<compile_context>
chip_gen: v5e
topology: v5e:2x2
jax: 0.10.0
libtpu: 0.0.40
codegen_flags: <defaults>
</compile_context>

<pallas_src>
import functools

import jax
import jax.numpy as jnp
from jax import lax
from jax.experimental import pallas as pl
from jax.experimental.pallas import tpu as pltpu

_MASK_VALUE = -0.7 * float(jnp.finfo(jnp.float32).max)


def _vmem_limit_bytes():
    """Per-generation VMEM budget: ~3/4 of physical, capped at 96 MB."""
    phys = 64 * 1024 * 1024
    try:
        info = pltpu.get_tpu_info()
        phys = int(getattr(info, "vmem_capacity_bytes", phys))
    except Exception:
        pass
    return max(32 * 1024 * 1024, min((phys * 3) // 4, 96 * 1024 * 1024))


# --------------------------------------------------------------------------
# Projection kernel: (B,S,E) x group-weight -> per-head (B,H,S,D) outputs.
# Grid = (batch, head_group, seq_tile); the weight is tiled by head group so
# a huge fused (E,3E) block never has to be VMEM-resident.
# --------------------------------------------------------------------------
def _proj_heads_kernel(x_ref, w_ref, *o_refs, heads_per_grp, head_dim):
    # x_ref: (1, TS, E); w_ref: (1, E, n_out*g*D); o_refs[t]: (1, g, TS, D)
    proj = jnp.dot(x_ref[0], w_ref[0], preferred_element_type=jnp.float32)
    proj = proj.astype(o_refs[0].dtype)
    g, D = heads_per_grp, head_dim
    for t, o_ref in enumerate(o_refs):
        for i in range(g):
            col = (t * g + i) * D
            o_ref[0, i] = proj[:, col:col + D]


def _build_w_groups(w_list, num_heads, head_dim, heads_per_grp, dtype):
    """Stack per-head-group column blocks of each weight into one tensor.

    Returns (n_groups, E, n_out*g*D); within group j the columns are ordered
    [tensor0 heads jg..jg+g-1 | tensor1 heads ... | ...] to match the kernel.
    """
    g, D = heads_per_grp, head_dim
    n_groups = num_heads // g
    groups = []
    for j in range(n_groups):
        cols = [w[:, j * g * D:(j + 1) * g * D] for w in w_list]
        groups.append(jnp.concatenate(cols, axis=1) if len(cols) > 1 else cols[0])
    return jnp.stack(groups, axis=0).astype(dtype)


def _pick_heads_per_group(num_heads, head_dim, emb, n_out, itemsize, budget):
    for g in range(num_heads, 0, -1):
        if num_heads % g == 0 and emb * n_out * g * head_dim * itemsize <= budget:
            return g
    return 1


def _project_to_heads(x, w_groups, *, n_out, heads_per_grp, head_dim,
                      block_s, out_dtype, vmem_limit):
    B, S, E = x.shape
    n_groups = w_groups.shape[0]
    H = n_groups * heads_per_grp
    w_cols = w_groups.shape[2]

    kernel = functools.partial(_proj_heads_kernel,
                               heads_per_grp=heads_per_grp, head_dim=head_dim)
    out_shapes = tuple(jax.ShapeDtypeStruct((B, H, S, head_dim), out_dtype)
                       for _ in range(n_out))
    out_specs = tuple(
        pl.BlockSpec((1, heads_per_grp, block_s, head_dim),
                     lambda b, j, st: (b, j, st, 0))
        for _ in range(n_out))

    return pl.pallas_call(
        kernel,
        out_shape=out_shapes,
        grid_spec=pltpu.PrefetchScalarGridSpec(
            num_scalar_prefetch=0,
            grid=(B, n_groups, S // block_s),   # seq innermost: weight group
            in_specs=[                          # is fetched once per (b, j)
                pl.BlockSpec((1, block_s, E), lambda b, j, st: (b, st, 0)),
                pl.BlockSpec((1, E, w_cols), lambda b, j, st: (j, 0, 0)),
            ],
            out_specs=out_specs,
        ),
        compiler_params=pltpu.CompilerParams(
            dimension_semantics=("parallel", "parallel", "parallel"),
            vmem_limit_bytes=vmem_limit,
        ),
    )(x, w_groups)


# --------------------------------------------------------------------------
# Flash attention with fused per-head output projection.
# grid = (batch, q_block, head); the KV sweep is an in-kernel loop of dynamic
# trip count (causal: only blocks up to the diagonal), with manual
# double-buffered DMA of (block_k, D) K/V tiles from HBM.
# --------------------------------------------------------------------------
def _flash_kernel(q_ref, k_hbm, v_hbm, wo_ref, bo_ref, o_ref,
                  kbuf, vbuf, sem, m_sc, l_sc, acc_sc, oacc_sc,
                  *, block_q, block_k, num_heads, kv_blocks_total, wo_resident):
    b = pl.program_id(0)
    qb = pl.program_id(1)
    h = pl.program_id(2)

    q_start = qb * block_q
    # Causal: this q tile only needs keys 0 .. q_start + block_q - 1.
    num_kv = jnp.minimum((q_start + block_q - 1) // block_k + 1, kv_blocks_total)

    @pl.when(h == 0)
    def _init_out_proj_acc():
        oacc_sc[...] = jnp.zeros(oacc_sc.shape, oacc_sc.dtype)

    # Online-softmax state.  Finite large-negative m init is safe because
    # every processed row has at least one unmasked key (key index 0).
    m_sc[...] = jnp.full(m_sc.shape, _MASK_VALUE, m_sc.dtype)
    l_sc[...] = jnp.zeros(l_sc.shape, l_sc.dtype)
    acc_sc[...] = jnp.zeros(acc_sc.shape, acc_sc.dtype)

    def kv_copies(s, slot):
        start = pl.multiple_of(s * block_k, block_k)
        k_cp = pltpu.make_async_copy(
            k_hbm.at[b, h, pl.ds(start, block_k), :], kbuf.at[slot],
            sem.at[0, slot])
        v_cp = pltpu.make_async_copy(
            v_hbm.at[b, h, pl.ds(start, block_k), :], vbuf.at[slot],
            sem.at[1, slot])
        return k_cp, v_cp

    # Prime the double buffer with the first KV block.
    k0, v0 = kv_copies(0, 0)
    k0.start()
    v0.start()

    q = q_ref[0, 0]          # (TQ, D), already scaled by 1/sqrt(D)

    @pl.loop(0, num_kv)
    def _kv_step(s):
        slot = s & 1
        k_cur, v_cur = kv_copies(s, slot)
        k_cur.wait()
        v_cur.wait()

        @pl.when(s + 1 < num_kv)
        def _prefetch_next():
            k_nxt, v_nxt = kv_copies(s + 1, 1 - slot)
            k_nxt.start()
            v_nxt.start()

        k = kbuf[slot]        # (TK, D)
        v = vbuf[slot]        # (TK, D)
        # Contraction on last dims of both operands -> no explicit k.T.
        scores = lax.dot_general(q, k, (((1,), (1,)), ((), ())),
                                 preferred_element_type=jnp.float32)  # (TQ,TK)

        def online_update(sc):
            m_prev = m_sc[...]
            m_new = jnp.maximum(m_prev, jnp.max(sc, axis=-1, keepdims=True))
            alpha = jnp.exp(m_prev - m_new)
            p = jnp.exp(sc - m_new)
            l_sc[...] = alpha * l_sc[...] + jnp.sum(p, axis=-1, keepdims=True)
            acc_sc[...] = alpha * acc_sc[...] + jnp.dot(
                p.astype(v.dtype), v, preferred_element_type=jnp.float32)
            m_sc[...] = m_new

        k_start = s * block_k
        # Only diagonal-straddling blocks pay for the iota + where mask.
        needs_mask = (k_start + block_k - 1) > q_start

        @pl.when(needs_mask)
        def _masked():
            row = q_start + lax.broadcasted_iota(jnp.int32, scores.shape, 0)
            col = k_start + lax.broadcasted_iota(jnp.int32, scores.shape, 1)
            online_update(jnp.where(col > row, _MASK_VALUE, scores))

        @pl.when(jnp.logical_not(needs_mask))
        def _unmasked():
            online_update(scores)

    # Normalize this head and fold it straight into the output-projection
    # accumulator (no head concatenate, no (S,E) attention tensor).
    wo = wo_ref[h] if wo_resident else wo_ref[0]          # (D, E)
    head_out = acc_sc[...] * pl.reciprocal(l_sc[...], approx=True)
    oacc_sc[...] += jnp.dot(head_out.astype(wo.dtype), wo,
                            preferred_element_type=jnp.float32)

    @pl.when(h == num_heads - 1)
    def _write_output():
        o_ref[0] = (oacc_sc[...] + bo_ref[...]).astype(o_ref.dtype)


def _flash_attention(q, k, v, wo_heads, bias, *, block_q, block_k,
                     out_dtype, vmem_limit, wo_resident):
    # q, k, v: (B, H, S, D) (q pre-scaled); wo_heads: (H, D, E); bias: (1, E)
    B, H, Sq, D = q.shape
    Skv = k.shape[2]
    E = wo_heads.shape[-1]
    kv_blocks_total = Skv // block_k

    if wo_resident:
        wo_spec = pl.BlockSpec((H, D, E), lambda b, qb, h: (0, 0, 0))
    else:
        wo_spec = pl.BlockSpec((1, D, E), lambda b, qb, h: (h, 0, 0))

    kernel = functools.partial(
        _flash_kernel, block_q=block_q, block_k=block_k, num_heads=H,
        kv_blocks_total=kv_blocks_total, wo_resident=wo_resident)

    return pl.pallas_call(
        kernel,
        out_shape=jax.ShapeDtypeStruct((B, Sq, E), out_dtype),
        grid_spec=pltpu.PrefetchScalarGridSpec(
            num_scalar_prefetch=0,
            grid=(B, Sq // block_q, H),
            in_specs=[
                pl.BlockSpec((1, 1, block_q, D), lambda b, qb, h: (b, h, qb, 0)),
                pl.BlockSpec(memory_space=pl.ANY),   # K: full (B,H,Skv,D) in HBM
                pl.BlockSpec(memory_space=pl.ANY),   # V: full (B,H,Skv,D) in HBM
                wo_spec,
                pl.BlockSpec((1, E), lambda b, qb, h: (0, 0)),
            ],
            out_specs=pl.BlockSpec((1, block_q, E), lambda b, qb, h: (b, qb, 0)),
            scratch_shapes=[
                pltpu.VMEM((2, block_k, D), k.dtype),   # K double buffer
                pltpu.VMEM((2, block_k, D), v.dtype),   # V double buffer
                pltpu.SemaphoreType.DMA((2, 2)),
                pltpu.VMEM((block_q, 1), jnp.float32),  # running max m
                pltpu.VMEM((block_q, 1), jnp.float32),  # running sum l
                pltpu.VMEM((block_q, D), jnp.float32),  # per-head P@V acc
                pltpu.VMEM((block_q, E), jnp.float32),  # output-proj acc
            ],
        ),
        compiler_params=pltpu.CompilerParams(
            # (B, q_block) stay parallel for v7x megacore; head is serial
            # because the fused out-projection accumulates across heads.
            dimension_semantics=("parallel", "parallel", "arbitrary"),
            vmem_limit_bytes=vmem_limit,
        ),
    )(q, k, v, wo_heads, bias)


# --------------------------------------------------------------------------
# Public wrapper (matches the PyTorch module forward, dropout=0, no mask)
# --------------------------------------------------------------------------
def causal_multihead_attention(query, key, value, wq_t, wk_t, wv_t, wo_t, bo,
                               *, num_heads, block_q=256, block_k=512,
                               block_s=256, matmul_dtype=jnp.bfloat16,
                               proj_heads_per_group=None, wo_resident=None):
    """query/key/value: (B, S, E); w*_t: (E, E) pre-transposed to
    (in_features, out_features); bo: (E,) out_proj bias."""
    B, Sq, E = query.shape
    Bk, Skv, Ek = key.shape
    assert Ek == E and Bk == B and value.shape == key.shape
    assert E % num_heads == 0, "embed_dim must be divisible by num_heads"
    D = E // num_heads
    assert D % 8 == 0, "head_dim must be a multiple of 8 for TPU sublane tiling"

    vmem_limit = _vmem_limit_bytes()
    itemsize = jnp.dtype(matmul_dtype).itemsize

    block_q = min(block_q, Sq)
    block_k = min(block_k, Skv)
    bs_q = min(block_s, Sq)
    bs_kv = min(block_s, Skv)
    assert Sq % block_q == 0 and Skv % block_k == 0, \
        "seq_len must be divisible by the attention tile sizes"
    assert Sq % bs_q == 0 and Skv % bs_kv == 0, \
        "seq_len must be divisible by the projection tile size"

    scale = 1.0 / (D ** 0.5)
    wq_scaled = wq_t * scale          # fold softmax scale into the Q projection
    w_budget = max(vmem_limit // 8, E * D * itemsize)

    if query is key and key is value:
        # Self-attention: fused x @ [Wq|Wk|Wv], tiled over head groups.
        g = proj_heads_per_group or _pick_heads_per_group(
            num_heads, D, E, 3, itemsize, w_budget)
        assert num_heads % g == 0
        wg = _build_w_groups([wq_scaled, wk_t, wv_t], num_heads, D, g, matmul_dtype)
        q_h, k_h, v_h = _project_to_heads(
            query.astype(matmul_dtype), wg, n_out=3, heads_per_grp=g,
            head_dim=D, block_s=bs_q, out_dtype=matmul_dtype,
            vmem_limit=vmem_limit)
    else:
        g = proj_heads_per_group or _pick_heads_per_group(
            num_heads, D, E, 1, itemsize, w_budget)
        assert num_heads % g == 0

        def proj(x, w, bs):
            wgx = _build_w_groups([w], num_heads, D, g, matmul_dtype)
            (out,) = _project_to_heads(
                x.astype(matmul_dtype), wgx, n_out=1, heads_per_grp=g,
                head_dim=D, block_s=bs, out_dtype=matmul_dtype,
                vmem_limit=vmem_limit)
            return out

        q_h = proj(query, wq_scaled, bs_q)
        k_h = proj(key, wk_t, bs_kv)
        v_h = proj(value, wv_t, bs_kv)

    wo_heads = wo_t.reshape(num_heads, D, E).astype(matmul_dtype)
    bias = bo.reshape(1, E).astype(jnp.float32)
    if wo_resident is None:
        wo_resident = (num_heads * D * E * itemsize) <= vmem_limit // 4

    return _flash_attention(q_h, k_h, v_h, wo_heads, bias,
                            block_q=block_q, block_k=block_k,
                            out_dtype=query.dtype, vmem_limit=vmem_limit,
                            wo_resident=wo_resident)


# --------------------------------------------------------------------------
# Pure-JAX reference (mirrors the PyTorch forward; optional bf16 matmul casts
# so the kernel's intentional precision choice can be isolated in testing).
# --------------------------------------------------------------------------
def _reference(query, key, value, wq_t, wk_t, wv_t, wo_t, bo, num_heads,
               matmul_dtype=jnp.float32):
    B, S, E = query.shape
    H = num_heads
    D = E // H
    f32 = jnp.float32
    c = lambda a: a.astype(matmul_dtype)
    scale = 1.0 / (D ** 0.5)
    q = jnp.einsum("bse,ef->bsf", c(query), c(wq_t * scale), preferred_element_type=f32)
    k = jnp.einsum("bse,ef->bsf", c(key), c(wk_t), preferred_element_type=f32)
    v = jnp.einsum("bse,ef->bsf", c(value), c(wv_t), preferred_element_type=f32)

    def heads(t):
        return t.reshape(B, S, H, D).transpose(0, 2, 1, 3)

    q, k, v = heads(q), heads(k), heads(v)
    s = jnp.einsum("bhqd,bhkd->bhqk", c(q), c(k), preferred_element_type=f32)
    causal = jnp.triu(jnp.ones((S, S), dtype=bool), k=1)
    s = jnp.where(causal[None, None], -jnp.inf, s)
    p = jax.nn.softmax(s, axis=-1)
    o = jnp.einsum("bhqk,bhkd->bhqd", c(p), c(v), preferred_element_type=f32)
    o = o.transpose(0, 2, 1, 3).reshape(B, S, E)
    return jnp.einsum("bse,ef->bsf", c(o), c(wo_t), preferred_element_type=f32) + bo


if __name__ == "__main__":
    key0 = jax.random.PRNGKey(0)
    k_x, k_k, k_v, k_wq, k_wk, k_wv, k_wo, k_bo = jax.random.split(key0, 8)

    # ---- Test 1: self-attention, bf16 MXU path, fused grouped QKV proj,
    #      resident Wo, multi-block causal KV loop (block_q != block_k). ----
    B, S, E, H = 2, 512, 128, 4
    x = jax.random.normal(k_x, (B, S, E), dtype=jnp.float32)
    w_scale = 1.0 / (E ** 0.5)
    wq = jax.random.normal(k_wq, (E, E), dtype=jnp.float32) * w_scale  # (out,in)
    wk = jax.random.normal(k_wk, (E, E), dtype=jnp.float32) * w_scale
    wv = jax.random.normal(k_wv, (E, E), dtype=jnp.float32) * w_scale
    wo = jax.random.normal(k_wo, (E, E), dtype=jnp.float32) * w_scale
    bo = jax.random.normal(k_bo, (E,), dtype=jnp.float32) * w_scale
    wq_t, wk_t, wv_t, wo_t = wq.T, wk.T, wv.T, wo.T   # (in, out)

    out_bf16 = causal_multihead_attention(x, x, x, wq_t, wk_t, wv_t, wo_t, bo,
                                          num_heads=H, block_q=256, block_k=128)
    out_bf16 = jax.block_until_ready(out_bf16)
    ref_bf16 = _reference(x, x, x, wq_t, wk_t, wv_t, wo_t, bo, H,
                          matmul_dtype=jnp.bfloat16)
    assert out_bf16.shape == (B, S, E)
    assert jnp.allclose(out_bf16, ref_bf16, atol=5e-2, rtol=5e-2), \
        "bf16 kernel mismatch vs reference"

    # ---- Test 2: distinct key/value (non-fused projections, 2 head groups),
    #      f32 matmuls, per-head-streamed Wo fallback path. ----
    B2, S2 = 2, 256
    x2 = jax.random.normal(k_x, (B2, S2, E), dtype=jnp.float32)
    xk = jax.random.normal(k_k, (B2, S2, E), dtype=jnp.float32)
    xv = jax.random.normal(k_v, (B2, S2, E), dtype=jnp.float32)
    out_f32 = causal_multihead_attention(x2, xk, xv, wq_t, wk_t, wv_t, wo_t, bo,
                                         num_heads=H, block_q=128, block_k=128,
                                         block_s=128, matmul_dtype=jnp.float32,
                                         proj_heads_per_group=2,
                                         wo_resident=False)
    out_f32 = jax.block_until_ready(out_f32)
    ref_f32 = _reference(x2, xk, xv, wq_t, wk_t, wv_t, wo_t, bo, H)
    assert jnp.allclose(out_f32, ref_f32, atol=2e-2, rtol=2e-2), \
        "f32 kernel mismatch vs reference"

    print("KERNEL_OK")
</pallas_src>

<mosaic_0001>
module attributes {stable_mosaic.version = 11 : i64} {
  func.func @_proj_heads_kernel(%arg0: i32, %arg1: i32, %arg2: i32, %arg3: memref<1x256x128xbf16, #tpu.memory_space<vmem>>, %arg4: memref<1x128x384xbf16, #tpu.memory_space<vmem>>, %arg5: memref<1x4x256x32xbf16, #tpu.memory_space<vmem>>, %arg6: memref<1x4x256x32xbf16, #tpu.memory_space<vmem>>, %arg7: memref<1x4x256x32xbf16, #tpu.memory_space<vmem>>) attributes {dimension_semantics = [#tpu.dimension_semantics<parallel>, #tpu.dimension_semantics<parallel>, #tpu.dimension_semantics<parallel>], iteration_bounds = array<i64: 2, 1, 2>, scalar_prefetch = 0 : i64, scratch_operands = 0 : i64, tpu.core_type = #tpu.core_type<tc>, window_params = [{transform_indices = @transform_0, window_bounds = array<i64: 1, 256, 128>}, {transform_indices = @transform_1, window_bounds = array<i64: 1, 128, 384>}, {transform_indices = @transform_2, window_bounds = array<i64: 1, 4, 256, 32>}, {transform_indices = @transform_3, window_bounds = array<i64: 1, 4, 256, 32>}, {transform_indices = @transform_4, window_bounds = array<i64: 1, 4, 256, 32>}]} {
    %c0 = arith.constant 0 : index
    %c0_0 = arith.constant 0 : index
    %c0_1 = arith.constant 0 : index
    %0 = vector.load %arg3[%c0, %c0_0, %c0_1] : memref<1x256x128xbf16, #tpu.memory_space<vmem>>, vector<1x256x128xbf16>
    %1 = vector.shape_cast %0 : vector<1x256x128xbf16> to vector<256x128xbf16>
    %c0_2 = arith.constant 0 : index
    %c0_3 = arith.constant 0 : index
    %c0_4 = arith.constant 0 : index
    %2 = vector.load %arg4[%c0_2, %c0_3, %c0_4] : memref<1x128x384xbf16, #tpu.memory_space<vmem>>, vector<1x128x384xbf16>
    %3 = vector.shape_cast %2 : vector<1x128x384xbf16> to vector<128x384xbf16>
    %cst = arith.constant dense<0.000000e+00> : vector<256x384xf32>
    %4 = tpu.matmul %1, %3, %cst {dimension_numbers = #tpu.dot_dimension_numbers<[1], [0], [0], [1], [0, 0, 1, 1], [], []>} : vector<256x128xbf16>, vector<128x384xbf16>, vector<256x384xf32> -> vector<256x384xf32>
    %5 = arith.truncf %4 : vector<256x384xf32> to vector<256x384xbf16>
    %6 = vector.extract_strided_slice %5 {offsets = [0, 0], sizes = [256, 32], strides = [1, 1]} : vector<256x384xbf16> to vector<256x32xbf16>
    %c0_5 = arith.constant 0 : index
    %c0_6 = arith.constant 0 : index
    %c0_7 = arith.constant 0 : index
    %c0_8 = arith.constant 0 : index
    %7 = vector.load %arg5[%c0_5, %c0_6, %c0_7, %c0_8] : memref<1x4x256x32xbf16, #tpu.memory_space<vmem>>, vector<1x1x256x32xbf16>
    %8 = vector.shape_cast %7 : vector<1x1x256x32xbf16> to vector<256x32xbf16>
    %9 = vector.shape_cast %6 : vector<256x32xbf16> to vector<1x1x256x32xbf16>
    tpu.vector_store %arg5[%c0_5, %c0_6, %c0_7, %c0_8], %9 {strides = array<i32>} : memref<1x4x256x32xbf16, #tpu.memory_space<vmem>>, vector<1x1x256x32xbf16>,
    %10 = vector.extract_strided_slice %5 {offsets = [0, 32], sizes = [256, 32], strides = [1, 1]} : vector<256x384xbf16> to vector<256x32xbf16>
    %c0_9 = arith.constant 0 : index
    %c1 = arith.constant 1 : index
    %c0_10 = arith.constant 0 : index
    %c0_11 = arith.constant 0 : index
    %11 = vector.load %arg5[%c0_9, %c1, %c0_10, %c0_11] : memref<1x4x256x32xbf16, #tpu.memory_space<vmem>>, vector<1x1x256x32xbf16>
    %12 = vector.shape_cast %11 : vector<1x1x256x32xbf16> to vector<256x32xbf16>
    %13 = vector.shape_cast %10 : vector<256x32xbf16> to vector<1x1x256x32xbf16>
    tpu.vector_store %arg5[%c0_9, %c1, %c0_10, %c0_11], %13 {strides = array<i32>} : memref<1x4x256x32xbf16, #tpu.memory_space<vmem>>, vector<1x1x256x32xbf16>,
    %14 = vector.extract_strided_slice %5 {offsets = [0, 64], sizes = [256, 32], strides = [1, 1]} : vector<256x384xbf16> to vector<256x32xbf16>
    %c0_12 = arith.constant 0 : index
    %c2 = arith.constant 2 : index
    %c0_13 = arith.constant 0 : index
    %c0_14 = arith.constant 0 : index
    %15 = vector.load %arg5[%c0_12, %c2, %c0_13, %c0_14] : memref<1x4x256x32xbf16, #tpu.memory_space<vmem>>, vector<1x1x256x32xbf16>
    %16 = vector.shape_cast %15 : vector<1x1x256x32xbf16> to vector<256x32xbf16>
    %17 = vector.shape_cast %14 : vector<256x32xbf16> to vector<1x1x256x32xbf16>
    tpu.vector_store %arg5[%c0_12, %c2, %c0_13, %c0_14], %17 {strides = array<i32>} : memref<1x4x256x32xbf16, #tpu.memory_space<vmem>>, vector<1x1x256x32xbf16>,
    %18 = vector.extract_strided_slice %5 {offsets = [0, 96], sizes = [256, 32], strides = [1, 1]} : vector<256x384xbf16> to vector<256x32xbf16>
    %c0_15 = arith.constant 0 : index
    %c3 = arith.constant 3 : index
    %c0_16 = arith.constant 0 : index
    %c0_17 = arith.constant 0 : index
    %19 = vector.load %arg5[%c0_15, %c3, %c0_16, %c0_17] : memref<1x4x256x32xbf16, #tpu.memory_space<vmem>>, vector<1x1x256x32xbf16>
    %20 = vector.shape_cast %19 : vector<1x1x256x32xbf16> to vector<256x32xbf16>
    %21 = vector.shape_cast %18 : vector<256x32xbf16> to vector<1x1x256x32xbf16>
    tpu.vector_store %arg5[%c0_15, %c3, %c0_16, %c0_17], %21 {strides = array<i32>} : memref<1x4x256x32xbf16, #tpu.memory_space<vmem>>, vector<1x1x256x32xbf16>,
    %22 = vector.extract_strided_slice %5 {offsets = [0, 128], sizes = [256, 32], strides = [1, 1]} : vector<256x384xbf16> to vector<256x32xbf16>
    %c0_18 = arith.constant 0 : index
    %c0_19 = arith.constant 0 : index
    %c0_20 = arith.constant 0 : index
    %c0_21 = arith.constant 0 : index
    %23 = vector.load %arg6[%c0_18, %c0_19, %c0_20, %c0_21] : memref<1x4x256x32xbf16, #tpu.memory_space<vmem>>, vector<1x1x256x32xbf16>
    %24 = vector.shape_cast %23 : vector<1x1x256x32xbf16> to vector<256x32xbf16>
    %25 = vector.shape_cast %22 : vector<256x32xbf16> to vector<1x1x256x32xbf16>
    tpu.vector_store %arg6[%c0_18, %c0_19, %c0_20, %c0_21], %25 {strides = array<i32>} : memref<1x4x256x32xbf16, #tpu.memory_space<vmem>>, vector<1x1x256x32xbf16>,
    %26 = vector.extract_strided_slice %5 {offsets = [0, 160], sizes = [256, 32], strides = [1, 1]} : vector<256x384xbf16> to vector<256x32xbf16>
    %c0_22 = arith.constant 0 : index
    %c1_23 = arith.constant 1 : index
    %c0_24 = arith.constant 0 : index
    %c0_25 = arith.constant 0 : index
    %27 = vector.load %arg6[%c0_22, %c1_23, %c0_24, %c0_25] : memref<1x4x256x32xbf16, #tpu.memory_space<vmem>>, vector<1x1x256x32xbf16>
    %28 = vector.shape_cast %27 : vector<1x1x256x32xbf16> to vector<256x32xbf16>
    %29 = vector.shape_cast %26 : vector<256x32xbf16> to vector<1x1x256x32xbf16>
    tpu.vector_store %arg6[%c0_22, %c1_23, %c0_24, %c0_25], %29 {strides = array<i32>} : memref<1x4x256x32xbf16, #tpu.memory_space<vmem>>, vector<1x1x256x32xbf16>,
    %30 = vector.extract_strided_slice %5 {offsets = [0, 192], sizes = [256, 32], strides = [1, 1]} : vector<256x384xbf16> to vector<256x32xbf16>
    %c0_26 = arith.constant 0 : index
    %c2_27 = arith.constant 2 : index
    %c0_28 = arith.constant 0 : index
    %c0_29 = arith.constant 0 : index
    %31 = vector.load %arg6[%c0_26, %c2_27, %c0_28, %c0_29] : memref<1x4x256x32xbf16, #tpu.memory_space<vmem>>, vector<1x1x256x32xbf16>
    %32 = vector.shape_cast %31 : vector<1x1x256x32xbf16> to vector<256x32xbf16>
    %33 = vector.shape_cast %30 : vector<256x32xbf16> to vector<1x1x256x32xbf16>
    tpu.vector_store %arg6[%c0_26, %c2_27, %c0_28, %c0_29], %33 {strides = array<i32>} : memref<1x4x256x32xbf16, #tpu.memory_space<vmem>>, vector<1x1x256x32xbf16>,
    %34 = vector.extract_strided_slice %5 {offsets = [0, 224], sizes = [256, 32], strides = [1, 1]} : vector<256x384xbf16> to vector<256x32xbf16>
    %c0_30 = arith.constant 0 : index
    %c3_31 = arith.constant 3 : index
    %c0_32 = arith.constant 0 : index
    %c0_33 = arith.constant 0 : index
    %35 = vector.load %arg6[%c0_30, %c3_31, %c0_32, %c0_33] : memref<1x4x256x32xbf16, #tpu.memory_space<vmem>>, vector<1x1x256x32xbf16>
    %36 = vector.shape_cast %35 : vector<1x1x256x32xbf16> to vector<256x32xbf16>
    %37 = vector.shape_cast %34 : vector<256x32xbf16> to vector<1x1x256x32xbf16>
    tpu.vector_store %arg6[%c0_30, %c3_31, %c0_32, %c0_33], %37 {strides = array<i32>} : memref<1x4x256x32xbf16, #tpu.memory_space<vmem>>, vector<1x1x256x32xbf16>,
    %38 = vector.extract_strided_slice %5 {offsets = [0, 256], sizes = [256, 32], strides = [1, 1]} : vector<256x384xbf16> to vector<256x32xbf16>
    %c0_34 = arith.constant 0 : index
    %c0_35 = arith.constant 0 : index
    %c0_36 = arith.constant 0 : index
    %c0_37 = arith.constant 0 : index
    %39 = vector.load %arg7[%c0_34, %c0_35, %c0_36, %c0_37] : memref<1x4x256x32xbf16, #tpu.memory_space<vmem>>, vector<1x1x256x32xbf16>
    %40 = vector.shape_cast %39 : vector<1x1x256x32xbf16> to vector<256x32xbf16>
    %41 = vector.shape_cast %38 : vector<256x32xbf16> to vector<1x1x256x32xbf16>
    tpu.vector_store %arg7[%c0_34, %c0_35, %c0_36, %c0_37], %41 {strides = array<i32>} : memref<1x4x256x32xbf16, #tpu.memory_space<vmem>>, vector<1x1x256x32xbf16>,
    %42 = vector.extract_strided_slice %5 {offsets = [0, 288], sizes = [256, 32], strides = [1, 1]} : vector<256x384xbf16> to vector<256x32xbf16>
    %c0_38 = arith.constant 0 : index
    %c1_39 = arith.constant 1 : index
    %c0_40 = arith.constant 0 : index
    %c0_41 = arith.constant 0 : index
    %43 = vector.load %arg7[%c0_38, %c1_39, %c0_40, %c0_41] : memref<1x4x256x32xbf16, #tpu.memory_space<vmem>>, vector<1x1x256x32xbf16>
    %44 = vector.shape_cast %43 : vector<1x1x256x32xbf16> to vector<256x32xbf16>
    %45 = vector.shape_cast %42 : vector<256x32xbf16> to vector<1x1x256x32xbf16>
    tpu.vector_store %arg7[%c0_38, %c1_39, %c0_40, %c0_41], %45 {strides = array<i32>} : memref<1x4x256x32xbf16, #tpu.memory_space<vmem>>, vector<1x1x256x32xbf16>,
    %46 = vector.extract_strided_slice %5 {offsets = [0, 320], sizes = [256, 32], strides = [1, 1]} : vector<256x384xbf16> to vector<256x32xbf16>
    %c0_42 = arith.constant 0 : index
    %c2_43 = arith.constant 2 : index
    %c0_44 = arith.constant 0 : index
    %c0_45 = arith.constant 0 : index
    %47 = vector.load %arg7[%c0_42, %c2_43, %c0_44, %c0_45] : memref<1x4x256x32xbf16, #tpu.memory_space<vmem>>, vector<1x1x256x32xbf16>
    %48 = vector.shape_cast %47 : vector<1x1x256x32xbf16> to vector<256x32xbf16>
    %49 = vector.shape_cast %46 : vector<256x32xbf16> to vector<1x1x256x32xbf16>
    tpu.vector_store %arg7[%c0_42, %c2_43, %c0_44, %c0_45], %49 {strides = array<i32>} : memref<1x4x256x32xbf16, #tpu.memory_space<vmem>>, vector<1x1x256x32xbf16>,
    %50 = vector.extract_strided_slice %5 {offsets = [0, 352], sizes = [256, 32], strides = [1, 1]} : vector<256x384xbf16> to vector<256x32xbf16>
    %c0_46 = arith.constant 0 : index
    %c3_47 = arith.constant 3 : index
    %c0_48 = arith.constant 0 : index
    %c0_49 = arith.constant 0 : index
    %51 = vector.load %arg7[%c0_46, %c3_47, %c0_48, %c0_49] : memref<1x4x256x32xbf16, #tpu.memory_space<vmem>>, vector<1x1x256x32xbf16>
    %52 = vector.shape_cast %51 : vector<1x1x256x32xbf16> to vector<256x32xbf16>
    %53 = vector.shape_cast %50 : vector<256x32xbf16> to vector<1x1x256x32xbf16>
    tpu.vector_store %arg7[%c0_46, %c3_47, %c0_48, %c0_49], %53 {strides = array<i32>} : memref<1x4x256x32xbf16, #tpu.memory_space<vmem>>, vector<1x1x256x32xbf16>,
    return
  }
  func.func @transform_0(%arg0: i32, %arg1: i32, %arg2: i32) -> (i32, i32, i32) {
    %c0_i32 = arith.constant 0 : i32
    %c0_i32_0 = arith.constant 0 : i32
    return %arg0, %arg2, %c0_i32 : i32, i32, i32
  }
  func.func @transform_1(%arg0: i32, %arg1: i32, %arg2: i32) -> (i32, i32, i32) {
    %c0_i32 = arith.constant 0 : i32
    %c0_i32_0 = arith.constant 0 : i32
    %c0_i32_1 = arith.constant 0 : i32
    return %arg1, %c0_i32, %c0_i32_0 : i32, i32, i32
  }
  func.func @transform_2(%arg0: i32, %arg1: i32, %arg2: i32) -> (i32, i32, i32, i32) {
    %c0_i32 = arith.constant 0 : i32
    %c0_i32_0 = arith.constant 0 : i32
    return %arg0, %arg1, %arg2, %c0_i32 : i32, i32, i32, i32
  }
  func.func @transform_3(%arg0: i32, %arg1: i32, %arg2: i32) -> (i32, i32, i32, i32) {
    %c0_i32 = arith.constant 0 : i32
    %c0_i32_0 = arith.constant 0 : i32
    return %arg0, %arg1, %arg2, %c0_i32 : i32, i32, i32, i32
  }
  func.func @transform_4(%arg0: i32, %arg1: i32, %arg2: i32) -> (i32, i32, i32, i32) {
    %c0_i32 = arith.constant 0 : i32
    %c0_i32_0 = arith.constant 0 : i32
    return %arg0, %arg1, %arg2, %c0_i32 : i32, i32, i32, i32
  }
}

</mosaic_0001>

<bundles_post_ra>
// kernel: tpu_custom_call.1
= control target key start
LH: loop header
LB: loop body
LE: loop exit
PB: predicated region body
PF: predicated region fallthrough
CT: control target
= control target key end

     0   :  { %s6846_s0 = inlined_call_operand.hbm [shape: bf16[2,512,128], index: 0, kind: input, shape index: {}]   ;;  %s6847_s1 = inlined_call_operand.hbm [shape: bf16[1,128,384], index: 1, kind: input, shape index: {}]   ;;  %s6848_s2 = inlined_call_operand.vmem [shape: bf16[2,4,512,32], index: 2, kind: output, shape index: {0}]   ;;  %s6849_s3 = inlined_call_operand.vmem [shape: bf16[2,4,512,32], index: 3, kind: output, shape index: {1}]   ;;  %s6850_s4 = inlined_call_operand.vmem [shape: bf16[2,4,512,32], index: 4, kind: output, shape index: {2}]  }
   0x1   :  { %6852 = sst [smem:[#allocation12_spill]] %s6847_s1 }
   0x2   :  { %6853 = sst [smem:[#allocation13_spill]] %s6848_s2 }
   0x3   :  { %6854 = sst [smem:[#allocation14_spill]] %s6849_s3 }
   0x4   :  { %6855 = sst [smem:[#allocation15_spill]] %s6850_s4 }
   0x5   :  { %10 = vsyncpa [#allocation3], 0 }
   0x6   :  { %12 = vsyncpa [#allocation3 + $0x1], 0 }
   0x7   :  { %13 = vsyncpa [#allocation5], 0  ;;  %s4852_s15 = smov 0   ;;  %s4854_s16 = smov 0  }
   0x8   :  { %s4856_s17 = smov 0   ;;  %s4858_s18 = smov 0  }
   0x9   :  { %s4860_s19 = smov 0   ;;  %s4862_s20 = smov 0  }
   0xa   :  { %s4864_s21 = smov 0   ;;  %s4866_s22 = smov 0  }
   0xb LB: > { %s4057_s23 = sadd.s32 4294967295, %s4817_s22   ;;  %p60_p0 = scmp.ne.s32.totalorder %s4793_s16, %s4789_s15  ;;  %s4817_s22 = sphi %s4866_s22, %s19_s22   ;;  %s4813_s21 = sphi %s4864_s21, %s6874_s21   ;;  %s4809_s20 = sphi %s4862_s20, %s6873_s20   ;;  %s4805_s19 = sphi %s4860_s19, %s6872_s19   ;;  %s4801_s18 = sphi %s4858_s18, %s6871_s18   ;;  %s4797_s17 = sphi %s4856_s17, %s6870_s17   ;;  %s4793_s16 = sphi %s4854_s16, %s6869_s16   ;;  %s4789_s15 = sphi %s4852_s15, %s6868_s15  }
   0xc   : > { %p4892_p1 = scmp.eq.s32.totalorder %s4057_s23, 0  ;;  %p4896_p2 = scmp.eq.s32.totalorder %s4057_s23, 3 }
   0xd   : > { %p4059_p3 = scmp.ge.s32.totalorder %s4817_s22, 1  ;;  %p187_p4 = scmp.lt.s32.totalorder %s4817_s22, 5 }
   0xe   : > { %p4904_p5 = por %p4892_p1, %p60_p0  ;;  %s6860_s1 = sld [smem:[#allocation12_spill]] }
   0xf   : > { %p4908_p6 = pnand %p4059_p3, %p187_p4  ;;  %s4819_s5 = smov [#allocation4]  }
  0x10   : > { %s203_s6 = sshll.u32 %s4819_s5, 4  ;;  %s4820_s7 = smov 192   ;;  %s204_s6 = int_to_ptr.vmem [resolvable:$true] %s203_s6 }
  0x11   : > { %p4604_p7 = pneg %p4908_p6  ;;  %s4821_s8 = smov 12  }
  0x12   : > { %s31_s9 = sadd.s32 1, %s4809_s20  ;;  %s38_s10 = sadd.s32 1, %s4813_s21 }
  0x13   : > { %p4605_p8 = pnand %p4604_p7, %p4892_p1  ;;  %p32_p9 = scmp.ge.s32.totalorder %s31_s9, 2 }
  0x14   : > { %s201_s30 = sshll.u32 %s6860_s1, 4  ;;  %s47_s11 = sadd.s32 1, %s4797_s17  ;;  %s202_s30 = int_to_ptr.hbm [resolvable:$true] %s201_s30 }
  0x15   : > { %4607 = dma.hbm_to_vmem [thread:$0]  (!%p4605_p8), %s202_s30, 3072, %s204_s6, [#allocation5], %s4820_s7, %s4820_s7, %s4821_s8  }
  0x16   : > { %p54_p10 = scmp.ne.s32.totalorder %s4797_s17, %s4793_s16  ;;  %p55_p11 = scmp.eq.s32.totalorder %s4817_s22, 0 }
  0x17   : > { %s6876_s9 = smov (%p32_p9, %s31_s9), 0  ;;  %s6878_s10 = smov (!%p32_p9, %s38_s10), %s4813_s21 }
  0x18   : > { %6861 = sst [smem:[#allocation11_spill]] %s6876_s9  ;;  %s43_s12 = ssub.s32 %s4809_s20, %s6876_s9 }
  0x19   : > { %p4930_p12 = por %p55_p11, %p54_p10  ;;  %p40_p13 = scmp.ge.s32.totalorder %s6878_s10, 2 }
  0x1a   : > { %p4936_p0 = por %p4896_p2, %p54_p10  ;;  %p4613_p3 = scmp.lt.s32.totalorder %s4817_s22, 4 }
  0x1b   : > { %s217_s15 = sand.u32 1, %s4797_s17   ;;  %s6880_s10 = smov (%p40_p13, %s6878_s10), 0 }
  0x1c   : > { %s4062_s23 = sshll.u32 %s217_s15, 7  ;;  %s42_s28 = ssub.s32 %s4813_s21, %s6880_s10 }
  0x1d   : > { %s44_s29 = sor.u32 %s43_s12, %s42_s28  ;;  %s4063_s30 = sshll.u32 %s4809_s20, 5 }
  0x1e   : > { %p45_p4 = scmp.eq.s32.totalorder %s44_s29, 0  ;;  %s4064_s5 = sshll.u32 %s4813_s21, 6 }
  0x1f   : > { %s226_s6 = sadd.s32 %s4064_s5, %s4063_s30  ;;  %s221_s7 = scalar_lea.vmem [#allocation2], %s4062_s23 }
  0x20   : > { %s231_s25 = sshll.u32 %s221_s7, 4  ;;  %s4065_s1 = sshll.u32 %s226_s6, 2  ;;  %s232_s25 = int_to_ptr.vmem [resolvable:$true] %s231_s25 }
  0x21   : > { %s4949_s8 = scalar_select %p45_p4, %s4797_s17, %s47_s11  }
  0x22   : > { %s228_s3 = scalar_lea.hbm %s6846_s0, %s4065_s1  ;;  %p4609_p2 = pnand %p4613_p3, %p4930_p12 }
  0x23   : > { %s229_s2 = sshll.u32 %s228_s3, 4  ;;  %s218_s12 = scalar_lea.sflag [#allocation3], %s217_s15  ;;  %s230_s2 = int_to_ptr.hbm [resolvable:$true] %s229_s2 }
  0x24   : > { %s4822_s28 = smov 64   ;;  %s4823_s29 = smov 4  }
  0x25   : > { %4611 = dma.hbm_to_vmem [thread:$0]  (!%p4609_p2), %s230_s2, 2048, %s232_s25, %s218_s12, %s4822_s28, %s4822_s28, %s4823_s29  }
  0x26   : > { %243 = sbr.rel (%p4908_p6) target bundleno = 981 (0x3d5), region = 28  ;;  %s4961_s11 = sand.u32 (!%p4908_p6), 1, %s4793_s16  }
  0x27   : > { %s4067_s4 = sshll.u32 (!%p4908_p6), %s4961_s11, 7  ;;  %s246_s1 = scalar_lea.sflag (!%p4908_p6), [#allocation3], %s4961_s11 }
  0x28   : > { %s4965_s9 = scalar_lea.vmem (!%p4908_p6), [#allocation2], %s4067_s4 }
  0x2b   : > { %4780 = dma.done.wait (%p4904_p5), %s246_s1, 2048  }
  0x2c   : > { %4782 = vsyncadd (%p4904_p5), %s246_s1, 4294965248 }
  0x2d   : > { %4784 = dma.done.wait (%p4892_p1), [#allocation5], 3072  }
  0x2e   : > { %4786 = vsyncadd (%p4892_p1), [#allocation5], 4294964224  ;;  %v4222_v0 = vld [vmem:[#allocation4 + $0xa8] sm:$0xf]  ;;  %v4572_v1 = vld [vmem:[#allocation4 + $0xb0] sm:$0xf0] }
  0x2f   : > { %v4571_v2 = vld [vmem:[#allocation4 + $0xac] sm:$0xf]  ;;  %v4223_v3 = vor.u32 %v4572_v1, %v4222_v0  ;;  %v4224_v4 = vld [vmem:[#allocation4 + $0xb4] sm:$0xf0]  ;;  %v4230_v5 = vld [vmem:[#allocation4 + $0xb0] sm:$0xf] }
  0x30   : > { %v4573_v6 = vld [vmem:[#allocation4 + $0xb8] sm:$0xf0]  ;;  %v4975_v7 = vor.u32 %v4571_v2, %v4224_v4  ;;  %v4210_v9 = vld [vmem:[#allocation4 + $0x90] sm:$0xf]  ;;  %v4568_v11 = vld [vmem:[#allocation4 + $0x94] sm:$0xf] }
  0x31   : > { %v4977_v8 = vor.u32 %v4573_v6, %v4230_v5  ;;  %v4569_v10 = vld [vmem:[#allocation4 + $0x98] sm:$0xf0]  ;;  %582 = vmatpush.bf16.msra.mxu0 %v4223_v3  ;;  %4574 = vmatpush.bf16.msra.mxu3 %v4223_v3  ;;  %v4212_v13 = vld [vmem:[#allocation4 + $0x9c] sm:$0xf0]  ;;  %v4218_v14 = vld [vmem:[#allocation4 + $0x98] sm:$0xf] }
  0x32   : > { %v4211_v12 = vor.u32 %v4569_v10, %v4210_v9  ;;  %v4570_v15 = vld [vmem:[#allocation4 + $0xa0] sm:$0xf0]  ;;  %671 = vmatpush.bf16.msra.mxu1 %v4975_v7  ;;  %v4981_v16 = vor.u32 %v4568_v11, %v4212_v13  ;;  %v4198_v18 = vld [vmem:[#allocation4 + $0x78] sm:$0xf]  ;;  %v4565_v20 = vld [vmem:[#allocation4 + $0x7c] sm:$0xf] }
  0x33   : > { %760 = vmatpush.bf16.msra.mxu2 %v4977_v8  ;;  %v4983_v17 = vor.u32 %v4570_v15, %v4218_v14  ;;  %v4566_v19 = vld [vmem:[#allocation4 + $0x80] sm:$0xf0]  ;;  %v4200_v21 = vld [vmem:[#allocation4 + $0x84] sm:$0xf0]  ;;  %v4206_v22 = vld [vmem:[#allocation4 + $0x80] sm:$0xf] }
  0x34   : > { %v4567_v23 = vld [vmem:[#allocation4 + $0x88] sm:$0xf0]  ;;  %v4199_v24 = vor.u32 %v4566_v19, %v4198_v18  ;;  %v4987_v25 = vor.u32 %v4565_v20, %v4200_v21  ;;  %v4186_v27 = vld [vmem:[#allocation4 + $0x60] sm:$0xf]  ;;  %v4562_v29 = vld [vmem:[#allocation4 + $0x64] sm:$0xf] }
  0x35   : > { %583 = vmatpush.bf16.msra.mxu0 %v4211_v12  ;;  %4575 = vmatpush.bf16.msra.mxu3 %v4211_v12  ;;  %v4989_v26 = vor.u32 %v4567_v23, %v4206_v22  ;;  %v4563_v28 = vld [vmem:[#allocation4 + $0x68] sm:$0xf0]  ;;  %v4188_v30 = vld [vmem:[#allocation4 + $0x6c] sm:$0xf0]  ;;  %v4194_v31 = vld [vmem:[#allocation4 + $0x68] sm:$0xf] }
  0x36   : > { %672 = vmatpush.bf16.msra.mxu1 %v4981_v16  ;;  %v4564_v32 = vld [vmem:[#allocation4 + $0x70] sm:$0xf0]  ;;  %v4187_v33 = vor.u32 %v4563_v28, %v4186_v27  ;;  %v4993_v34 = vor.u32 %v4562_v29, %v4188_v30  ;;  %v4174_v36 = vld [vmem:[#allocation4 + $0x48] sm:$0xf]  ;;  %v4559_v38 = vld [vmem:[#allocation4 + $0x4c] sm:$0xf] }
  0x37   : > { %761 = vmatpush.bf16.msra.mxu2 %v4983_v17  ;;  %v4995_v35 = vor.u32 %v4564_v32, %v4194_v31  ;;  %v4560_v37 = vld [vmem:[#allocation4 + $0x50] sm:$0xf0]  ;;  %v4176_v39 = vld [vmem:[#allocation4 + $0x54] sm:$0xf0]  ;;  %v4182_v40 = vld [vmem:[#allocation4 + $0x50] sm:$0xf] }
  0x38   : > { %v4561_v41 = vld [vmem:[#allocation4 + $0x58] sm:$0xf0]  ;;  %v4175_v42 = vor.u32 %v4560_v37, %v4174_v36  ;;  %v4179_v43 = vor.u32 %v4559_v38, %v4176_v39  ;;  %v4162_v45 = vld [vmem:[#allocation4 + $0x30] sm:$0xf]  ;;  %v4556_v47 = vld [vmem:[#allocation4 + $0x34] sm:$0xf] }
  0x39   : > { %584 = vmatpush.bf16.msra.mxu0 %v4199_v24  ;;  %4576 = vmatpush.bf16.msra.mxu3 %v4199_v24  ;;  %v4999_v44 = vor.u32 %v4561_v41, %v4182_v40  ;;  %v4557_v46 = vld [vmem:[#allocation4 + $0x38] sm:$0xf0]  ;;  %v4164_v48 = vld [vmem:[#allocation4 + $0x3c] sm:$0xf0]  ;;  %v4170_v49 = vld [vmem:[#allocation4 + $0x38] sm:$0xf] }
  0x3a   : > { %673 = vmatpush.bf16.msra.mxu1 %v4987_v25  ;;  %v4558_v50 = vld [vmem:[#allocation4 + $0x40] sm:$0xf0]  ;;  %v4163_v51 = vor.u32 %v4557_v46, %v4162_v45  ;;  %v4167_v52 = vor.u32 %v4556_v47, %v4164_v48  ;;  %v4150_v54 = vld [vmem:[#allocation4 + $0x18] sm:$0xf]  ;;  %v4553_v56 = vld [vmem:[#allocation4 + $0x1c] sm:$0xf] }
  0x3b   : > { %762 = vmatpush.bf16.msra.mxu2 %v4989_v26  ;;  %v5002_v53 = vor.u32 %v4558_v50, %v4170_v49  ;;  %v4554_v55 = vld [vmem:[#allocation4 + $0x20] sm:$0xf0]  ;;  %v4152_v57 = vld [vmem:[#allocation4 + $0x24] sm:$0xf0]  ;;  %v4158_v58 = vld [vmem:[#allocation4 + $0x20] sm:$0xf] }
  0x3c   : > { %v4555_v59 = vld [vmem:[#allocation4 + $0x28] sm:$0xf0]  ;;  %v4151_v60 = vor.u32 %v4554_v55, %v4150_v54  ;;  %v4155_v61 = vor.u32 %v4553_v56, %v4152_v57  ;;  %v4138_v63 = vld [vmem:[#allocation4] sm:$0xf]  ;;  %v4550_v1 = vld [vmem:[#allocation4 + $0x4] sm:$0xf] }
  0x3d   : > { %585 = vmatpush.bf16.msra.mxu0 %v4187_v33  ;;  %4577 = vmatpush.bf16.msra.mxu3 %v4187_v33  ;;  %v4159_v62 = vor.u32 %v4555_v59, %v4158_v58  ;;  %v4551_v0 = vld [vmem:[#allocation4 + $0x8] sm:$0xf0]  ;;  %v4140_v2 = vld [vmem:[#allocation4 + $0xc] sm:$0xf0]  ;;  %v4146_v3 = vld [vmem:[#allocation4 + $0x8] sm:$0xf] }
  0x3e   : > { %674 = vmatpush.bf16.msra.mxu1 %v4993_v34  ;;  %v4552_v4 = vld [vmem:[#allocation4 + $0x10] sm:$0xf0]  ;;  %v4139_v5 = vor.u32 %v4551_v0, %v4138_v63  ;;  %v4143_v6 = vor.u32 %v4550_v1, %v4140_v2  ;;  %v4534_v10 = vld [vmem:[%s4965_s9] sm:$0xff]  ;;  %v4535_v12 = vld [vmem:[%s4965_s9 + $0x8] sm:$0xff]  ;;  %s4069_s2 = sshll.u32 %s4961_s11, 9  ;;  %vm913_vm0 = vcmask 257024  }
  0x3f   : > { %763 = vmatpush.bf16.msra.mxu2 %v4995_v35  ;;  %v4147_v9 = vor.u32 %v4552_v4, %v4146_v3  ;;  %v4546_v11 = vld [vmem:[%s4965_s9 + $0x60] sm:$0xff]  ;;  %v5013_v13 = vld [vmem:[%s4965_s9 + $0x68] sm:$0xff]  ;;  %v4536_v14 = vld [vmem:[%s4965_s9 + $0x10] sm:$0xff]  ;;  %s5038_s3 = scalar_lea.vmem [#allocation6], %s4069_s2  ;;  %s4824_s24 = smov 64  }
  0x40   : > { %v5026_v15 = vld [vmem:[%s4965_s9 + $0x78] sm:$0xff]  ;;  %s4825_s26 = smov 96   ;;  %s4826_s27 = smov 32   ;;  %v4540_v30 = vld [vmem:[%s4965_s9 + $0x30] sm:$0xff] }
  0x41   : > { %586 = vmatpush.bf16.msra.mxu0 %v4175_v42  ;;  %4578 = vmatpush.bf16.msra.mxu3 %v4175_v42  ;;  %s5045_s13 = scalar_lea.vmem [#allocation7], %s4069_s2  ;;  %s5053_s15 = scalar_lea.vmem [#allocation8], %s4069_s2  ;;  %v4541_v4 = vld [vmem:[%s4965_s9 + $0x38] sm:$0xff] }
  0x42   : > { %675 = vmatpush.bf16.msra.mxu1 %v4179_v43  ;;  %s4523_s23 = sshll.u32 (%p4936_p0), %s4801_s18, 5  ;;  %s4524_s30 = sshll.u32 (%p4936_p0), %s4805_s19, 8 }
  0x43   : > { %764 = vmatpush.bf16.msra.mxu2 %v4999_v44  ;;  %s2223_s5 = sadd.s32 (%p4936_p0), %s4524_s30, %s4523_s23  ;;  %s6864_s12 = sld [smem:[#allocation13_spill]] (%p4936_p0) }
  0x44   : > { %s4525_s6 = sshll.u32 (%p4936_p0), %s2223_s5, 2 }
  0x45   : > { %587 = vmatpush.bf16.msra.mxu0 %v4163_v51  ;;  %4579 = vmatpush.bf16.msra.mxu3 %v4163_v51 }
  0x46   : > { %676 = vmatpush.bf16.msra.mxu1 %v4167_v52 }
  0x47   : > { %765 = vmatpush.bf16.msra.mxu2 %v5002_v53 }
  0x49   : > { %588 = vmatpush.bf16.msra.mxu0 %v4151_v60  ;;  %4580 = vmatpush.bf16.msra.mxu3 %v4151_v60  ;;  %s6420_s28 = scalar_lea.vmem (%p4936_p0), %s6864_s12, %s4525_s6 }
  0x4a   : > { %677 = vmatpush.bf16.msra.mxu1 %v4155_v61 }
  0x4b   : > { %766 = vmatpush.bf16.msra.mxu2 %v4159_v62 }
  0x4d   : > { %589 = vmatpush.bf16.msra.mxu0 %v4139_v5  ;;  %4581 = vmatpush.bf16.msra.mxu3 %v4139_v5 }
  0x4e   : > { %678 = vmatpush.bf16.msra.mxu1 %v4143_v6 }
  0x4f   : > { %767 = vmatpush.bf16.msra.mxu2 %v4147_v9 }
  0x50   : > { %590 = vmatmul.bf16.vlgmr.msra.gmra.mxu0 %v4534_v10  ;;  %650 = vmatmul.bf16.vlgmr.msra.gmra.mxu3 %v4546_v11 }
  0x51   : > { %4582 = vmatpush.bf16.msrb.mxu3 %v4975_v7  ;;  %679 = vmatmul.bf16.vlgmr.msra.gmra.mxu1 %v4534_v10  ;;  %v5017_v7 = vld [vmem:[%s4965_s9 + $0x70] sm:$0xff] }
  0x52   : > { %768 = vmatmul.bf16.vlgmr.msra.gmra.mxu2 %v4534_v10 }
  0x55   : > { %4583 = vmatpush.bf16.msrb.mxu3 %v4981_v16  ;;  %v4537_v16 = vld [vmem:[%s4965_s9 + $0x18] sm:$0xff] }
  0x59   : > { %4584 = vmatpush.bf16.msrb.mxu3 %v4987_v25 }
  0x5d   : > { %4585 = vmatpush.bf16.msrb.mxu3 %v4993_v34 }
  0x60   : > { %595 = vmatmul.bf16.gmra.mxu0 %v4535_v12  ;;  %655 = vmatmul.bf16.gmra.mxu3 %v5013_v13 }
  0x61   : > { %4586 = vmatpush.bf16.msrb.mxu3 %v4179_v43  ;;  %684 = vmatmul.bf16.gmra.mxu1 %v4535_v12 }
  0x62   : > { %773 = vmatmul.bf16.gmra.mxu2 %v4535_v12 }
  0x65   : > { %4587 = vmatpush.bf16.msrb.mxu3 %v4167_v52 }
  0x69   : > { %4588 = vmatpush.bf16.msrb.mxu3 %v4155_v61 }
  0x6d   : > { %4589 = vmatpush.bf16.msrb.mxu3 %v4143_v6 }
  0x70   : > { %660 = vmatmul.bf16.gmra.mxu3 %v5017_v7  ;;  %600 = vmatmul.bf16.gmra.mxu0 %v4536_v14 }
  0x71   : > { %4590 = vmatpush.bf16.msra.mxu3 %v4977_v8  ;;  %689 = vmatmul.bf16.gmra.mxu1 %v4536_v14  ;;  %v4538_v8 = vld [vmem:[%s4965_s9 + $0x20] sm:$0xff] }
  0x72   : > { %778 = vmatmul.bf16.gmra.mxu2 %v4536_v14 }
  0x75   : > { %4591 = vmatpush.bf16.msra.mxu3 %v4983_v17  ;;  %v4539_v17 = vld [vmem:[%s4965_s9 + $0x28] sm:$0xff] }
  0x79   : > { %4592 = vmatpush.bf16.msra.mxu3 %v4989_v26 }
  0x7d   : > { %4593 = vmatpush.bf16.msra.mxu3 %v4995_v35 }
  0x80   : > { %665 = vmatmul.bf16.gmra.mxu3 %v5026_v15  ;;  %605 = vmatmul.bf16.gmra.mxu0 %v4537_v16 }
  0x81   : > { %4594 = vmatpush.bf16.msra.mxu3 %v4999_v44  ;;  %694 = vmatmul.bf16.gmra.mxu1 %v4537_v16 }
  0x82   : > { %783 = vmatmul.bf16.gmra.mxu2 %v4537_v16 }
  0x85   : > { %4595 = vmatpush.bf16.msra.mxu3 %v5002_v53 }
  0x89   : > { %4596 = vmatpush.bf16.msra.mxu3 %v4159_v62 }
  0x8d   : > { %4597 = vmatpush.bf16.msra.mxu3 %v4147_v9 }
  0x90   : > { %739 = vmatmul.bf16.vlgmr.msrb.gmra.mxu3 %v4546_v11  ;;  %610 = vmatmul.bf16.gmra.mxu0 %v4538_v8 }
  0x91   : > { %699 = vmatmul.bf16.gmra.mxu1 %v4538_v8 }
  0x92   : > { %788 = vmatmul.bf16.gmra.mxu2 %v4538_v8 }
  0xa0   : > { %744 = vmatmul.bf16.gmra.mxu3 %v5013_v13  ;;  %615 = vmatmul.bf16.gmra.mxu0 %v4539_v17 }
  0xa1   : > { %704 = vmatmul.bf16.gmra.mxu1 %v4539_v17 }
  0xa2   : > { %793 = vmatmul.bf16.gmra.mxu2 %v4539_v17 }
  0xb0   : > { %749 = vmatmul.bf16.gmra.mxu3 %v5017_v7  ;;  %620 = vmatmul.bf16.gmra.mxu0 %v4540_v30 }
  0xb1   : > { %709 = vmatmul.bf16.gmra.mxu1 %v4540_v30 }
  0xb2   : > { %798 = vmatmul.bf16.gmra.mxu2 %v4540_v30 }
  0xc0   : > { %754 = vmatmul.bf16.gmra.mxu3 %v5026_v15  ;;  %625 = vmatmul.bf16.gmra.mxu0 %v4541_v4 }
  0xc1   : > { %714 = vmatmul.bf16.gmra.mxu1 %v4541_v4 }
  0xc2   : > { %803 = vmatmul.bf16.gmra.mxu2 %v4541_v4 }
  0xcd   : > { %v591_v18 = vpop.f32.mrf.mxu0 }
  0xce   : > { %v680_v19 = vpop.f32.mrf.mxu1 }
  0xcf   : > { %v849_v20 = vpack.c.bf16 %v680_v19, %v591_v18 }
  0xd0   : > { %828 = vmatmul.bf16.vlgmr.msra.gmra.mxu3 %v4546_v11 }
  0xd1   : > { %914 = vst.msk [vmem:[%s5038_s3] sm:$0xf] %vm913_vm0, %v849_v20  ;;  %v1365_v21 = vrot.slane %v849_v20, 4  ;;  %1107 = vrot.lane.b32.xlu2 %v849_v20, %s4824_s24  ;;  %978 = vrot.lane.b32.xlu0 %v849_v20, %s4825_s26 }
  0xd2   : > { %1236 = vrot.lane.b32.xlu1 %v849_v20, %s4826_s27 }
  0xd3   : > { %1429 = vst.msk [vmem:[%s5045_s13] sm:$0xf] %vm913_vm0, %v1365_v21  ;;  %v5049_v22 = vpop.f32.mrf.mxu3 }
  0xd5   : > { %v769_v23 = vpop.f32.mrf.mxu2  ;;  %v593_v25 = vpop.f32.mrf.mxu0 }
  0xd6   : > { %v5051_v24 = vpack.c.bf16 %v769_v23, %v769_v23  ;;  %v682_v26 = vpop.f32.mrf.mxu1 }
  0xd7   : > { %v851_v27 = vpack.c.bf16 %v682_v26, %v593_v25 }
  0xd8   : > { %1752 = vst.msk [vmem:[%s5053_s15] sm:$0xf] %vm913_vm0, %v5051_v24 }
  0xd9   : > { %915 = vst.msk [vmem:[%s5038_s3 + $0x4] sm:$0xf] %vm913_vm0, %v851_v27  ;;  %v1366_v28 = vrot.slane %v851_v27, 4  ;;  %1945 = vrot.lane.b32.xlu2 %v5051_v24, %s4824_s24  ;;  %1816 = vrot.lane.b32.xlu0 %v5051_v24, %s4825_s26 }
  0xdb   : > { %1430 = vst.msk [vmem:[%s5045_s13 + $0x4] sm:$0xf] %vm913_vm0, %v1366_v28  ;;  %v5066_v29 = vpop.f32.mrf.mxu3 }
  0xdd   : > { %v771_v31 = vpop.f32.mrf.mxu2  ;;  %v596_v33 = vpop.f32.mrf.mxu0 }
  0xde   : > { %v5069_v32 = vpack.c.bf16 %v771_v31, %v771_v31  ;;  %v685_v34 = vpop.f32.mrf.mxu1 }
  0xdf   : > { %v853_v35 = vpack.c.bf16 %v685_v34, %v596_v33 }
  0xe0   : > { %1753 = vst.msk [vmem:[%s5053_s15 + $0x4] sm:$0xf] %vm913_vm0, %v5069_v32  ;;  %1818 = vrot.lane.b32.xlu1 %v5069_v32, %s4825_s26  ;;  %833 = vmatmul.bf16.gmra.mxu3 %v5013_v13 }
  0xe1   : > { %916 = vst.msk [vmem:[%s5038_s3 + $0x8] sm:$0xf] %vm913_vm0, %v853_v35  ;;  %v1367_v36 = vrot.slane %v853_v35, 4  ;;  %1238 = vrot.lane.b32.xlu2 %v851_v27, %s4826_s27  ;;  %980 = vrot.lane.b32.xlu0 %v851_v27, %s4825_s26 }
  0xe3   : > { %1431 = vst.msk [vmem:[%s5045_s13 + $0x8] sm:$0xf] %vm913_vm0, %v1367_v36  ;;  %v5083_v37 = vpop.f32.mrf.mxu3 }
  0xe5   : > { %v774_v38 = vpop.f32.mrf.mxu2  ;;  %v598_v39 = vpop.f32.mrf.mxu0 }
  0xe6   : > { %v5085_v40 = vpack.c.bf16 %v774_v38, %v774_v38  ;;  %v687_v41 = vpop.f32.mrf.mxu1 }
  0xe7   : > { %v855_v42 = vpack.c.bf16 %v687_v41, %v598_v39 }
  0xe8   : > { %1754 = vst.msk [vmem:[%s5053_s15 + $0x8] sm:$0xf] %vm913_vm0, %v5085_v40  ;;  %982 = vrot.lane.b32.xlu1 %v853_v35, %s4825_s26 }
  0xe9   : > { %917 = vst.msk [vmem:[%s5038_s3 + $0xc] sm:$0xf] %vm913_vm0, %v855_v42  ;;  %v1368_v43 = vrot.slane %v855_v42, 4  ;;  %1820 = vrot.lane.b32.xlu2 %v5085_v40, %s4825_s26  ;;  %1109 = vrot.lane.b32.xlu0 %v851_v27, %s4824_s24 }
  0xeb   : > { %1432 = vst.msk [vmem:[%s5045_s13 + $0xc] sm:$0xf] %vm913_vm0, %v1368_v43  ;;  %v5098_v44 = vpop.f32.mrf.mxu3 }
  0xed   : > { %v776_v45 = vpop.f32.mrf.mxu2  ;;  %v601_v47 = vpop.f32.mrf.mxu0 }
  0xee   : > { %v5100_v46 = vpack.c.bf16 %v776_v45, %v776_v45  ;;  %v690_v48 = vpop.f32.mrf.mxu1 }
  0xef   : > { %v857_v49 = vpack.c.bf16 %v690_v48, %v601_v47 }
  0xf0   : > { %1111 = vrot.lane.b32.xlu1 %v853_v35, %s4824_s24  ;;  %1755 = vst.msk [vmem:[%s5053_s15 + $0xc] sm:$0xf] %vm913_vm0, %v5100_v46  ;;  %838 = vmatmul.bf16.gmra.mxu3 %v5017_v7 }
  0xf1   : > { %1947 = vrot.lane.b32.xlu0 %v5069_v32, %s4824_s24  ;;  %1113 = vrot.lane.b32.xlu2 %v855_v42, %s4824_s24  ;;  %918 = vst.msk [vmem:[%s5038_s3 + $0x10] sm:$0xf] %vm913_vm0, %v857_v49  ;;  %v1369_v50 = vrot.slane %v857_v49, 4 }
  0xf3   : > { %v5112_v51 = vpop.f32.mrf.mxu3  ;;  %1433 = vst.msk [vmem:[%s5045_s13 + $0x10] sm:$0xf] %vm913_vm0, %v1369_v50 }
  0xf5   : > { %v779_v52 = vpop.f32.mrf.mxu2  ;;  %v603_v54 = vpop.f32.mrf.mxu0 }
  0xf6   : > { %v5116_v53 = vpack.c.bf16 %v779_v52, %v779_v52  ;;  %v692_v55 = vpop.f32.mrf.mxu1 }
  0xf7   : > { %v859_v56 = vpack.c.bf16 %v692_v55, %v603_v54 }
  0xf8   : > { %1949 = vrot.lane.b32.xlu1 %v5085_v40, %s4824_s24  ;;  %1756 = vst.msk [vmem:[%s5053_s15 + $0x10] sm:$0xf] %vm913_vm0, %v5116_v53 }
  0xf9   : > { %1240 = vrot.lane.b32.xlu0 %v853_v35, %s4826_s27  ;;  %1951 = vrot.lane.b32.xlu2 %v5100_v46, %s4824_s24  ;;  %919 = vst.msk [vmem:[%s5038_s3 + $0x14] sm:$0xf] %vm913_vm0, %v859_v56  ;;  %v1370_v57 = vrot.slane %v859_v56, 4 }
  0xfb   : > { %v5128_v58 = vpop.f32.mrf.mxu3  ;;  %1434 = vst.msk [vmem:[%s5045_s13 + $0x14] sm:$0xf] %vm913_vm0, %v1370_v57 }
  0xfd   : > { %v781_v59 = vpop.f32.mrf.mxu2  ;;  %v606_v61 = vpop.f32.mrf.mxu0 }
  0xfe   : > { %v5132_v60 = vpack.c.bf16 %v781_v59, %v781_v59  ;;  %v695_v62 = vpop.f32.mrf.mxu1 }
  0xff   : > { %v5138_v63 = vpack.c.bf16 %v695_v62, %v606_v61 }
 0x100   : > { %984 = vrot.lane.b32.xlu1 %v855_v42, %s4825_s26  ;;  %1757 = vst.msk [vmem:[%s5053_s15 + $0x14] sm:$0xf] %vm913_vm0, %v5132_v60  ;;  %843 = vmatmul.bf16.gmra.mxu3 %v5026_v15 }
 0x101   : > { %1822 = vrot.lane.b32.xlu0 %v5100_v46, %s4825_s26  ;;  %986 = vrot.lane.b32.xlu2 %v857_v49, %s4825_s26  ;;  %920 = vst.msk [vmem:[%s5038_s3 + $0x18] sm:$0xf] %vm913_vm0, %v5138_v63  ;;  %v1371_v0 = vrot.slane %v5138_v63, 4 }
 0x103   : > { %v5148_v1 = vpop.f32.mrf.mxu3  ;;  %1435 = vst.msk [vmem:[%s5045_s13 + $0x18] sm:$0xf] %vm913_vm0, %v1371_v0 }
 0x105   : > { %v784_v2 = vpop.f32.mrf.mxu2  ;;  %v608_v3 = vpop.f32.mrf.mxu0 }
 0x106   : > { %v697_v5 = vpop.f32.mrf.mxu1  ;;  %v5156_v9 = vpack.c.bf16 %v784_v2, %v784_v2 }
 0x107   : > { %v5154_v6 = vpack.c.bf16 %v697_v5, %v608_v3 }
 0x108   : > { %1242 = vrot.lane.b32.xlu1 %v855_v42, %s4826_s27  ;;  %1758 = vst.msk [vmem:[%s5053_s15 + $0x18] sm:$0xf] %vm913_vm0, %v5156_v9 }
 0x109   : > { %1115 = vrot.lane.b32.xlu0 %v857_v49, %s4824_s24  ;;  %1244 = vrot.lane.b32.xlu2 %v857_v49, %s4826_s27  ;;  %921 = vst.msk [vmem:[%s5038_s3 + $0x1c] sm:$0xf] %vm913_vm0, %v5154_v6  ;;  %v1372_v10 = vrot.slane %v5154_v6, 4 }
 0x10b   : > { %v5167_v11 = vpop.f32.mrf.mxu3  ;;  %1436 = vst.msk [vmem:[%s5045_s13 + $0x1c] sm:$0xf] %vm913_vm0, %v1372_v10  ;;  %v4543_v10 = vld [vmem:[%s4965_s9 + $0x48] sm:$0xff] }
 0x10d   : > { %v786_v12 = vpop.f32.mrf.mxu2  ;;  %v611_v15 = vpop.f32.mrf.mxu0 }
 0x10e   : > { %v5171_v13 = vpack.c.bf16 %v786_v12, %v786_v12  ;;  %v700_v16 = vpop.f32.mrf.mxu1 }
 0x10f   : > { %v5184_v8 = vpack.c.bf16 %v700_v16, %v611_v15 }
 0x110   : > { %1824 = vrot.lane.b32.xlu1 %v5116_v53, %s4825_s26  ;;  %1759 = vst.msk [vmem:[%s5053_s15 + $0x1c] sm:$0xf] %vm913_vm0, %v5171_v13 }
 0x111   : > { %1953 = vrot.lane.b32.xlu0 %v5116_v53, %s4824_s24  ;;  %988 = vrot.lane.b32.xlu2 %v859_v56, %s4825_s26  ;;  %922 = vst.msk [vmem:[%s5038_s3 + $0x20] sm:$0xf] %vm913_vm0, %v5184_v8  ;;  %v1373_v18 = vrot.slane %v5184_v8, 4 }
 0x113   : > { %v740_v7 = vpop.f32.mrf.mxu3  ;;  %1437 = vst.msk [vmem:[%s5045_s13 + $0x20] sm:$0xf] %vm913_vm0, %v1373_v18 }
 0x114   : > { %v5182_v14 = vpack.c.bf16 %v740_v7, %v5049_v22 }
 0x115   : > { %v613_v21 = vpop.f32.mrf.mxu0  ;;  %v789_v31 = vpop.f32.mrf.mxu2 }
 0x116   : > { %938 = vst.msk [vmem:[%s5038_s3 + $0x60] sm:$0xf] %vm913_vm0, %v5182_v14  ;;  %v1389_v17 = vrot.slane %v5182_v14, 4  ;;  %v702_v22 = vpop.f32.mrf.mxu1  ;;  %v5235_v33 = vpack.c.bf16 %v789_v31, %v789_v31 }
 0x117   : > { %v5205_v23 = vpack.c.bf16 %v702_v22, %v613_v21 }
 0x118   : > { %1117 = vrot.lane.b32.xlu1 %v859_v56, %s4824_s24  ;;  %1453 = vst.msk [vmem:[%s5045_s13 + $0x60] sm:$0xf] %vm913_vm0, %v1389_v17 }
 0x119   : > { %1246 = vrot.lane.b32.xlu0 %v859_v56, %s4826_s27  ;;  %1826 = vrot.lane.b32.xlu2 %v5132_v60, %s4825_s26  ;;  %923 = vst.msk [vmem:[%s5038_s3 + $0x24] sm:$0xf] %vm913_vm0, %v5205_v23  ;;  %v1374_v26 = vrot.slane %v5205_v23, 4 }
 0x11a   : > { %1760 = vst.msk [vmem:[%s5053_s15 + $0x20] sm:$0xf] %vm913_vm0, %v5235_v33 }
 0x11b   : > { %v742_v19 = vpop.f32.mrf.mxu3  ;;  %1438 = vst.msk [vmem:[%s5045_s13 + $0x24] sm:$0xf] %vm913_vm0, %v1374_v26 }
 0x11c   : > { %v5203_v20 = vpack.c.bf16 %v742_v19, %v5066_v29  ;;  %v4542_v29 = vld [vmem:[%s4965_s9 + $0x40] sm:$0xff] }
 0x11d   : > { %630 = vmatmul.bf16.gmra.mxu0 %v4542_v29  ;;  %719 = vmatmul.bf16.gmra.mxu1 %v4542_v29  ;;  %v616_v43 = vpop.f32.mrf.mxu0  ;;  %v791_v48 = vpop.f32.mrf.mxu2 }
 0x11e   : > { %939 = vst.msk [vmem:[%s5038_s3 + $0x64] sm:$0xf] %vm913_vm0, %v5203_v20  ;;  %v1390_v25 = vrot.slane %v5203_v20, 4  ;;  %808 = vmatmul.bf16.gmra.mxu2 %v4542_v29  ;;  %v5278_v49 = vpack.c.bf16 %v791_v48, %v791_v48 }
 0x120   : > { %1955 = vrot.lane.b32.xlu1 %v5132_v60, %s4824_s24  ;;  %1454 = vst.msk [vmem:[%s5045_s13 + $0x64] sm:$0xf] %vm913_vm0, %v1390_v25 }
 0x121   : > { %1119 = vrot.lane.b32.xlu2 %v5138_v63, %s4824_s24  ;;  %990 = vrot.lane.b32.xlu0 %v5138_v63, %s4825_s26  ;;  %1761 = vst.msk [vmem:[%s5053_s15 + $0x24] sm:$0xf] %vm913_vm0, %v5278_v49 }
 0x123   : > { %v745_v27 = vpop.f32.mrf.mxu3 }
 0x124   : > { %v5226_v28 = vpack.c.bf16 %v745_v27, %v5083_v37 }
 0x125   : > { %v618_v56 = vpop.f32.mrf.mxu0  ;;  %v794_v5 = vpop.f32.mrf.mxu2 }
 0x126   : > { %940 = vst.msk [vmem:[%s5038_s3 + $0x68] sm:$0xf] %vm913_vm0, %v5226_v28  ;;  %v1391_v30 = vrot.slane %v5226_v28, 4  ;;  %v5338_v7 = vpack.c.bf16 %v794_v5, %v794_v5  ;;  %v4545_v5 = vld [vmem:[%s4965_s9 + $0x58] sm:$0xff] }
 0x128   : > { %1248 = vrot.lane.b32.xlu1 %v5138_v63, %s4826_s27  ;;  %1455 = vst.msk [vmem:[%s5045_s13 + $0x68] sm:$0xf] %vm913_vm0, %v1391_v30 }
 0x129   : > { %1957 = vrot.lane.b32.xlu2 %v5156_v9, %s4824_s24  ;;  %1828 = vrot.lane.b32.xlu0 %v5156_v9, %s4825_s26  ;;  %1762 = vst.msk [vmem:[%s5053_s15 + $0x28] sm:$0xf] %vm913_vm0, %v5338_v7 }
 0x12b   : > { %v1108_v34 = vpop.permute.xlu2 %1107  ;;  %v747_v35 = vpop.f32.mrf.mxu3 }
 0x12c   : > { %4264 = vst.msk [vmem:[%s5038_s3 + $0x100] sm:$0xf] %vm913_vm0, %v1108_v34  ;;  %v1558_v36 = vrot.slane %v1108_v34, 4  ;;  %v5249_v37 = vpack.c.bf16 %v747_v35, %v5098_v44  ;;  %v705_v44 = vpop.f32.mrf.mxu1  ;;  %v4544_v35 = vld [vmem:[%s4965_s9 + $0x50] sm:$0xff] }
 0x12d   : > { %v5274_v47 = vpack.c.bf16 %v705_v44, %v616_v43  ;;  %635 = vmatmul.bf16.gmra.mxu0 %v4543_v10  ;;  %724 = vmatmul.bf16.gmra.mxu1 %v4543_v10  ;;  %v796_v17 = vpop.f32.mrf.mxu2  ;;  %v621_v34 = vpop.f32.mrf.mxu0 }
 0x12e   : > { %4360 = vst.msk [vmem:[%s5045_s13 + $0x100] sm:$0xf] %vm913_vm0, %v1558_v36  ;;  %v1392_v38 = vrot.slane %v5249_v37, 4  ;;  %813 = vmatmul.bf16.gmra.mxu2 %v4543_v10  ;;  %v5362_v18 = vpack.c.bf16 %v796_v17, %v796_v17 }
 0x12f   : > { %941 = vst.msk [vmem:[%s5038_s3 + $0x6c] sm:$0xf] %vm913_vm0, %v5249_v37  ;;  %v1375_v50 = vrot.slane %v5274_v47, 4 }
 0x130   : > { %992 = vrot.lane.b32.xlu1 %v5154_v6, %s4825_s26  ;;  %1456 = vst.msk [vmem:[%s5045_s13 + $0x6c] sm:$0xf] %vm913_vm0, %v1392_v38 }
 0x131   : > { %1250 = vrot.lane.b32.xlu2 %v5154_v6, %s4826_s27  ;;  %1121 = vrot.lane.b32.xlu0 %v5154_v6, %s4824_s24  ;;  %924 = vst.msk [vmem:[%s5038_s3 + $0x28] sm:$0xf] %vm913_vm0, %v5274_v47 }
 0x132   : > { %1439 = vst.msk [vmem:[%s5045_s13 + $0x28] sm:$0xf] %vm913_vm0, %v1375_v50 }
 0x133   : > { %v1946_v39 = vpop.permute.xlu2 %1945  ;;  %v750_v41 = vpop.f32.mrf.mxu3  ;;  %1763 = vst.msk [vmem:[%s5053_s15 + $0x2c] sm:$0xf] %vm913_vm0, %v5362_v18 }
 0x134   : > { %4456 = vst.msk [vmem:[%s5053_s15 + $0x100] sm:$0xf] %vm913_vm0, %v1946_v39  ;;  %v5268_v42 = vpack.c.bf16 %v750_v41, %v5112_v51  ;;  %v707_v57 = vpop.f32.mrf.mxu1 }
 0x135   : > { %v5303_v61 = vpack.c.bf16 %v707_v57, %v618_v56 }
 0x136   : > { %942 = vst.msk [vmem:[%s5038_s3 + $0x70] sm:$0xf] %vm913_vm0, %v5268_v42  ;;  %v1393_v45 = vrot.slane %v5268_v42, 4 }
 0x137   : > { %925 = vst.msk [vmem:[%s5038_s3 + $0x2c] sm:$0xf] %vm913_vm0, %v5303_v61 }
 0x138   : > { %1830 = vrot.lane.b32.xlu1 %v5171_v13, %s4825_s26  ;;  %1457 = vst.msk [vmem:[%s5045_s13 + $0x70] sm:$0xf] %vm913_vm0, %v1393_v45 }
 0x139   : > { %1252 = vrot.lane.b32.xlu0 %v5184_v8, %s4826_s27  ;;  %994 = vrot.lane.b32.xlu2 %v5184_v8, %s4825_s26 }
 0x13b   : > { %v1239_v51 = vpop.permute.xlu2 %1238  ;;  %v752_v52 = vpop.f32.mrf.mxu3 }
 0x13c   : > { %4297 = vst.msk [vmem:[%s5038_s3 + $0x184] sm:$0xf] %vm913_vm0, %v1239_v51  ;;  %v1656_v54 = vrot.slane %v1239_v51, 4  ;;  %v5298_v55 = vpack.c.bf16 %v752_v52, %v5128_v58  ;;  %v1376_v58 = vrot.slane %v5303_v61, 4 }
 0x13d   : > { %640 = vmatmul.bf16.gmra.mxu0 %v4544_v35  ;;  %729 = vmatmul.bf16.gmra.mxu1 %v4544_v35 }
 0x13e   : > { %4393 = vst.msk [vmem:[%s5045_s13 + $0x184] sm:$0xf] %vm913_vm0, %v1656_v54  ;;  %v1394_v59 = vrot.slane %v5298_v55, 4  ;;  %818 = vmatmul.bf16.gmra.mxu2 %v4544_v35 }
 0x13f   : > { %943 = vst.msk [vmem:[%s5038_s3 + $0x74] sm:$0xf] %vm913_vm0, %v5298_v55 }
 0x140   : > { %1123 = vrot.lane.b32.xlu1 %v5184_v8, %s4824_s24  ;;  %1458 = vst.msk [vmem:[%s5045_s13 + $0x74] sm:$0xf] %vm913_vm0, %v1394_v59 }
 0x141   : > { %1026 = vrot.lane.b32.xlu0 %v5182_v14, %s4825_s26  ;;  %1155 = vrot.lane.b32.xlu2 %v5182_v14, %s4824_s24  ;;  %1440 = vst.msk [vmem:[%s5045_s13 + $0x2c] sm:$0xf] %vm913_vm0, %v1376_v58 }
 0x143   : > { %v979_v62 = vpop.permute.xlu0 %978  ;;  %v1821_v63 = vpop.permute.xlu2 %1820 }
 0x144   : > { %4232 = vst.msk [vmem:[%s5038_s3 + $0x80] sm:$0xf] %vm913_vm0, %v979_v62  ;;  %v1461_v0 = vrot.slane %v979_v62, 4  ;;  %v755_v2 = vpop.f32.mrf.mxu3  ;;  %v1237_v3 = vpop.permute.xlu1 %1236 }
 0x145   : > { %4426 = vst.msk [vmem:[%s5053_s15 + $0x88] sm:$0xf] %vm913_vm0, %v1821_v63  ;;  %v5327_v4 = vpack.c.bf16 %v755_v2, %v5148_v1  ;;  %v1655_v6 = vrot.slane %v1237_v3, 4 }
 0x146   : > { %4328 = vst.msk [vmem:[%s5045_s13 + $0x80] sm:$0xf] %vm913_vm0, %v1461_v0 }
 0x147   : > { %944 = vst.msk [vmem:[%s5038_s3 + $0x78] sm:$0xf] %vm913_vm0, %v5327_v4  ;;  %v1395_v12 = vrot.slane %v5327_v4, 4 }
 0x148   : > { %1284 = vrot.lane.b32.xlu1 %v5182_v14, %s4826_s27  ;;  %4296 = vst.msk [vmem:[%s5038_s3 + $0x180] sm:$0xf] %vm913_vm0, %v1237_v3 }
 0x149   : > { %1459 = vst.msk [vmem:[%s5045_s13 + $0x78] sm:$0xf] %vm913_vm0, %v1395_v12  ;;  %1832 = vrot.lane.b32.xlu2 %v5235_v33, %s4825_s26  ;;  %996 = vrot.lane.b32.xlu0 %v5205_v23, %s4825_s26 }
 0x14a   : > { %4392 = vst.msk [vmem:[%s5045_s13 + $0x180] sm:$0xf] %vm913_vm0, %v1655_v6 }
 0x14b   : > { %v1817_v1 = vpop.permute.xlu0 %1816  ;;  %v1114_v14 = vpop.permute.xlu2 %1113 }
 0x14c   : > { %4424 = vst.msk [vmem:[%s5053_s15 + $0x80] sm:$0xf] %vm913_vm0, %v1817_v1  ;;  %v1561_v15 = vrot.slane %v1114_v14, 4  ;;  %v757_v16 = vpop.f32.mrf.mxu3 }
 0x14d   : > { %4267 = vst.msk [vmem:[%s5038_s3 + $0x10c] sm:$0xf] %vm913_vm0, %v1114_v14  ;;  %v5358_v8 = vpack.c.bf16 %v757_v16, %v5167_v11  ;;  %645 = vmatmul.bf16.gmra.mxu0 %v4545_v5  ;;  %734 = vmatmul.bf16.gmra.mxu1 %v4545_v5 }
 0x14e   : > { %4363 = vst.msk [vmem:[%s5045_s13 + $0x10c] sm:$0xf] %vm913_vm0, %v1561_v15  ;;  %823 = vmatmul.bf16.gmra.mxu2 %v4545_v5 }
 0x14f   : > { %945 = vst.msk [vmem:[%s5038_s3 + $0x7c] sm:$0xf] %vm913_vm0, %v5358_v8  ;;  %v1396_v19 = vrot.slane %v5358_v8, 4 }
 0x150   : > { %1254 = vrot.lane.b32.xlu1 %v5205_v23, %s4826_s27 }
 0x151   : > { %1460 = vst.msk [vmem:[%s5045_s13 + $0x7c] sm:$0xf] %vm913_vm0, %v1396_v19  ;;  %1125 = vrot.lane.b32.xlu2 %v5205_v23, %s4824_s24  ;;  %1157 = vrot.lane.b32.xlu0 %v5203_v20, %s4824_s24 }
 0x152   : > { %v1819_v11 = vpop.permute.xlu1 %1818 }
 0x153   : > { %4425 = vst.msk [vmem:[%s5053_s15 + $0x84] sm:$0xf] %vm913_vm0, %v1819_v11  ;;  %v981_v21 = vpop.permute.xlu0 %980  ;;  %v1952_v22 = vpop.permute.xlu2 %1951 }
 0x154   : > { %4233 = vst.msk [vmem:[%s5038_s3 + $0x84] sm:$0xf] %vm913_vm0, %v981_v21  ;;  %v1462_v25 = vrot.slane %v981_v21, 4 }
 0x155   : > { %4459 = vst.msk [vmem:[%s5053_s15 + $0x10c] sm:$0xf] %vm913_vm0, %v1952_v22 }
 0x156   : > { %4329 = vst.msk [vmem:[%s5045_s13 + $0x84] sm:$0xf] %vm913_vm0, %v1462_v25 }
 0x158   : > { %1028 = vrot.lane.b32.xlu1 %v5203_v20, %s4825_s26 }
 0x159   : > { %1286 = vrot.lane.b32.xlu2 %v5203_v20, %s4826_s27  ;;  %1834 = vrot.lane.b32.xlu0 %v5278_v49, %s4825_s26  ;;  %v710_v20 = vpop.f32.mrf.mxu1 }
 0x15a   : > { %v983_v23 = vpop.permute.xlu1 %982  ;;  %v5412_v38 = vpack.c.bf16 %v710_v20, %v621_v34 }
 0x15b   : > { %4234 = vst.msk [vmem:[%s5038_s3 + $0x88] sm:$0xf] %vm913_vm0, %v983_v23  ;;  %v1463_v26 = vrot.slane %v983_v23, 4  ;;  %v1110_v27 = vpop.permute.xlu0 %1109  ;;  %v987_v29 = vpop.permute.xlu2 %986 }
 0x15c   : > { %v1559_v30 = vrot.slane %v1110_v27, 4  ;;  %v1465_v31 = vrot.slane %v987_v29, 4  ;;  %4265 = vst.msk [vmem:[%s5038_s3 + $0x104] sm:$0xf] %vm913_vm0, %v1110_v27  ;;  %v1377_v45 = vrot.slane %v5412_v38, 4 }
 0x15d   : > { %4330 = vst.msk [vmem:[%s5045_s13 + $0x88] sm:$0xf] %vm913_vm0, %v1463_v26 }
 0x15e   : > { %4361 = vst.msk [vmem:[%s5045_s13 + $0x104] sm:$0xf] %vm913_vm0, %v1559_v30 }
 0x15f   : > { %4236 = vst.msk [vmem:[%s5038_s3 + $0x90] sm:$0xf] %vm913_vm0, %v987_v29 }
 0x160   : > { %998 = vrot.lane.b32.xlu1 %v5274_v47, %s4825_s26  ;;  %4332 = vst.msk [vmem:[%s5045_s13 + $0x90] sm:$0xf] %vm913_vm0, %v1465_v31 }
 0x161   : > { %1256 = vrot.lane.b32.xlu2 %v5274_v47, %s4826_s27  ;;  %1127 = vrot.lane.b32.xlu0 %v5274_v47, %s4824_s24  ;;  %926 = vst.msk [vmem:[%s5038_s3 + $0x30] sm:$0xf] %vm913_vm0, %v5412_v38  ;;  %v623_v47 = vpop.f32.mrf.mxu0  ;;  %v712_v48 = vpop.f32.mrf.mxu1 }
 0x162   : > { %v1112_v36 = vpop.permute.xlu1 %1111  ;;  %v5430_v50 = vpack.c.bf16 %v712_v48, %v623_v47  ;;  %1441 = vst.msk [vmem:[%s5045_s13 + $0x30] sm:$0xf] %vm913_vm0, %v1377_v45 }
 0x163   : > { %4266 = vst.msk [vmem:[%s5038_s3 + $0x108] sm:$0xf] %vm913_vm0, %v1112_v36  ;;  %v1560_v39 = vrot.slane %v1112_v36, 4  ;;  %v1948_v41 = vpop.permute.xlu0 %1947  ;;  %v1245_v43 = vpop.permute.xlu2 %1244 }
 0x164   : > { %v1659_v44 = vrot.slane %v1245_v43, 4  ;;  %4457 = vst.msk [vmem:[%s5053_s15 + $0x104] sm:$0xf] %vm913_vm0, %v1948_v41  ;;  %v1378_v52 = vrot.slane %v5430_v50, 4 }
 0x165   : > { %4362 = vst.msk [vmem:[%s5045_s13 + $0x108] sm:$0xf] %vm913_vm0, %v1560_v39 }
 0x166   : > { %4300 = vst.msk [vmem:[%s5038_s3 + $0x190] sm:$0xf] %vm913_vm0, %v1245_v43 }
 0x167   : > { %4396 = vst.msk [vmem:[%s5045_s13 + $0x190] sm:$0xf] %vm913_vm0, %v1659_v44 }
 0x168   : > { %1159 = vrot.lane.b32.xlu1 %v5226_v28, %s4824_s24  ;;  %927 = vst.msk [vmem:[%s5038_s3 + $0x34] sm:$0xf] %vm913_vm0, %v5430_v50 }
 0x169   : > { %1030 = vrot.lane.b32.xlu2 %v5226_v28, %s4825_s26  ;;  %1288 = vrot.lane.b32.xlu0 %v5226_v28, %s4826_s27  ;;  %1442 = vst.msk [vmem:[%s5045_s13 + $0x34] sm:$0xf] %vm913_vm0, %v1378_v52  ;;  %v799_v28 = vpop.f32.mrf.mxu2  ;;  %v715_v11 = vpop.f32.mrf.mxu1 }
 0x16a   : > { %v1950_v51 = vpop.permute.xlu1 %1949  ;;  %v5460_v62 = vpack.c.bf16 %v799_v28, %v799_v28 }
 0x16b   : > { %4458 = vst.msk [vmem:[%s5053_s15 + $0x108] sm:$0xf] %vm913_vm0, %v1950_v51  ;;  %v1241_v54 = vpop.permute.xlu0 %1240  ;;  %v989_v56 = vpop.permute.xlu2 %988 }
 0x16c   : > { %4298 = vst.msk [vmem:[%s5038_s3 + $0x188] sm:$0xf] %vm913_vm0, %v1241_v54  ;;  %v1657_v57 = vrot.slane %v1241_v54, 4  ;;  %v1466_v59 = vrot.slane %v989_v56, 4 }
 0x16d   : > { %4237 = vst.msk [vmem:[%s5038_s3 + $0x94] sm:$0xf] %vm913_vm0, %v989_v56 }
 0x16e   : > { %4394 = vst.msk [vmem:[%s5045_s13 + $0x188] sm:$0xf] %vm913_vm0, %v1657_v57 }
 0x16f   : > { %4333 = vst.msk [vmem:[%s5045_s13 + $0x94] sm:$0xf] %vm913_vm0, %v1466_v59 }
 0x170   : > { %1836 = vrot.lane.b32.xlu1 %v5338_v7, %s4825_s26  ;;  %1764 = vst.msk [vmem:[%s5053_s15 + $0x30] sm:$0xf] %vm913_vm0, %v5460_v62 }
 0x171   : > { %1258 = vrot.lane.b32.xlu0 %v5303_v61, %s4826_s27  ;;  %1000 = vrot.lane.b32.xlu2 %v5303_v61, %s4825_s26  ;;  %v801_v3 = vpop.f32.mrf.mxu2  ;;  %v717_v34 = vpop.f32.mrf.mxu1 }
 0x172   : > { %v985_v58 = vpop.permute.xlu1 %984  ;;  %v5476_v6 = vpack.c.bf16 %v801_v3, %v801_v3 }
 0x173   : > { %4235 = vst.msk [vmem:[%s5038_s3 + $0x8c] sm:$0xf] %vm913_vm0, %v985_v58  ;;  %v1464_v63 = vrot.slane %v985_v58, 4  ;;  %v1823_v0 = vpop.permute.xlu0 %1822  ;;  %v1827_v2 = vpop.permute.xlu2 %1826 }
 0x174   : > { %4427 = vst.msk [vmem:[%s5053_s15 + $0x8c] sm:$0xf] %vm913_vm0, %v1823_v0 }
 0x175   : > { %4331 = vst.msk [vmem:[%s5045_s13 + $0x8c] sm:$0xf] %vm913_vm0, %v1464_v63 }
 0x176   : > { %4429 = vst.msk [vmem:[%s5053_s15 + $0x94] sm:$0xf] %vm913_vm0, %v1827_v2 }
 0x177   : > { %1765 = vst.msk [vmem:[%s5053_s15 + $0x34] sm:$0xf] %vm913_vm0, %v5476_v6 }
 0x178   : > { %1129 = vrot.lane.b32.xlu1 %v5303_v61, %s4824_s24 }
 0x179   : > { %1032 = vrot.lane.b32.xlu0 %v5249_v37, %s4825_s26  ;;  %1161 = vrot.lane.b32.xlu2 %v5249_v37, %s4824_s24  ;;  %v804_v43 = vpop.f32.mrf.mxu2 }
 0x17a   : > { %v1243_v10 = vpop.permute.xlu1 %1242  ;;  %v5565_v45 = vpack.c.bf16 %v804_v43, %v804_v43 }
 0x17b   : > { %4299 = vst.msk [vmem:[%s5038_s3 + $0x18c] sm:$0xf] %vm913_vm0, %v1243_v10  ;;  %v1658_v12 = vrot.slane %v1243_v10, 4  ;;  %v1116_v61 = vpop.permute.xlu0 %1115  ;;  %v1120_v1 = vpop.permute.xlu2 %1119 }
 0x17c   : > { %v1562_v14 = vrot.slane %v1116_v61, 4  ;;  %v1564_v15 = vrot.slane %v1120_v1, 4  ;;  %4268 = vst.msk [vmem:[%s5038_s3 + $0x110] sm:$0xf] %vm913_vm0, %v1116_v61 }
 0x17d   : > { %4395 = vst.msk [vmem:[%s5045_s13 + $0x18c] sm:$0xf] %vm913_vm0, %v1658_v12 }
 0x17e   : > { %4364 = vst.msk [vmem:[%s5045_s13 + $0x110] sm:$0xf] %vm913_vm0, %v1562_v14 }
 0x17f   : > { %4270 = vst.msk [vmem:[%s5038_s3 + $0x118] sm:$0xf] %vm913_vm0, %v1120_v1 }
 0x180   : > { %1290 = vrot.lane.b32.xlu1 %v5249_v37, %s4826_s27  ;;  %4366 = vst.msk [vmem:[%s5045_s13 + $0x118] sm:$0xf] %vm913_vm0, %v1564_v15  ;;  %v626_v37 = vpop.f32.mrf.mxu0 }
 0x181   : > { %1838 = vrot.lane.b32.xlu2 %v5362_v18, %s4825_s26  ;;  %1002 = vrot.lane.b32.xlu0 %v5412_v38, %s4825_s26  ;;  %v5515_v22 = vpack.c.bf16 %v715_v11, %v626_v37  ;;  %1766 = vst.msk [vmem:[%s5053_s15 + $0x38] sm:$0xf] %vm913_vm0, %v5565_v45  ;;  %v806_v63 = vpop.f32.mrf.mxu2 }
 0x182   : > { %v1825_v16 = vpop.permute.xlu1 %1824  ;;  %v5614_v61 = vpack.c.bf16 %v806_v63, %v806_v63 }
 0x183   : > { %4428 = vst.msk [vmem:[%s5053_s15 + $0x90] sm:$0xf] %vm913_vm0, %v1825_v16  ;;  %v1954_v17 = vpop.permute.xlu0 %1953  ;;  %v1958_v19 = vpop.permute.xlu2 %1957  ;;  %v1379_v30 = vrot.slane %v5515_v22, 4 }
 0x184   : > { %4460 = vst.msk [vmem:[%s5053_s15 + $0x110] sm:$0xf] %vm913_vm0, %v1954_v17 }
 0x185   : > { %4462 = vst.msk [vmem:[%s5053_s15 + $0x118] sm:$0xf] %vm913_vm0, %v1958_v19 }
 0x186   : > { %928 = vst.msk [vmem:[%s5038_s3 + $0x38] sm:$0xf] %vm913_vm0, %v5515_v22 }
 0x187   : > { %1443 = vst.msk [vmem:[%s5045_s13 + $0x38] sm:$0xf] %vm913_vm0, %v1379_v30 }
 0x188   : > { %1260 = vrot.lane.b32.xlu1 %v5412_v38, %s4826_s27  ;;  %v628_v31 = vpop.f32.mrf.mxu0  ;;  %1767 = vst.msk [vmem:[%s5053_s15 + $0x3c] sm:$0xf] %vm913_vm0, %v5614_v61 }
 0x189   : > { %1131 = vrot.lane.b32.xlu2 %v5412_v38, %s4824_s24  ;;  %1163 = vrot.lane.b32.xlu0 %v5268_v42, %s4824_s24  ;;  %v5535_v20 = vpack.c.bf16 %v717_v34, %v628_v31 }
 0x18a   : > { %v1118_v21 = vpop.permute.xlu1 %1117 }
 0x18b   : > { %4269 = vst.msk [vmem:[%s5038_s3 + $0x114] sm:$0xf] %vm913_vm0, %v1118_v21  ;;  %v1563_v25 = vrot.slane %v1118_v21, 4  ;;  %v1247_v23 = vpop.permute.xlu0 %1246  ;;  %v1251_v26 = vpop.permute.xlu2 %1250 }
 0x18c   : > { %v1660_v27 = vrot.slane %v1247_v23, 4  ;;  %v1662_v29 = vrot.slane %v1251_v26, 4  ;;  %4301 = vst.msk [vmem:[%s5038_s3 + $0x194] sm:$0xf] %vm913_vm0, %v1247_v23 }
 0x18d   : > { %4365 = vst.msk [vmem:[%s5045_s13 + $0x114] sm:$0xf] %vm913_vm0, %v1563_v25 }
 0x18e   : > { %4397 = vst.msk [vmem:[%s5045_s13 + $0x194] sm:$0xf] %vm913_vm0, %v1660_v27 }
 0x18f   : > { %4303 = vst.msk [vmem:[%s5038_s3 + $0x19c] sm:$0xf] %vm913_vm0, %v1251_v26  ;;  %v829_v26 = vpop.f32.mrf.mxu3 }
 0x190   : > { %1034 = vrot.lane.b32.xlu1 %v5268_v42, %s4825_s26  ;;  %4399 = vst.msk [vmem:[%s5045_s13 + $0x19c] sm:$0xf] %vm913_vm0, %v1662_v29 }
 0x191   : > { %1292 = vrot.lane.b32.xlu2 %v5268_v42, %s4826_s27  ;;  %1840 = vrot.lane.b32.xlu0 %v5460_v62, %s4825_s26  ;;  %929 = vst.msk [vmem:[%s5038_s3 + $0x3c] sm:$0xf] %vm913_vm0, %v5535_v20  ;;  %v1380_v42 = vrot.slane %v5535_v20, 4 }
 0x192   : > { %v1956_v35 = vpop.permute.xlu1 %1955 }
 0x193   : > { %4461 = vst.msk [vmem:[%s5053_s15 + $0x114] sm:$0xf] %vm913_vm0, %v1956_v35  ;;  %v991_v36 = vpop.permute.xlu0 %990  ;;  %v995_v38 = vpop.permute.xlu2 %994 }
 0x194   : > { %4238 = vst.msk [vmem:[%s5038_s3 + $0x98] sm:$0xf] %vm913_vm0, %v991_v36  ;;  %v1467_v39 = vrot.slane %v991_v36, 4  ;;  %v1469_v41 = vrot.slane %v995_v38, 4 }
 0x195   : > { %4240 = vst.msk [vmem:[%s5038_s3 + $0xa0] sm:$0xf] %vm913_vm0, %v995_v38 }
 0x196   : > { %4334 = vst.msk [vmem:[%s5045_s13 + $0x98] sm:$0xf] %vm913_vm0, %v1467_v39  ;;  %v5685_v39 = vpack.c.bf16 %v829_v26, %v829_v26 }
 0x197   : > { %4336 = vst.msk [vmem:[%s5045_s13 + $0xa0] sm:$0xf] %vm913_vm0, %v1469_v41 }
 0x198   : > { %1004 = vrot.lane.b32.xlu1 %v5430_v50, %s4825_s26  ;;  %1444 = vst.msk [vmem:[%s5045_s13 + $0x3c] sm:$0xf] %vm913_vm0, %v1380_v42  ;;  %v831_v42 = vpop.f32.mrf.mxu3 }
 0x199   : > { %1262 = vrot.lane.b32.xlu2 %v5430_v50, %s4826_s27  ;;  %1133 = vrot.lane.b32.xlu0 %v5430_v50, %s4824_s24  ;;  %1776 = vst.msk [vmem:[%s5053_s15 + $0x60] sm:$0xf] %vm913_vm0, %v5685_v39 }
 0x19a   : > { %v1249_v44 = vpop.permute.xlu1 %1248  ;;  %v720_v28 = vpop.f32.mrf.mxu1 }
 0x19b   : > { %4302 = vst.msk [vmem:[%s5038_s3 + $0x198] sm:$0xf] %vm913_vm0, %v1249_v44  ;;  %v1661_v47 = vrot.slane %v1249_v44, 4  ;;  %v1829_v48 = vpop.permute.xlu0 %1828  ;;  %v1156_v51 = vpop.permute.xlu2 %1155 }
 0x19c   : > { %v1582_v52 = vrot.slane %v1156_v51, 4  ;;  %4430 = vst.msk [vmem:[%s5053_s15 + $0x98] sm:$0xf] %vm913_vm0, %v1829_v48  ;;  %v5696_v48 = vpack.c.bf16 %v831_v42, %v831_v42 }
 0x19d   : > { %4398 = vst.msk [vmem:[%s5045_s13 + $0x198] sm:$0xf] %vm913_vm0, %v1661_v47 }
 0x19e   : > { %4288 = vst.msk [vmem:[%s5038_s3 + $0x160] sm:$0xf] %vm913_vm0, %v1156_v51 }
 0x19f   : > { %4384 = vst.msk [vmem:[%s5045_s13 + $0x160] sm:$0xf] %vm913_vm0, %v1582_v52 }
 0x1a0   : > { %1165 = vrot.lane.b32.xlu1 %v5298_v55, %s4824_s24  ;;  %1777 = vst.msk [vmem:[%s5053_s15 + $0x64] sm:$0xf] %vm913_vm0, %v5696_v48 }
 0x1a1   : > { %1036 = vrot.lane.b32.xlu2 %v5298_v55, %s4825_s26  ;;  %1294 = vrot.lane.b32.xlu0 %v5298_v55, %s4826_s27  ;;  %v631_v55 = vpop.f32.mrf.mxu0  ;;  %v809_v16 = vpop.f32.mrf.mxu2 }
 0x1a2   : > { %v993_v50 = vpop.permute.xlu1 %992  ;;  %v5598_v58 = vpack.c.bf16 %v720_v28, %v631_v55  ;;  %v722_v14 = vpop.f32.mrf.mxu1  ;;  %v5649_v23 = vpack.c.bf16 %v809_v16, %v809_v16 }
 0x1a3   : > { %4239 = vst.msk [vmem:[%s5038_s3 + $0x9c] sm:$0xf] %vm913_vm0, %v993_v50  ;;  %v1468_v54 = vrot.slane %v993_v50, 4  ;;  %v1122_v56 = vpop.permute.xlu0 %1121  ;;  %v1833_v57 = vpop.permute.xlu2 %1832 }
 0x1a4   : > { %v1565_v59 = vrot.slane %v1122_v56, 4  ;;  %4271 = vst.msk [vmem:[%s5038_s3 + $0x11c] sm:$0xf] %vm913_vm0, %v1122_v56  ;;  %v1381_v12 = vrot.slane %v5598_v58, 4 }
 0x1a5   : > { %4335 = vst.msk [vmem:[%s5045_s13 + $0x9c] sm:$0xf] %vm913_vm0, %v1468_v54 }
 0x1a6   : > { %4367 = vst.msk [vmem:[%s5045_s13 + $0x11c] sm:$0xf] %vm913_vm0, %v1565_v59 }
 0x1a7   : > { %4432 = vst.msk [vmem:[%s5053_s15 + $0xa0] sm:$0xf] %vm913_vm0, %v1833_v57 }
 0x1a8   : > { %1842 = vrot.lane.b32.xlu1 %v5476_v6, %s4825_s26  ;;  %930 = vst.msk [vmem:[%s5038_s3 + $0x40] sm:$0xf] %vm913_vm0, %v5598_v58 }
 0x1a9   : > { %1264 = vrot.lane.b32.xlu0 %v5515_v22, %s4826_s27  ;;  %1006 = vrot.lane.b32.xlu2 %v5515_v22, %s4825_s26  ;;  %v633_v1 = vpop.f32.mrf.mxu0  ;;  %1445 = vst.msk [vmem:[%s5045_s13 + $0x40] sm:$0xf] %vm913_vm0, %v1381_v12  ;;  %v811_v29 = vpop.f32.mrf.mxu2 }
 0x1aa   : > { %v1831_v0 = vpop.permute.xlu1 %1830  ;;  %v5624_v15 = vpack.c.bf16 %v722_v14, %v633_v1  ;;  %1768 = vst.msk [vmem:[%s5053_s15 + $0x40] sm:$0xf] %vm913_vm0, %v5649_v23  ;;  %v5668_v36 = vpack.c.bf16 %v811_v29, %v811_v29  ;;  %v725_v52 = vpop.f32.mrf.mxu1 }
 0x1ab   : > { %4431 = vst.msk [vmem:[%s5053_s15 + $0x9c] sm:$0xf] %vm913_vm0, %v1831_v0  ;;  %v1253_v2 = vpop.permute.xlu0 %1252  ;;  %v1126_v3 = vpop.permute.xlu2 %1125 }
 0x1ac   : > { %4304 = vst.msk [vmem:[%s5038_s3 + $0x1a0] sm:$0xf] %vm913_vm0, %v1253_v2  ;;  %v1663_v5 = vrot.slane %v1253_v2, 4  ;;  %v1567_v10 = vrot.slane %v1126_v3, 4  ;;  %v1382_v25 = vrot.slane %v5624_v15, 4 }
 0x1ad   : > { %4273 = vst.msk [vmem:[%s5038_s3 + $0x124] sm:$0xf] %vm913_vm0, %v1126_v3 }
 0x1ae   : > { %4400 = vst.msk [vmem:[%s5045_s13 + $0x1a0] sm:$0xf] %vm913_vm0, %v1663_v5 }
 0x1af   : > { %4369 = vst.msk [vmem:[%s5045_s13 + $0x124] sm:$0xf] %vm913_vm0, %v1567_v10 }
 0x1b0   : > { %1135 = vrot.lane.b32.xlu1 %v5515_v22, %s4824_s24  ;;  %931 = vst.msk [vmem:[%s5038_s3 + $0x44] sm:$0xf] %vm913_vm0, %v5624_v15 }
 0x1b1   : > { %1038 = vrot.lane.b32.xlu0 %v5327_v4, %s4825_s26  ;;  %1167 = vrot.lane.b32.xlu2 %v5327_v4, %s4824_s24  ;;  %1446 = vst.msk [vmem:[%s5045_s13 + $0x44] sm:$0xf] %vm913_vm0, %v1382_v25  ;;  %v636_v51 = vpop.f32.mrf.mxu0  ;;  %v814_v2 = vpop.f32.mrf.mxu2 }
 0x1b2   : > { %v1124_v17 = vpop.permute.xlu1 %1123  ;;  %1769 = vst.msk [vmem:[%s5053_s15 + $0x44] sm:$0xf] %vm913_vm0, %v5668_v36  ;;  %v5713_v54 = vpack.c.bf16 %v725_v52, %v636_v51  ;;  %v727_v63 = vpop.f32.mrf.mxu1 }
 0x1b3   : > { %4272 = vst.msk [vmem:[%s5038_s3 + $0x120] sm:$0xf] %vm913_vm0, %v1124_v17  ;;  %v1566_v19 = vrot.slane %v1124_v17, 4  ;;  %v1027_v37 = vpop.permute.xlu0 %1026  ;;  %v1287_v11 = vpop.permute.xlu2 %1286 }
 0x1b4   : > { %v1485_v21 = vrot.slane %v1027_v37, 4  ;;  %v1680_v22 = vrot.slane %v1287_v11, 4  ;;  %4256 = vst.msk [vmem:[%s5038_s3 + $0xe0] sm:$0xf] %vm913_vm0, %v1027_v37  ;;  %v1383_v55 = vrot.slane %v5713_v54, 4 }
 0x1b5   : > { %4368 = vst.msk [vmem:[%s5045_s13 + $0x120] sm:$0xf] %vm913_vm0, %v1566_v19  ;;  %v5763_v19 = vpack.c.bf16 %v814_v2, %v814_v2 }
 0x1b6   : > { %4352 = vst.msk [vmem:[%s5045_s13 + $0xe0] sm:$0xf] %vm913_vm0, %v1485_v21 }
 0x1b7   : > { %4321 = vst.msk [vmem:[%s5038_s3 + $0x1e4] sm:$0xf] %vm913_vm0, %v1287_v11 }
 0x1b8   : > { %1296 = vrot.lane.b32.xlu1 %v5327_v4, %s4826_s27  ;;  %4417 = vst.msk [vmem:[%s5045_s13 + $0x1e4] sm:$0xf] %vm913_vm0, %v1680_v22 }
 0x1b9   : > { %1844 = vrot.lane.b32.xlu2 %v5565_v45, %s4825_s26  ;;  %1008 = vrot.lane.b32.xlu0 %v5535_v20, %s4825_s26  ;;  %932 = vst.msk [vmem:[%s5038_s3 + $0x48] sm:$0xf] %vm913_vm0, %v5713_v54  ;;  %v638_v28 = vpop.f32.mrf.mxu0  ;;  %v816_v11 = vpop.f32.mrf.mxu2 }
 0x1ba   : > { %v1285_v27 = vpop.permute.xlu1 %1284  ;;  %1447 = vst.msk [vmem:[%s5045_s13 + $0x48] sm:$0xf] %vm913_vm0, %v1383_v55  ;;  %v5733_v0 = vpack.c.bf16 %v727_v63, %v638_v28  ;;  %v5774_v26 = vpack.c.bf16 %v816_v11, %v816_v11  ;;  %v730_v29 = vpop.f32.mrf.mxu1 }
 0x1bb   : > { %4320 = vst.msk [vmem:[%s5038_s3 + $0x1e0] sm:$0xf] %vm913_vm0, %v1285_v27  ;;  %v1679_v4 = vrot.slane %v1285_v27, 4  ;;  %v997_v30 = vpop.permute.xlu0 %996  ;;  %v1257_v31 = vpop.permute.xlu2 %1256 }
 0x1bc   : > { %v1470_v34 = vrot.slane %v997_v30, 4  ;;  %v1665_v35 = vrot.slane %v1257_v31, 4  ;;  %4241 = vst.msk [vmem:[%s5038_s3 + $0xa4] sm:$0xf] %vm913_vm0, %v997_v30  ;;  %v1384_v16 = vrot.slane %v5733_v0, 4 }
 0x1bd   : > { %4416 = vst.msk [vmem:[%s5045_s13 + $0x1e0] sm:$0xf] %vm913_vm0, %v1679_v4 }
 0x1be   : > { %4337 = vst.msk [vmem:[%s5045_s13 + $0xa4] sm:$0xf] %vm913_vm0, %v1470_v34 }
 0x1bf   : > { %4306 = vst.msk [vmem:[%s5038_s3 + $0x1a8] sm:$0xf] %vm913_vm0, %v1257_v31 }
 0x1c0   : > { %1266 = vrot.lane.b32.xlu1 %v5535_v20, %s4826_s27  ;;  %4402 = vst.msk [vmem:[%s5045_s13 + $0x1a8] sm:$0xf] %vm913_vm0, %v1665_v35 }
 0x1c1   : > { %1137 = vrot.lane.b32.xlu2 %v5535_v20, %s4824_s24  ;;  %1169 = vrot.lane.b32.xlu0 %v5358_v8, %s4824_s24  ;;  %933 = vst.msk [vmem:[%s5038_s3 + $0x4c] sm:$0xf] %vm913_vm0, %v5733_v0  ;;  %v641_v4 = vpop.f32.mrf.mxu0  ;;  %v819_v63 = vpop.f32.mrf.mxu2 }
 0x1c2   : > { %v1255_v38 = vpop.permute.xlu1 %1254  ;;  %1448 = vst.msk [vmem:[%s5045_s13 + $0x4c] sm:$0xf] %vm913_vm0, %v1384_v16  ;;  %v5794_v34 = vpack.c.bf16 %v730_v29, %v641_v4 }
 0x1c3   : > { %4305 = vst.msk [vmem:[%s5038_s3 + $0x1a4] sm:$0xf] %vm913_vm0, %v1255_v38  ;;  %v1664_v41 = vrot.slane %v1255_v38, 4  ;;  %v1158_v43 = vpop.permute.xlu0 %1157  ;;  %v1031_v44 = vpop.permute.xlu2 %1030 }
 0x1c4   : > { %v1583_v20 = vrot.slane %v1158_v43, 4  ;;  %v1487_v47 = vrot.slane %v1031_v44, 4  ;;  %4289 = vst.msk [vmem:[%s5038_s3 + $0x164] sm:$0xf] %vm913_vm0, %v1158_v43  ;;  %v1385_v42 = vrot.slane %v5794_v34, 4 }
 0x1c5   : > { %4401 = vst.msk [vmem:[%s5045_s13 + $0x1a4] sm:$0xf] %vm913_vm0, %v1664_v41 }
 0x1c6   : > { %4385 = vst.msk [vmem:[%s5045_s13 + $0x164] sm:$0xf] %vm913_vm0, %v1583_v20  ;;  %v732_v20 = vpop.f32.mrf.mxu1 }
 0x1c7   : > { %4258 = vst.msk [vmem:[%s5038_s3 + $0xe8] sm:$0xf] %vm913_vm0, %v1031_v44 }
 0x1c8   : > { %1040 = vrot.lane.b32.xlu1 %v5358_v8, %s4825_s26  ;;  %4354 = vst.msk [vmem:[%s5045_s13 + $0xe8] sm:$0xf] %vm913_vm0, %v1487_v47 }
 0x1c9   : > { %1298 = vrot.lane.b32.xlu2 %v5358_v8, %s4826_s27  ;;  %1846 = vrot.lane.b32.xlu0 %v5614_v61, %s4825_s26  ;;  %1770 = vst.msk [vmem:[%s5053_s15 + $0x48] sm:$0xf] %vm913_vm0, %v5763_v19  ;;  %v643_v44 = vpop.f32.mrf.mxu0 }
 0x1ca   : > { %v1029_v50 = vpop.permute.xlu1 %1028  ;;  %1771 = vst.msk [vmem:[%s5053_s15 + $0x4c] sm:$0xf] %vm913_vm0, %v5774_v26  ;;  %v5816_v47 = vpack.c.bf16 %v732_v20, %v643_v44 }
 0x1cb   : > { %4257 = vst.msk [vmem:[%s5038_s3 + $0xe4] sm:$0xf] %vm913_vm0, %v1029_v50  ;;  %v1486_v56 = vrot.slane %v1029_v50, 4  ;;  %v1835_v57 = vpop.permute.xlu0 %1834  ;;  %v1001_v59 = vpop.permute.xlu2 %1000 }
 0x1cc   : > { %v1472_v8 = vrot.slane %v1001_v59, 4  ;;  %4433 = vst.msk [vmem:[%s5053_s15 + $0xa4] sm:$0xf] %vm913_vm0, %v1835_v57  ;;  %v1386_v55 = vrot.slane %v5816_v47, 4 }
 0x1cd   : > { %4353 = vst.msk [vmem:[%s5045_s13 + $0xe4] sm:$0xf] %vm913_vm0, %v1486_v56 }
 0x1ce   : > { %4243 = vst.msk [vmem:[%s5038_s3 + $0xac] sm:$0xf] %vm913_vm0, %v1001_v59 }
 0x1cf   : > { %4339 = vst.msk [vmem:[%s5045_s13 + $0xac] sm:$0xf] %vm913_vm0, %v1472_v8 }
 0x1d0   : > { %1010 = vrot.lane.b32.xlu1 %v5598_v58, %s4825_s26  ;;  %934 = vst.msk [vmem:[%s5038_s3 + $0x50] sm:$0xf] %vm913_vm0, %v5794_v34 }
 0x1d1   : > { %1268 = vrot.lane.b32.xlu2 %v5598_v58, %s4826_s27  ;;  %1139 = vrot.lane.b32.xlu0 %v5598_v58, %s4824_s24  ;;  %v834_v58 = vpop.f32.mrf.mxu3  ;;  %1449 = vst.msk [vmem:[%s5045_s13 + $0x50] sm:$0xf] %vm913_vm0, %v1385_v42 }
 0x1d2   : > { %v999_v3 = vpop.permute.xlu1 %998  ;;  %v5778_v27 = vpack.c.bf16 %v834_v58, %v834_v58  ;;  %935 = vst.msk [vmem:[%s5038_s3 + $0x54] sm:$0xf] %vm913_vm0, %v5816_v47  ;;  %v646_v58 = vpop.f32.mrf.mxu0 }
 0x1d3   : > { %4242 = vst.msk [vmem:[%s5038_s3 + $0xa8] sm:$0xf] %vm913_vm0, %v999_v3  ;;  %v1471_v5 = vrot.slane %v999_v3, 4  ;;  %v1128_v10 = vpop.permute.xlu0 %1127  ;;  %v1162_v12 = vpop.permute.xlu2 %1161 }
 0x1d4   : > { %v1568_v1 = vrot.slane %v1128_v10, 4  ;;  %v1585_v14 = vrot.slane %v1162_v12, 4  ;;  %4274 = vst.msk [vmem:[%s5038_s3 + $0x128] sm:$0xf] %vm913_vm0, %v1128_v10 }
 0x1d5   : > { %4338 = vst.msk [vmem:[%s5045_s13 + $0xa8] sm:$0xf] %vm913_vm0, %v1471_v5 }
 0x1d6   : > { %4370 = vst.msk [vmem:[%s5045_s13 + $0x128] sm:$0xf] %vm913_vm0, %v1568_v1 }
 0x1d7   : > { %4291 = vst.msk [vmem:[%s5038_s3 + $0x16c] sm:$0xf] %vm913_vm0, %v1162_v12 }
 0x1d8   : > { %1848 = vrot.lane.b32.xlu1 %v5649_v23, %s4825_s26  ;;  %4387 = vst.msk [vmem:[%s5045_s13 + $0x16c] sm:$0xf] %vm913_vm0, %v1585_v14  ;;  %v5866_v14 = vpack.c.bf16 %v819_v63, %v819_v63 }
 0x1d9   : > { %1864 = vrot.lane.b32.xlu0 %v5685_v39, %s4825_s26  ;;  %1012 = vrot.lane.b32.xlu2 %v5624_v15, %s4825_s26  ;;  %1778 = vst.msk [vmem:[%s5053_s15 + $0x68] sm:$0xf] %vm913_vm0, %v5778_v27  ;;  %v836_v30 = vpop.f32.mrf.mxu3 }
 0x1da   : > { %v1160_v17 = vpop.permute.xlu1 %1159  ;;  %v5806_v43 = vpack.c.bf16 %v836_v30, %v836_v30  ;;  %1450 = vst.msk [vmem:[%s5045_s13 + $0x54] sm:$0xf] %vm913_vm0, %v1386_v55 }
 0x1db   : > { %4290 = vst.msk [vmem:[%s5038_s3 + $0x168] sm:$0xf] %vm913_vm0, %v1160_v17  ;;  %v1584_v37 = vrot.slane %v1160_v17, 4  ;;  %v1289_v21 = vpop.permute.xlu0 %1288  ;;  %v1839_v22 = vpop.permute.xlu2 %1838 }
 0x1dc   : > { %v1681_v25 = vrot.slane %v1289_v21, 4  ;;  %4322 = vst.msk [vmem:[%s5038_s3 + $0x1e8] sm:$0xf] %vm913_vm0, %v1289_v21  ;;  %v735_v17 = vpop.f32.mrf.mxu1 }
 0x1dd   : > { %4386 = vst.msk [vmem:[%s5045_s13 + $0x168] sm:$0xf] %vm913_vm0, %v1584_v37  ;;  %v821_v37 = vpop.f32.mrf.mxu2  ;;  %v5884_v4 = vpack.c.bf16 %v735_v17, %v646_v58 }
 0x1de   : > { %4418 = vst.msk [vmem:[%s5045_s13 + $0x1e8] sm:$0xf] %vm913_vm0, %v1681_v25 }
 0x1df   : > { %4435 = vst.msk [vmem:[%s5053_s15 + $0xac] sm:$0xf] %vm913_vm0, %v1839_v22  ;;  %v1387_v30 = vrot.slane %v5884_v4, 4 }
 0x1e0   : > { %1141 = vrot.lane.b32.xlu1 %v5624_v15, %s4824_s24  ;;  %1779 = vst.msk [vmem:[%s5053_s15 + $0x6c] sm:$0xf] %vm913_vm0, %v5806_v43 }
 0x1e1   : > { %1270 = vrot.lane.b32.xlu0 %v5624_v15, %s4826_s27  ;;  %1850 = vrot.lane.b32.xlu2 %v5668_v36, %s4825_s26  ;;  %v839_v50 = vpop.f32.mrf.mxu3  ;;  %1772 = vst.msk [vmem:[%s5053_s15 + $0x50] sm:$0xf] %vm913_vm0, %v5866_v14 }
 0x1e2   : > { %v1837_v31 = vpop.permute.xlu1 %1836  ;;  %v5841_v28 = vpack.c.bf16 %v839_v50, %v839_v50  ;;  %936 = vst.msk [vmem:[%s5038_s3 + $0x58] sm:$0xf] %vm913_vm0, %v5884_v4 }
 0x1e3   : > { %4434 = vst.msk [vmem:[%s5053_s15 + $0xa8] sm:$0xf] %vm913_vm0, %v1837_v31  ;;  %v1259_v35 = vpop.permute.xlu0 %1258  ;;  %v1132_v38 = vpop.permute.xlu2 %1131 }
 0x1e4   : > { %4307 = vst.msk [vmem:[%s5038_s3 + $0x1ac] sm:$0xf] %vm913_vm0, %v1259_v35  ;;  %v1666_v15 = vrot.slane %v1259_v35, 4  ;;  %v1570_v41 = vrot.slane %v1132_v38, 4  ;;  %v648_v31 = vpop.f32.mrf.mxu0  ;;  %v737_v35 = vpop.f32.mrf.mxu1 }
 0x1e5   : > { %4276 = vst.msk [vmem:[%s5038_s3 + $0x130] sm:$0xf] %vm913_vm0, %v1132_v38  ;;  %v5910_v20 = vpack.c.bf16 %v737_v35, %v648_v31 }
 0x1e6   : > { %4403 = vst.msk [vmem:[%s5045_s13 + $0x1ac] sm:$0xf] %vm913_vm0, %v1666_v15 }
 0x1e7   : > { %4372 = vst.msk [vmem:[%s5045_s13 + $0x130] sm:$0xf] %vm913_vm0, %v1570_v41  ;;  %v824_v41 = vpop.f32.mrf.mxu2  ;;  %v1388_v50 = vrot.slane %v5910_v20, 4 }
 0x1e8   : > { %1866 = vrot.lane.b32.xlu1 %v5696_v48, %s4825_s26  ;;  %1780 = vst.msk [vmem:[%s5053_s15 + $0x70] sm:$0xf] %vm913_vm0, %v5841_v28 }
 0x1e9   : > { %1143 = vrot.lane.b32.xlu2 %v5713_v54, %s4824_s24  ;;  %1014 = vrot.lane.b32.xlu0 %v5713_v54, %s4825_s26  ;;  %v841_v1 = vpop.f32.mrf.mxu3  ;;  %1451 = vst.msk [vmem:[%s5045_s13 + $0x58] sm:$0xf] %vm913_vm0, %v1387_v30 }
 0x1ea   : > { %v1130_v51 = vpop.permute.xlu1 %1129  ;;  %v5868_v16 = vpack.c.bf16 %v841_v1, %v841_v1  ;;  %937 = vst.msk [vmem:[%s5038_s3 + $0x5c] sm:$0xf] %vm913_vm0, %v5910_v20 }
 0x1eb   : > { %4275 = vst.msk [vmem:[%s5038_s3 + $0x12c] sm:$0xf] %vm913_vm0, %v1130_v51  ;;  %v1569_v52 = vrot.slane %v1130_v51, 4  ;;  %v1033_v56 = vpop.permute.xlu0 %1032  ;;  %v1293_v57 = vpop.permute.xlu2 %1292 }
 0x1ec   : > { %v1488_v59 = vrot.slane %v1033_v56, 4  ;;  %v1683_v8 = vrot.slane %v1293_v57, 4  ;;  %4259 = vst.msk [vmem:[%s5038_s3 + $0xec] sm:$0xf] %vm913_vm0, %v1033_v56 }
 0x1ed   : > { %4371 = vst.msk [vmem:[%s5045_s13 + $0x12c] sm:$0xf] %vm913_vm0, %v1569_v52  ;;  %v5914_v52 = vpack.c.bf16 %v821_v37, %v821_v37 }
 0x1ee   : > { %4355 = vst.msk [vmem:[%s5045_s13 + $0xec] sm:$0xf] %vm913_vm0, %v1488_v59 }
 0x1ef   : > { %4324 = vst.msk [vmem:[%s5038_s3 + $0x1f0] sm:$0xf] %vm913_vm0, %v1293_v57 }
 0x1f0   : > { %1272 = vrot.lane.b32.xlu1 %v5713_v54, %s4826_s27  ;;  %4420 = vst.msk [vmem:[%s5045_s13 + $0x1f0] sm:$0xf] %vm913_vm0, %v1683_v8 }
 0x1f1   : > { %1868 = vrot.lane.b32.xlu2 %v5778_v27, %s4825_s26  ;;  %1852 = vrot.lane.b32.xlu0 %v5763_v19, %s4825_s26  ;;  %1781 = vst.msk [vmem:[%s5053_s15 + $0x74] sm:$0xf] %vm913_vm0, %v5868_v16  ;;  %v844_v56 = vpop.f32.mrf.mxu3 }
 0x1f2   : > { %v1291_v2 = vpop.permute.xlu1 %1290  ;;  %1773 = vst.msk [vmem:[%s5053_s15 + $0x54] sm:$0xf] %vm913_vm0, %v5914_v52 }
 0x1f3   : > { %4323 = vst.msk [vmem:[%s5038_s3 + $0x1ec] sm:$0xf] %vm913_vm0, %v1291_v2  ;;  %v1682_v54 = vrot.slane %v1291_v2, 4  ;;  %v1003_v3 = vpop.permute.xlu0 %1002  ;;  %v1263_v5 = vpop.permute.xlu2 %1262 }
 0x1f4   : > { %v1473_v10 = vrot.slane %v1003_v3, 4  ;;  %v1668_v12 = vrot.slane %v1263_v5, 4  ;;  %4244 = vst.msk [vmem:[%s5038_s3 + $0xb0] sm:$0xf] %vm913_vm0, %v1003_v3  ;;  %v826_v2 = vpop.f32.mrf.mxu2 }
 0x1f5   : > { %4419 = vst.msk [vmem:[%s5045_s13 + $0x1ec] sm:$0xf] %vm913_vm0, %v1682_v54  ;;  %v5943_v54 = vpack.c.bf16 %v824_v41, %v824_v41  ;;  %v5951_v3 = vpack.c.bf16 %v826_v2, %v826_v2 }
 0x1f6   : > { %4340 = vst.msk [vmem:[%s5045_s13 + $0xb0] sm:$0xf] %vm913_vm0, %v1473_v10 }
 0x1f7   : > { %4309 = vst.msk [vmem:[%s5038_s3 + $0x1b4] sm:$0xf] %vm913_vm0, %v1263_v5 }
 0x1f8   : > { %1016 = vrot.lane.b32.xlu1 %v5733_v0, %s4825_s26  ;;  %4405 = vst.msk [vmem:[%s5045_s13 + $0x1b4] sm:$0xf] %vm913_vm0, %v1668_v12 }
 0x1f9   : > { %1274 = vrot.lane.b32.xlu2 %v5733_v0, %s4826_s27  ;;  %1145 = vrot.lane.b32.xlu0 %v5733_v0, %s4824_s24  ;;  %1452 = vst.msk [vmem:[%s5045_s13 + $0x5c] sm:$0xf] %vm913_vm0, %v1388_v50  ;;  %v846_v12 = vpop.f32.mrf.mxu3 }
 0x1fa   : > { %v1261_v11 = vpop.permute.xlu1 %1260  ;;  %1774 = vst.msk [vmem:[%s5053_s15 + $0x58] sm:$0xf] %vm913_vm0, %v5943_v54  ;;  %v5971_v37 = vpack.c.bf16 %v846_v12, %v846_v12 }
 0x1fb   : > { %4308 = vst.msk [vmem:[%s5038_s3 + $0x1b0] sm:$0xf] %vm913_vm0, %v1261_v11  ;;  %v1667_v21 = vrot.slane %v1261_v11, 4  ;;  %v1164_v22 = vpop.permute.xlu0 %1163  ;;  %v1037_v25 = vpop.permute.xlu2 %1036  ;;  %v5975_v11 = vpack.c.bf16 %v844_v56, %v844_v56 }
 0x1fc   : > { %v1586_v29 = vrot.slane %v1164_v22, 4  ;;  %v1490_v0 = vrot.slane %v1037_v25, 4  ;;  %4292 = vst.msk [vmem:[%s5038_s3 + $0x170] sm:$0xf] %vm913_vm0, %v1164_v22 }
 0x1fd   : > { %4404 = vst.msk [vmem:[%s5045_s13 + $0x1b0] sm:$0xf] %vm913_vm0, %v1667_v21 }
 0x1fe   : > { %4388 = vst.msk [vmem:[%s5045_s13 + $0x170] sm:$0xf] %vm913_vm0, %v1586_v29 }
 0x1ff   : > { %4261 = vst.msk [vmem:[%s5038_s3 + $0xf4] sm:$0xf] %vm913_vm0, %v1037_v25 }
 0x200   : > { %1854 = vrot.lane.b32.xlu1 %v5774_v26, %s4825_s26  ;;  %4357 = vst.msk [vmem:[%s5045_s13 + $0xf4] sm:$0xf] %vm913_vm0, %v1490_v0 }
 0x201   : > { %1870 = vrot.lane.b32.xlu0 %v5806_v43, %s4825_s26  ;;  %1018 = vrot.lane.b32.xlu2 %v5794_v34, %s4825_s26  ;;  %1775 = vst.msk [vmem:[%s5053_s15 + $0x5c] sm:$0xf] %vm913_vm0, %v5951_v3 }
 0x202   : > { %v1035_v38 = vpop.permute.xlu1 %1034  ;;  %1782 = vst.msk [vmem:[%s5053_s15 + $0x78] sm:$0xf] %vm913_vm0, %v5975_v11 }
 0x203   : > { %4260 = vst.msk [vmem:[%s5038_s3 + $0xf0] sm:$0xf] %vm913_vm0, %v1035_v38  ;;  %v1489_v15 = vrot.slane %v1035_v38, 4  ;;  %v1841_v42 = vpop.permute.xlu0 %1840  ;;  %v1007_v44 = vpop.permute.xlu2 %1006 }
 0x204   : > { %v1475_v51 = vrot.slane %v1007_v44, 4  ;;  %4436 = vst.msk [vmem:[%s5053_s15 + $0xb0] sm:$0xf] %vm913_vm0, %v1841_v42 }
 0x205   : > { %4356 = vst.msk [vmem:[%s5045_s13 + $0xf0] sm:$0xf] %vm913_vm0, %v1489_v15 }
 0x206   : > { %4246 = vst.msk [vmem:[%s5038_s3 + $0xb8] sm:$0xf] %vm913_vm0, %v1007_v44 }
 0x207   : > { %4342 = vst.msk [vmem:[%s5045_s13 + $0xb8] sm:$0xf] %vm913_vm0, %v1475_v51 }
 0x208   : > { %1147 = vrot.lane.b32.xlu1 %v5794_v34, %s4824_s24  ;;  %1783 = vst.msk [vmem:[%s5053_s15 + $0x7c] sm:$0xf] %vm913_vm0, %v5971_v37 }
 0x209   : > { %1276 = vrot.lane.b32.xlu0 %v5794_v34, %s4826_s27  ;;  %1856 = vrot.lane.b32.xlu2 %v5866_v14, %s4825_s26 }
 0x20a   : > { %v1005_v57 = vpop.permute.xlu1 %1004 }
 0x20b   : > { %4245 = vst.msk [vmem:[%s5038_s3 + $0xb4] sm:$0xf] %vm913_vm0, %v1005_v57  ;;  %v1474_v59 = vrot.slane %v1005_v57, 4  ;;  %v1134_v8 = vpop.permute.xlu0 %1133  ;;  %v1168_v55 = vpop.permute.xlu2 %1167 }
 0x20c   : > { %v1571_v63 = vrot.slane %v1134_v8, 4  ;;  %v1588_v34 = vrot.slane %v1168_v55, 4  ;;  %4277 = vst.msk [vmem:[%s5038_s3 + $0x134] sm:$0xf] %vm913_vm0, %v1134_v8 }
 0x20d   : > { %4341 = vst.msk [vmem:[%s5045_s13 + $0xb4] sm:$0xf] %vm913_vm0, %v1474_v59 }
 0x20e   : > { %4373 = vst.msk [vmem:[%s5045_s13 + $0x134] sm:$0xf] %vm913_vm0, %v1571_v63 }
 0x20f   : > { %4294 = vst.msk [vmem:[%s5038_s3 + $0x178] sm:$0xf] %vm913_vm0, %v1168_v55 }
 0x210   : > { %1872 = vrot.lane.b32.xlu1 %v5841_v28, %s4825_s26  ;;  %4390 = vst.msk [vmem:[%s5045_s13 + $0x178] sm:$0xf] %vm913_vm0, %v1588_v34 }
 0x211   : > { %1149 = vrot.lane.b32.xlu2 %v5816_v47, %s4824_s24  ;;  %1020 = vrot.lane.b32.xlu0 %v5816_v47, %s4825_s26 }
 0x212   : > { %v1166_v5 = vpop.permute.xlu1 %1165 }
 0x213   : > { %4293 = vst.msk [vmem:[%s5038_s3 + $0x174] sm:$0xf] %vm913_vm0, %v1166_v5  ;;  %v1587_v10 = vrot.slane %v1166_v5, 4  ;;  %v1295_v1 = vpop.permute.xlu0 %1294  ;;  %v1845_v58 = vpop.permute.xlu2 %1844 }
 0x214   : > { %v1684_v17 = vrot.slane %v1295_v1, 4  ;;  %4325 = vst.msk [vmem:[%s5038_s3 + $0x1f4] sm:$0xf] %vm913_vm0, %v1295_v1 }
 0x215   : > { %4389 = vst.msk [vmem:[%s5045_s13 + $0x174] sm:$0xf] %vm913_vm0, %v1587_v10 }
 0x216   : > { %4421 = vst.msk [vmem:[%s5045_s13 + $0x1f4] sm:$0xf] %vm913_vm0, %v1684_v17 }
 0x217   : > { %4438 = vst.msk [vmem:[%s5053_s15 + $0xb8] sm:$0xf] %vm913_vm0, %v1845_v58 }
 0x218   : > { %1278 = vrot.lane.b32.xlu1 %v5816_v47, %s4826_s27 }
 0x219   : > { %1874 = vrot.lane.b32.xlu2 %v5868_v16, %s4825_s26  ;;  %1858 = vrot.lane.b32.xlu0 %v5914_v52, %s4825_s26 }
 0x21a   : > { %v1843_v21 = vpop.permute.xlu1 %1842 }
 0x21b   : > { %4437 = vst.msk [vmem:[%s5053_s15 + $0xb4] sm:$0xf] %vm913_vm0, %v1843_v21  ;;  %v1265_v22 = vpop.permute.xlu0 %1264  ;;  %v1138_v25 = vpop.permute.xlu2 %1137 }
 0x21c   : > { %4310 = vst.msk [vmem:[%s5038_s3 + $0x1b8] sm:$0xf] %vm913_vm0, %v1265_v22  ;;  %v1669_v47 = vrot.slane %v1265_v22, 4  ;;  %v1573_v29 = vrot.slane %v1138_v25, 4 }
 0x21d   : > { %4279 = vst.msk [vmem:[%s5038_s3 + $0x13c] sm:$0xf] %vm913_vm0, %v1138_v25 }
 0x21e   : > { %4406 = vst.msk [vmem:[%s5045_s13 + $0x1b8] sm:$0xf] %vm913_vm0, %v1669_v47 }
 0x21f   : > { %4375 = vst.msk [vmem:[%s5045_s13 + $0x13c] sm:$0xf] %vm913_vm0, %v1573_v29 }
 0x220   : > { %1022 = vrot.lane.b32.xlu1 %v5884_v4, %s4825_s26 }
 0x221   : > { %1280 = vrot.lane.b32.xlu2 %v5884_v4, %s4826_s27  ;;  %1151 = vrot.lane.b32.xlu0 %v5884_v4, %s4824_s24 }
 0x222   : > { %v1136_v0 = vpop.permute.xlu1 %1135 }
 0x223   : > { %4278 = vst.msk [vmem:[%s5038_s3 + $0x138] sm:$0xf] %vm913_vm0, %v1136_v0  ;;  %v1572_v30 = vrot.slane %v1136_v0, 4  ;;  %v1039_v31 = vpop.permute.xlu0 %1038  ;;  %v1299_v35 = vpop.permute.xlu2 %1298 }
 0x224   : > { %v1491_v38 = vrot.slane %v1039_v31, 4  ;;  %v1686_v15 = vrot.slane %v1299_v35, 4  ;;  %4262 = vst.msk [vmem:[%s5038_s3 + $0xf8] sm:$0xf] %vm913_vm0, %v1039_v31 }
 0x225   : > { %4374 = vst.msk [vmem:[%s5045_s13 + $0x138] sm:$0xf] %vm913_vm0, %v1572_v30 }
 0x226   : > { %4358 = vst.msk [vmem:[%s5045_s13 + $0xf8] sm:$0xf] %vm913_vm0, %v1491_v38 }
 0x227   : > { %4327 = vst.msk [vmem:[%s5038_s3 + $0x1fc] sm:$0xf] %vm913_vm0, %v1299_v35 }
 0x228   : > { %1860 = vrot.lane.b32.xlu1 %v5943_v54, %s4825_s26  ;;  %4423 = vst.msk [vmem:[%s5045_s13 + $0x1fc] sm:$0xf] %vm913_vm0, %v1686_v15 }
 0x229   : > { %1876 = vrot.lane.b32.xlu0 %v5975_v11, %s4825_s26  ;;  %1024 = vrot.lane.b32.xlu2 %v5910_v20, %s4825_s26 }
 0x22a   : > { %v1297_v4 = vpop.permute.xlu1 %1296 }
 0x22b   : > { %4326 = vst.msk [vmem:[%s5038_s3 + $0x1f8] sm:$0xf] %vm913_vm0, %v1297_v4  ;;  %v1685_v41 = vrot.slane %v1297_v4, 4  ;;  %v1009_v42 = vpop.permute.xlu0 %1008  ;;  %v1269_v44 = vpop.permute.xlu2 %1268 }
 0x22c   : > { %v1476_v51 = vrot.slane %v1009_v42, 4  ;;  %v1671_v50 = vrot.slane %v1269_v44, 4  ;;  %4247 = vst.msk [vmem:[%s5038_s3 + $0xbc] sm:$0xf] %vm913_vm0, %v1009_v42 }
 0x22d   : > { %4422 = vst.msk [vmem:[%s5045_s13 + $0x1f8] sm:$0xf] %vm913_vm0, %v1685_v41 }
 0x22e   : > { %4343 = vst.msk [vmem:[%s5045_s13 + $0xbc] sm:$0xf] %vm913_vm0, %v1476_v51 }
 0x22f   : > { %4312 = vst.msk [vmem:[%s5038_s3 + $0x1c0] sm:$0xf] %vm913_vm0, %v1269_v44 }
 0x230   : > { %1153 = vrot.lane.b32.xlu1 %v5910_v20, %s4824_s24  ;;  %4408 = vst.msk [vmem:[%s5045_s13 + $0x1c0] sm:$0xf] %vm913_vm0, %v1671_v50 }
 0x231   : > { %1282 = vrot.lane.b32.xlu0 %v5910_v20, %s4826_s27  ;;  %1862 = vrot.lane.b32.xlu2 %v5951_v3, %s4825_s26 }
 0x232   : > { %v1267_v56 = vpop.permute.xlu1 %1266 }
 0x233   : > { %4311 = vst.msk [vmem:[%s5038_s3 + $0x1bc] sm:$0xf] %vm913_vm0, %v1267_v56  ;;  %v1670_v57 = vrot.slane %v1267_v56, 4  ;;  %v1170_v59 = vpop.permute.xlu0 %1169  ;;  %v1013_v8 = vpop.permute.xlu2 %1012 }
 0x234   : > { %v1589_v55 = vrot.slane %v1170_v59, 4  ;;  %v1478_v63 = vrot.slane %v1013_v8, 4  ;;  %4295 = vst.msk [vmem:[%s5038_s3 + $0x17c] sm:$0xf] %vm913_vm0, %v1170_v59 }
 0x235   : > { %4407 = vst.msk [vmem:[%s5045_s13 + $0x1bc] sm:$0xf] %vm913_vm0, %v1670_v57 }
 0x236   : > { %4391 = vst.msk [vmem:[%s5045_s13 + $0x17c] sm:$0xf] %vm913_vm0, %v1589_v55 }
 0x237   : > { %4249 = vst.msk [vmem:[%s5038_s3 + $0xc4] sm:$0xf] %vm913_vm0, %v1013_v8 }
 0x238   : > { %1878 = vrot.lane.b32.xlu1 %v5971_v37, %s4825_s26  ;;  %4345 = vst.msk [vmem:[%s5045_s13 + $0xc4] sm:$0xf] %vm913_vm0, %v1478_v63 }
 0x239   : > { %1959 = vrot.lane.b32.xlu0 %v5171_v13, %s4824_s24  ;;  %1963 = vrot.lane.b32.xlu2 %v5278_v49, %s4824_s24 }
 0x23a   : > { %v1041_v20 = vpop.permute.xlu1 %1040 }
 0x23b   : > { %4263 = vst.msk [vmem:[%s5038_s3 + $0xfc] sm:$0xf] %vm913_vm0, %v1041_v20  ;;  %v1492_v34 = vrot.slane %v1041_v20, 4  ;;  %v1847_v2 = vpop.permute.xlu0 %1846  ;;  %v1851_v5 = vpop.permute.xlu2 %1850 }
 0x23c   : > { %4439 = vst.msk [vmem:[%s5053_s15 + $0xbc] sm:$0xf] %vm913_vm0, %v1847_v2 }
 0x23d   : > { %4359 = vst.msk [vmem:[%s5045_s13 + $0xfc] sm:$0xf] %vm913_vm0, %v1492_v34 }
 0x23e   : > { %4441 = vst.msk [vmem:[%s5053_s15 + $0xc4] sm:$0xf] %vm913_vm0, %v1851_v5 }
 0x240   : > { %1961 = vrot.lane.b32.xlu1 %v5235_v33, %s4824_s24 }
 0x241   : > { %1965 = vrot.lane.b32.xlu0 %v5338_v7, %s4824_s24  ;;  %1969 = vrot.lane.b32.xlu2 %v5460_v62, %s4824_s24 }
 0x242   : > { %v1011_v10 = vpop.permute.xlu1 %1010 }
 0x243   : > { %4248 = vst.msk [vmem:[%s5038_s3 + $0xc0] sm:$0xf] %vm913_vm0, %v1011_v10  ;;  %v1477_v12 = vrot.slane %v1011_v10, 4  ;;  %v1140_v1 = vpop.permute.xlu0 %1139  ;;  %v1144_v58 = vpop.permute.xlu2 %1143 }
 0x244   : > { %v1574_v17 = vrot.slane %v1140_v1, 4  ;;  %v1576_v21 = vrot.slane %v1144_v58, 4  ;;  %4280 = vst.msk [vmem:[%s5038_s3 + $0x140] sm:$0xf] %vm913_vm0, %v1140_v1 }
 0x245   : > { %4344 = vst.msk [vmem:[%s5045_s13 + $0xc0] sm:$0xf] %vm913_vm0, %v1477_v12 }
 0x246   : > { %4376 = vst.msk [vmem:[%s5045_s13 + $0x140] sm:$0xf] %vm913_vm0, %v1574_v17 }
 0x247   : > { %4282 = vst.msk [vmem:[%s5038_s3 + $0x148] sm:$0xf] %vm913_vm0, %v1144_v58 }
 0x248   : > { %1967 = vrot.lane.b32.xlu1 %v5362_v18, %s4824_s24  ;;  %4378 = vst.msk [vmem:[%s5045_s13 + $0x148] sm:$0xf] %vm913_vm0, %v1576_v21 }
 0x249   : > { %1971 = vrot.lane.b32.xlu0 %v5476_v6, %s4824_s24  ;;  %1975 = vrot.lane.b32.xlu2 %v5614_v61, %s4824_s24 }
 0x24a   : > { %v1849_v22 = vpop.permute.xlu1 %1848 }
 0x24b   : > { %4440 = vst.msk [vmem:[%s5053_s15 + $0xc0] sm:$0xf] %vm913_vm0, %v1849_v22  ;;  %v1865_v25 = vpop.permute.xlu0 %1864  ;;  %v1869_v47 = vpop.permute.xlu2 %1868 }
 0x24c   : > { %4448 = vst.msk [vmem:[%s5053_s15 + $0xe0] sm:$0xf] %vm913_vm0, %v1865_v25 }
 0x24d   : > { %4450 = vst.msk [vmem:[%s5053_s15 + $0xe8] sm:$0xf] %vm913_vm0, %v1869_v47 }
 0x250   : > { %1973 = vrot.lane.b32.xlu1 %v5565_v45, %s4824_s24 }
 0x251   : > { %1977 = vrot.lane.b32.xlu0 %v5649_v23, %s4824_s24  ;;  %1981 = vrot.lane.b32.xlu2 %v5763_v19, %s4824_s24 }
 0x252   : > { %v1142_v29 = vpop.permute.xlu1 %1141 }
 0x253   : > { %4281 = vst.msk [vmem:[%s5038_s3 + $0x144] sm:$0xf] %vm913_vm0, %v1142_v29  ;;  %v1575_v0 = vrot.slane %v1142_v29, 4  ;;  %v1271_v30 = vpop.permute.xlu0 %1270  ;;  %v1275_v31 = vpop.permute.xlu2 %1274 }
 0x254   : > { %v1672_v35 = vrot.slane %v1271_v30, 4  ;;  %v1674_v38 = vrot.slane %v1275_v31, 4  ;;  %4313 = vst.msk [vmem:[%s5038_s3 + $0x1c4] sm:$0xf] %vm913_vm0, %v1271_v30 }
 0x255   : > { %4377 = vst.msk [vmem:[%s5045_s13 + $0x144] sm:$0xf] %vm913_vm0, %v1575_v0 }
 0x256   : > { %4409 = vst.msk [vmem:[%s5045_s13 + $0x1c4] sm:$0xf] %vm913_vm0, %v1672_v35 }
 0x257   : > { %4315 = vst.msk [vmem:[%s5038_s3 + $0x1cc] sm:$0xf] %vm913_vm0, %v1275_v31 }
 0x258   : > { %1979 = vrot.lane.b32.xlu1 %v5668_v36, %s4824_s24  ;;  %4411 = vst.msk [vmem:[%s5045_s13 + $0x1cc] sm:$0xf] %vm913_vm0, %v1674_v38 }
 0x259   : > { %1983 = vrot.lane.b32.xlu0 %v5774_v26, %s4824_s24  ;;  %1987 = vrot.lane.b32.xlu2 %v5914_v52, %s4824_s24 }
 0x25a   : > { %v1867_v15 = vpop.permute.xlu1 %1866 }
 0x25b   : > { %4449 = vst.msk [vmem:[%s5053_s15 + $0xe4] sm:$0xf] %vm913_vm0, %v1867_v15  ;;  %v1015_v4 = vpop.permute.xlu0 %1014  ;;  %v1019_v41 = vpop.permute.xlu2 %1018 }
 0x25c   : > { %4250 = vst.msk [vmem:[%s5038_s3 + $0xc8] sm:$0xf] %vm913_vm0, %v1015_v4  ;;  %v1479_v42 = vrot.slane %v1015_v4, 4  ;;  %v1481_v44 = vrot.slane %v1019_v41, 4 }
 0x25d   : > { %4252 = vst.msk [vmem:[%s5038_s3 + $0xd0] sm:$0xf] %vm913_vm0, %v1019_v41 }
 0x25e   : > { %4346 = vst.msk [vmem:[%s5045_s13 + $0xc8] sm:$0xf] %vm913_vm0, %v1479_v42 }
 0x25f   : > { %4348 = vst.msk [vmem:[%s5045_s13 + $0xd0] sm:$0xf] %vm913_vm0, %v1481_v44 }
 0x260   : > { %1985 = vrot.lane.b32.xlu1 %v5866_v14, %s4824_s24 }
 0x261   : > { %1989 = vrot.lane.b32.xlu0 %v5943_v54, %s4824_s24  ;;  %1993 = vrot.lane.b32.xlu2 %v5685_v39, %s4824_s24 }
 0x262   : > { %v1273_v51 = vpop.permute.xlu1 %1272 }
 0x263   : > { %4314 = vst.msk [vmem:[%s5038_s3 + $0x1c8] sm:$0xf] %vm913_vm0, %v1273_v51  ;;  %v1673_v50 = vrot.slane %v1273_v51, 4  ;;  %v1853_v56 = vpop.permute.xlu0 %1852  ;;  %v1857_v57 = vpop.permute.xlu2 %1856 }
 0x264   : > { %4442 = vst.msk [vmem:[%s5053_s15 + $0xc8] sm:$0xf] %vm913_vm0, %v1853_v56 }
 0x265   : > { %4410 = vst.msk [vmem:[%s5045_s13 + $0x1c8] sm:$0xf] %vm913_vm0, %v1673_v50 }
 0x266   : > { %4444 = vst.msk [vmem:[%s5053_s15 + $0xd0] sm:$0xf] %vm913_vm0, %v1857_v57 }
 0x268   : > { %1991 = vrot.lane.b32.xlu1 %v5951_v3, %s4824_s24 }
 0x269   : > { %1995 = vrot.lane.b32.xlu0 %v5696_v48, %s4824_s24  ;;  %1999 = vrot.lane.b32.xlu2 %v5806_v43, %s4824_s24 }
 0x26a   : > { %v1017_v59 = vpop.permute.xlu1 %1016 }
 0x26b   : > { %4251 = vst.msk [vmem:[%s5038_s3 + $0xcc] sm:$0xf] %vm913_vm0, %v1017_v59  ;;  %v1480_v8 = vrot.slane %v1017_v59, 4  ;;  %v1146_v55 = vpop.permute.xlu0 %1145  ;;  %v1150_v63 = vpop.permute.xlu2 %1149 }
 0x26c   : > { %v1577_v20 = vrot.slane %v1146_v55, 4  ;;  %v1579_v34 = vrot.slane %v1150_v63, 4  ;;  %4283 = vst.msk [vmem:[%s5038_s3 + $0x14c] sm:$0xf] %vm913_vm0, %v1146_v55 }
 0x26d   : > { %4347 = vst.msk [vmem:[%s5045_s13 + $0xcc] sm:$0xf] %vm913_vm0, %v1480_v8 }
 0x26e   : > { %4379 = vst.msk [vmem:[%s5045_s13 + $0x14c] sm:$0xf] %vm913_vm0, %v1577_v20 }
 0x26f   : > { %4285 = vst.msk [vmem:[%s5038_s3 + $0x154] sm:$0xf] %vm913_vm0, %v1150_v63 }
 0x270   : > { %1997 = vrot.lane.b32.xlu1 %v5778_v27, %s4824_s24  ;;  %4381 = vst.msk [vmem:[%s5045_s13 + $0x154] sm:$0xf] %vm913_vm0, %v1579_v34 }
 0x271   : > { %2001 = vrot.lane.b32.xlu0 %v5841_v28, %s4824_s24  ;;  %2005 = vrot.lane.b32.xlu2 %v5975_v11, %s4824_s24 }
 0x272   : > { %v1855_v2 = vpop.permute.xlu1 %1854 }
 0x273   : > { %4443 = vst.msk [vmem:[%s5053_s15 + $0xcc] sm:$0xf] %vm913_vm0, %v1855_v2  ;;  %v1871_v5 = vpop.permute.xlu0 %1870  ;;  %v1875_v10 = vpop.permute.xlu2 %1874 }
 0x274   : > { %4451 = vst.msk [vmem:[%s5053_s15 + $0xec] sm:$0xf] %vm913_vm0, %v1871_v5 }
 0x275   : > { %4453 = vst.msk [vmem:[%s5053_s15 + $0xf4] sm:$0xf] %vm913_vm0, %v1875_v10 }
 0x278   : > { %2003 = vrot.lane.b32.xlu1 %v5868_v16, %s4824_s24 }
 0x279   : > { %2007 = vrot.lane.b32.xlu0 %v5971_v37, %s4824_s24  ;;  %2076 = vrot.lane.b32.xlu2 %v5069_v32, %s4826_s27 }
 0x27a   : > { %v1148_v12 = vpop.permute.xlu1 %1147 }
 0x27b   : > { %4284 = vst.msk [vmem:[%s5038_s3 + $0x150] sm:$0xf] %vm913_vm0, %v1148_v12  ;;  %v1578_v1 = vrot.slane %v1148_v12, 4  ;;  %v1277_v58 = vpop.permute.xlu0 %1276  ;;  %v1281_v17 = vpop.permute.xlu2 %1280 }
 0x27c   : > { %v1675_v21 = vrot.slane %v1277_v58, 4  ;;  %v1677_v22 = vrot.slane %v1281_v17, 4  ;;  %4316 = vst.msk [vmem:[%s5038_s3 + $0x1d0] sm:$0xf] %vm913_vm0, %v1277_v58 }
 0x27d   : > { %4380 = vst.msk [vmem:[%s5045_s13 + $0x150] sm:$0xf] %vm913_vm0, %v1578_v1 }
 0x27e   : > { %4412 = vst.msk [vmem:[%s5045_s13 + $0x1d0] sm:$0xf] %vm913_vm0, %v1675_v21 }
 0x27f   : > { %4318 = vst.msk [vmem:[%s5038_s3 + $0x1d8] sm:$0xf] %vm913_vm0, %v1281_v17 }
 0x280   : > { %2074 = vrot.lane.b32.xlu1 %v5051_v24, %s4826_s27  ;;  %4414 = vst.msk [vmem:[%s5045_s13 + $0x1d8] sm:$0xf] %vm913_vm0, %v1677_v22 }
 0x281   : > { %2078 = vrot.lane.b32.xlu0 %v5085_v40, %s4826_s27  ;;  %2082 = vrot.lane.b32.xlu2 %v5116_v53, %s4826_s27 }
 0x282   : > { %v1873_v32 = vpop.permute.xlu1 %1872 }
 0x283   : > { %4452 = vst.msk [vmem:[%s5053_s15 + $0xf0] sm:$0xf] %vm913_vm0, %v1873_v32  ;;  %v1021_v25 = vpop.permute.xlu0 %1020  ;;  %v1025_v47 = vpop.permute.xlu2 %1024 }
 0x284   : > { %4253 = vst.msk [vmem:[%s5038_s3 + $0xd4] sm:$0xf] %vm913_vm0, %v1021_v25  ;;  %v1482_v24 = vrot.slane %v1021_v25, 4  ;;  %v1484_v29 = vrot.slane %v1025_v47, 4 }
 0x285   : > { %4255 = vst.msk [vmem:[%s5038_s3 + $0xdc] sm:$0xf] %vm913_vm0, %v1025_v47 }
 0x286   : > { %4349 = vst.msk [vmem:[%s5045_s13 + $0xd4] sm:$0xf] %vm913_vm0, %v1482_v24 }
 0x287   : > { %4351 = vst.msk [vmem:[%s5045_s13 + $0xdc] sm:$0xf] %vm913_vm0, %v1484_v29 }
 0x288   : > { %2080 = vrot.lane.b32.xlu1 %v5100_v46, %s4826_s27 }
 0x289   : > { %2084 = vrot.lane.b32.xlu0 %v5132_v60, %s4826_s27  ;;  %2088 = vrot.lane.b32.xlu2 %v5171_v13, %s4826_s27 }
 0x28a   : > { %v1279_v40 = vpop.permute.xlu1 %1278 }
 0x28b   : > { %4317 = vst.msk [vmem:[%s5038_s3 + $0x1d4] sm:$0xf] %vm913_vm0, %v1279_v40  ;;  %v1676_v53 = vrot.slane %v1279_v40, 4  ;;  %v1859_v0 = vpop.permute.xlu0 %1858  ;;  %v1863_v30 = vpop.permute.xlu2 %1862 }
 0x28c   : > { %4445 = vst.msk [vmem:[%s5053_s15 + $0xd4] sm:$0xf] %vm913_vm0, %v1859_v0 }
 0x28d   : > { %4413 = vst.msk [vmem:[%s5045_s13 + $0x1d4] sm:$0xf] %vm913_vm0, %v1676_v53 }
 0x28e   : > { %4447 = vst.msk [vmem:[%s5053_s15 + $0xdc] sm:$0xf] %vm913_vm0, %v1863_v30 }
 0x290   : > { %2086 = vrot.lane.b32.xlu1 %v5156_v9, %s4826_s27 }
 0x291   : > { %2090 = vrot.lane.b32.xlu0 %v5235_v33, %s4826_s27  ;;  %2094 = vrot.lane.b32.xlu2 %v5338_v7, %s4826_s27 }
 0x292   : > { %v1023_v46 = vpop.permute.xlu1 %1022 }
 0x293   : > { %4254 = vst.msk [vmem:[%s5038_s3 + $0xd8] sm:$0xf] %vm913_vm0, %v1023_v46  ;;  %v1483_v60 = vrot.slane %v1023_v46, 4  ;;  %v1152_v13 = vpop.permute.xlu0 %1151  ;;  %v1964_v31 = vpop.permute.xlu2 %1963 }
 0x294   : > { %v1580_v35 = vrot.slane %v1152_v13, 4  ;;  %4286 = vst.msk [vmem:[%s5038_s3 + $0x158] sm:$0xf] %vm913_vm0, %v1152_v13 }
 0x295   : > { %4350 = vst.msk [vmem:[%s5045_s13 + $0xd8] sm:$0xf] %vm913_vm0, %v1483_v60 }
 0x296   : > { %4382 = vst.msk [vmem:[%s5045_s13 + $0x158] sm:$0xf] %vm913_vm0, %v1580_v35  ;;  %v2242_v35 = vld [vmem:[%s5038_s3] sm:$0xff] (%p4936_p0)  }
 0x297   : > { %4465 = vst.msk [vmem:[%s5053_s15 + $0x124] sm:$0xf] %vm913_vm0, %v1964_v31 }
 0x298   : > { %2092 = vrot.lane.b32.xlu1 %v5278_v49, %s4826_s27  ;;  %2243 = vst [vmem:[%s6420_s28] sm:$0xff] (%p4936_p0), %v2242_v35  }
 0x299   : > { %2096 = vrot.lane.b32.xlu0 %v5362_v18, %s4826_s27  ;;  %2100 = vrot.lane.b32.xlu2 %v5476_v6, %s4826_s27 }
 0x29a   : > { %v1861_v9 = vpop.permute.xlu1 %1860 }
 0x29b   : > { %4446 = vst.msk [vmem:[%s5053_s15 + $0xd8] sm:$0xf] %vm913_vm0, %v1861_v9  ;;  %v1877_v33 = vpop.permute.xlu0 %1876  ;;  %v1970_v7 = vpop.permute.xlu2 %1969  ;;  %v2246_v9 = vld [vmem:[%s5038_s3 + $0x8] sm:$0xff] (%p4936_p0)  }
 0x29c   : > { %4454 = vst.msk [vmem:[%s5053_s15 + $0xf8] sm:$0xf] %vm913_vm0, %v1877_v33  ;;  %v2250_v33 = vld [vmem:[%s5038_s3 + $0x10] sm:$0xff] (%p4936_p0)  }
 0x29d   : > { %4468 = vst.msk [vmem:[%s5053_s15 + $0x130] sm:$0xf] %vm913_vm0, %v1970_v7  ;;  %v2254_v7 = vld [vmem:[%s5038_s3 + $0x18] sm:$0xff] (%p4936_p0)  }
 0x29e   : > { %2247 = vst [vmem:[%s6420_s28 + $0x8] sm:$0xff] (%p4936_p0), %v2246_v9  }
 0x29f   : > { %2251 = vst [vmem:[%s6420_s28 + $0x10] sm:$0xff] (%p4936_p0), %v2250_v33  }
 0x2a0   : > { %2098 = vrot.lane.b32.xlu1 %v5460_v62, %s4826_s27  ;;  %2255 = vst [vmem:[%s6420_s28 + $0x18] sm:$0xff] (%p4936_p0), %v2254_v7  }
 0x2a1   : > { %2102 = vrot.lane.b32.xlu0 %v5565_v45, %s4826_s27  ;;  %2106 = vrot.lane.b32.xlu2 %v5649_v23, %s4826_s27 }
 0x2a2   : > { %v1154_v49 = vpop.permute.xlu1 %1153 }
 0x2a3   : > { %4287 = vst.msk [vmem:[%s5038_s3 + $0x15c] sm:$0xf] %vm913_vm0, %v1154_v49  ;;  %v1581_v18 = vrot.slane %v1154_v49, 4  ;;  %v1283_v6 = vpop.permute.xlu0 %1282  ;;  %v1976_v38 = vpop.permute.xlu2 %1975  ;;  %v2258_v49 = vld [vmem:[%s5038_s3 + $0x20] sm:$0xff] (%p4936_p0)  }
 0x2a4   : > { %v1678_v15 = vrot.slane %v1283_v6, 4  ;;  %4319 = vst.msk [vmem:[%s5038_s3 + $0x1dc] sm:$0xf] %vm913_vm0, %v1283_v6  ;;  %v2266_v6 = vld [vmem:[%s5038_s3 + $0x30] sm:$0xff] (%p4936_p0)  }
 0x2a5   : > { %4383 = vst.msk [vmem:[%s5045_s13 + $0x15c] sm:$0xf] %vm913_vm0, %v1581_v18  ;;  %v2262_v18 = vld [vmem:[%s5038_s3 + $0x28] sm:$0xff] (%p4936_p0)  }
 0x2a6   : > { %4415 = vst.msk [vmem:[%s5045_s13 + $0x1dc] sm:$0xf] %vm913_vm0, %v1678_v15  ;;  %v2274_v15 = vld [vmem:[%s5038_s3 + $0x40] sm:$0xff] (%p4936_p0)  }
 0x2a7   : > { %4471 = vst.msk [vmem:[%s5053_s15 + $0x13c] sm:$0xf] %vm913_vm0, %v1976_v38  ;;  %v2270_v38 = vld [vmem:[%s5038_s3 + $0x38] sm:$0xff] (%p4936_p0)  }
 0x2a8   : > { %2104 = vrot.lane.b32.xlu1 %v5614_v61, %s4826_s27  ;;  %2259 = vst [vmem:[%s6420_s28 + $0x20] sm:$0xff] (%p4936_p0), %v2258_v49  }
 0x2a9   : > { %2108 = vrot.lane.b32.xlu0 %v5668_v36, %s4826_s27  ;;  %2112 = vrot.lane.b32.xlu2 %v5774_v26, %s4826_s27  ;;  %2263 = vst [vmem:[%s6420_s28 + $0x28] sm:$0xff] (%p4936_p0), %v2262_v18  }
 0x2aa   : > { %v1879_v62 = vpop.permute.xlu1 %1878  ;;  %2267 = vst [vmem:[%s6420_s28 + $0x30] sm:$0xff] (%p4936_p0), %v2266_v6  }
 0x2ab   : > { %4455 = vst.msk [vmem:[%s5053_s15 + $0xfc] sm:$0xf] %vm913_vm0, %v1879_v62  ;;  %v1960_v45 = vpop.permute.xlu0 %1959  ;;  %v1982_v23 = vpop.permute.xlu2 %1981  ;;  %v2278_v62 = vld [vmem:[%s5038_s3 + $0x48] sm:$0xff] (%p4936_p0)  }
 0x2ac   : > { %4463 = vst.msk [vmem:[%s5053_s15 + $0x11c] sm:$0xf] %vm913_vm0, %v1960_v45  ;;  %v2282_v45 = vld [vmem:[%s5038_s3 + $0x50] sm:$0xff] (%p4936_p0)  }
 0x2ad   : > { %4474 = vst.msk [vmem:[%s5053_s15 + $0x148] sm:$0xf] %vm913_vm0, %v1982_v23  ;;  %v2286_v23 = vld [vmem:[%s5038_s3 + $0x58] sm:$0xff] (%p4936_p0)  }
 0x2ae   : > { %2271 = vst [vmem:[%s6420_s28 + $0x38] sm:$0xff] (%p4936_p0), %v2270_v38  }
 0x2af   : > { %2275 = vst [vmem:[%s6420_s28 + $0x40] sm:$0xff] (%p4936_p0), %v2274_v15  }
 0x2b0   : > { %2110 = vrot.lane.b32.xlu1 %v5763_v19, %s4826_s27  ;;  %2279 = vst [vmem:[%s6420_s28 + $0x48] sm:$0xff] (%p4936_p0), %v2278_v62  }
 0x2b1   : > { %2114 = vrot.lane.b32.xlu0 %v5866_v14, %s4826_s27  ;;  %2118 = vrot.lane.b32.xlu2 %v5943_v54, %s4826_s27  ;;  %2283 = vst [vmem:[%s6420_s28 + $0x50] sm:$0xff] (%p4936_p0), %v2282_v45  }
 0x2b2   : > { %v1962_v61 = vpop.permute.xlu1 %1961  ;;  %2287 = vst [vmem:[%s6420_s28 + $0x58] sm:$0xff] (%p4936_p0), %v2286_v23  }
 0x2b3   : > { %4464 = vst.msk [vmem:[%s5053_s15 + $0x120] sm:$0xf] %vm913_vm0, %v1962_v61  ;;  %v1966_v36 = vpop.permute.xlu0 %1965  ;;  %v1988_v26 = vpop.permute.xlu2 %1987  ;;  %v2290_v61 = vld [vmem:[%s5038_s3 + $0x60] sm:$0xff] (%p4936_p0)  }
 0x2b4   : > { %4466 = vst.msk [vmem:[%s5053_s15 + $0x128] sm:$0xf] %vm913_vm0, %v1966_v36  ;;  %v2294_v36 = vld [vmem:[%s5038_s3 + $0x68] sm:$0xff] (%p4936_p0)  }
 0x2b5   : > { %4477 = vst.msk [vmem:[%s5053_s15 + $0x154] sm:$0xf] %vm913_vm0, %v1988_v26  ;;  %v2298_v26 = vld [vmem:[%s5038_s3 + $0x70] sm:$0xff] (%p4936_p0)  }
 0x2b6   : > { %2291 = vst [vmem:[%s6420_s28 + $0x60] sm:$0xff] (%p4936_p0), %v2290_v61  }
 0x2b7   : > { %2295 = vst [vmem:[%s6420_s28 + $0x68] sm:$0xff] (%p4936_p0), %v2294_v36  }
 0x2b8   : > { %2116 = vrot.lane.b32.xlu1 %v5914_v52, %s4826_s27  ;;  %2299 = vst [vmem:[%s6420_s28 + $0x70] sm:$0xff] (%p4936_p0), %v2298_v26  }
 0x2b9   : > { %2120 = vrot.lane.b32.xlu0 %v5951_v3, %s4826_s27  ;;  %2124 = vrot.lane.b32.xlu2 %v5696_v48, %s4826_s27 }
 0x2ba   : > { %v1968_v19 = vpop.permute.xlu1 %1967 }
 0x2bb   : > { %4467 = vst.msk [vmem:[%s5053_s15 + $0x12c] sm:$0xf] %vm913_vm0, %v1968_v19  ;;  %v1972_v14 = vpop.permute.xlu0 %1971  ;;  %v1994_v54 = vpop.permute.xlu2 %1993  ;;  %v2302_v19 = vld [vmem:[%s5038_s3 + $0x78] sm:$0xff] (%p4936_p0)  }
 0x2bc   : > { %4469 = vst.msk [vmem:[%s5053_s15 + $0x134] sm:$0xf] %vm913_vm0, %v1972_v14  ;;  %v2306_v14 = vld [vmem:[%s5038_s3 + $0x80] sm:$0xff] (%p4936_p0)  }
 0x2bd   : > { %4480 = vst.msk [vmem:[%s5053_s15 + $0x160] sm:$0xf] %vm913_vm0, %v1994_v54  ;;  %v2310_v54 = vld [vmem:[%s5038_s3 + $0x88] sm:$0xff] (%p4936_p0)  }
 0x2be   : > { %2303 = vst [vmem:[%s6420_s28 + $0x78] sm:$0xff] (%p4936_p0), %v2302_v19  }
 0x2bf   : > { %2307 = vst [vmem:[%s6420_s28 + $0x100] sm:$0xff] (%p4936_p0), %v2306_v14  }
 0x2c0   : > { %2122 = vrot.lane.b32.xlu1 %v5685_v39, %s4826_s27  ;;  %2311 = vst [vmem:[%s6420_s28 + $0x108] sm:$0xff] (%p4936_p0), %v2310_v54  }
 0x2c1   : > { %2126 = vrot.lane.b32.xlu0 %v5778_v27, %s4826_s27  ;;  %2130 = vrot.lane.b32.xlu2 %v5841_v28, %s4826_s27 }
 0x2c2   : > { %v1974_v52 = vpop.permute.xlu1 %1973 }
 0x2c3   : > { %4470 = vst.msk [vmem:[%s5053_s15 + $0x138] sm:$0xf] %vm913_vm0, %v1974_v52  ;;  %v1978_v48 = vpop.permute.xlu0 %1977  ;;  %v2000_v3 = vpop.permute.xlu2 %1999  ;;  %v2314_v52 = vld [vmem:[%s5038_s3 + $0x90] sm:$0xff] (%p4936_p0)  }
 0x2c4   : > { %4472 = vst.msk [vmem:[%s5053_s15 + $0x140] sm:$0xf] %vm913_vm0, %v1978_v48  ;;  %v2318_v48 = vld [vmem:[%s5038_s3 + $0x98] sm:$0xff] (%p4936_p0)  }
 0x2c5   : > { %4483 = vst.msk [vmem:[%s5053_s15 + $0x16c] sm:$0xf] %vm913_vm0, %v2000_v3  ;;  %v2322_v3 = vld [vmem:[%s5038_s3 + $0xa0] sm:$0xff] (%p4936_p0)  }
 0x2c6   : > { %2315 = vst [vmem:[%s6420_s28 + $0x110] sm:$0xff] (%p4936_p0), %v2314_v52  }
 0x2c7   : > { %2319 = vst [vmem:[%s6420_s28 + $0x118] sm:$0xff] (%p4936_p0), %v2318_v48  }
 0x2c8   : > { %2128 = vrot.lane.b32.xlu1 %v5806_v43, %s4826_s27  ;;  %2323 = vst [vmem:[%s6420_s28 + $0x120] sm:$0xff] (%p4936_p0), %v2322_v3  }
 0x2c9   : > { %2132 = vrot.lane.b32.xlu0 %v5868_v16, %s4826_s27  ;;  %2136 = vrot.lane.b32.xlu2 %v5971_v37, %s4826_s27 }
 0x2ca   : > { %v1980_v39 = vpop.permute.xlu1 %1979 }
 0x2cb   : > { %4473 = vst.msk [vmem:[%s5053_s15 + $0x144] sm:$0xf] %vm913_vm0, %v1980_v39  ;;  %v1984_v27 = vpop.permute.xlu0 %1983  ;;  %v2006_v28 = vpop.permute.xlu2 %2005  ;;  %v2326_v39 = vld [vmem:[%s5038_s3 + $0xa8] sm:$0xff] (%p4936_p0)  }
 0x2cc   : > { %4475 = vst.msk [vmem:[%s5053_s15 + $0x14c] sm:$0xf] %vm913_vm0, %v1984_v27  ;;  %v2330_v27 = vld [vmem:[%s5038_s3 + $0xb0] sm:$0xff] (%p4936_p0)  }
 0x2cd   : > { %4486 = vst.msk [vmem:[%s5053_s15 + $0x178] sm:$0xf] %vm913_vm0, %v2006_v28  ;;  %v2334_v28 = vld [vmem:[%s5038_s3 + $0xb8] sm:$0xff] (%p4936_p0)  }
 0x2ce   : > { %2327 = vst [vmem:[%s6420_s28 + $0x128] sm:$0xff] (%p4936_p0), %v2326_v39  }
 0x2cf   : > { %2331 = vst [vmem:[%s6420_s28 + $0x130] sm:$0xff] (%p4936_p0), %v2330_v27  }
 0x2d0   : > { %2134 = vrot.lane.b32.xlu1 %v5975_v11, %s4826_s27  ;;  %2335 = vst [vmem:[%s6420_s28 + $0x138] sm:$0xff] (%p4936_p0), %v2334_v28  }
 0x2d2   : > { %v1986_v43 = vpop.permute.xlu1 %1985 }
 0x2d3   : > { %4476 = vst.msk [vmem:[%s5053_s15 + $0x150] sm:$0xf] %vm913_vm0, %v1986_v43  ;;  %v1990_v16 = vpop.permute.xlu0 %1989  ;;  %v2077_v37 = vpop.permute.xlu2 %2076  ;;  %v2338_v43 = vld [vmem:[%s5038_s3 + $0xc0] sm:$0xff] (%p4936_p0)  }
 0x2d4   : > { %4478 = vst.msk [vmem:[%s5053_s15 + $0x158] sm:$0xf] %vm913_vm0, %v1990_v16  ;;  %v2342_v16 = vld [vmem:[%s5038_s3 + $0xc8] sm:$0xff] (%p4936_p0)  }
 0x2d5   : > { %4489 = vst.msk [vmem:[%s5053_s15 + $0x184] sm:$0xf] %vm913_vm0, %v2077_v37  ;;  %v2346_v37 = vld [vmem:[%s5038_s3 + $0xd0] sm:$0xff] (%p4936_p0)  }
 0x2d6   : > { %2339 = vst [vmem:[%s6420_s28 + $0x140] sm:$0xff] (%p4936_p0), %v2338_v43  }
 0x2d7   : > { %2343 = vst [vmem:[%s6420_s28 + $0x148] sm:$0xff] (%p4936_p0), %v2342_v16  }
 0x2d8   : > { %2347 = vst [vmem:[%s6420_s28 + $0x150] sm:$0xff] (%p4936_p0), %v2346_v37  }
 0x2da   : > { %v1992_v4 = vpop.permute.xlu1 %1991 }
 0x2db   : > { %4479 = vst.msk [vmem:[%s5053_s15 + $0x15c] sm:$0xf] %vm913_vm0, %v1992_v4  ;;  %v1996_v41 = vpop.permute.xlu0 %1995  ;;  %v2083_v42 = vpop.permute.xlu2 %2082  ;;  %v2350_v4 = vld [vmem:[%s5038_s3 + $0xd8] sm:$0xff] (%p4936_p0)  }
 0x2dc   : > { %4481 = vst.msk [vmem:[%s5053_s15 + $0x164] sm:$0xf] %vm913_vm0, %v1996_v41  ;;  %v2354_v41 = vld [vmem:[%s5038_s3 + $0xe0] sm:$0xff] (%p4936_p0)  }
 0x2dd   : > { %4492 = vst.msk [vmem:[%s5053_s15 + $0x190] sm:$0xf] %vm913_vm0, %v2083_v42  ;;  %v2358_v42 = vld [vmem:[%s5038_s3 + $0xe8] sm:$0xff] (%p4936_p0)  }
 0x2de   : > { %2351 = vst [vmem:[%s6420_s28 + $0x158] sm:$0xff] (%p4936_p0), %v2350_v4  }
 0x2df   : > { %2355 = vst [vmem:[%s6420_s28 + $0x160] sm:$0xff] (%p4936_p0), %v2354_v41  }
 0x2e0   : > { %2359 = vst [vmem:[%s6420_s28 + $0x168] sm:$0xff] (%p4936_p0), %v2358_v42  }
 0x2e2   : > { %v1998_v11 = vpop.permute.xlu1 %1997 }
 0x2e3   : > { %4482 = vst.msk [vmem:[%s5053_s15 + $0x168] sm:$0xf] %vm913_vm0, %v1998_v11  ;;  %v2002_v44 = vpop.permute.xlu0 %2001  ;;  %v2089_v51 = vpop.permute.xlu2 %2088  ;;  %v2362_v11 = vld [vmem:[%s5038_s3 + $0xf0] sm:$0xff] (%p4936_p0)  }
 0x2e4   : > { %4484 = vst.msk [vmem:[%s5053_s15 + $0x170] sm:$0xf] %vm913_vm0, %v2002_v44  ;;  %v2366_v44 = vld [vmem:[%s5038_s3 + $0xf8] sm:$0xff] (%p4936_p0)  }
 0x2e5   : > { %4495 = vst.msk [vmem:[%s5053_s15 + $0x19c] sm:$0xf] %vm913_vm0, %v2089_v51  ;;  %v2370_v51 = vld [vmem:[%s5038_s3 + $0x100] sm:$0xff] (%p4936_p0)  }
 0x2e6   : > { %2363 = vst [vmem:[%s6420_s28 + $0x170] sm:$0xff] (%p4936_p0), %v2362_v11  }
 0x2e7   : > { %2367 = vst [vmem:[%s6420_s28 + $0x178] sm:$0xff] (%p4936_p0), %v2366_v44  }
 0x2e8   : > { %2371 = vst [vmem:[%s6420_s28 + $0x200] sm:$0xff] (%p4936_p0), %v2370_v51  }
 0x2ea   : > { %v2004_v50 = vpop.permute.xlu1 %2003 }
 0x2eb   : > { %4485 = vst.msk [vmem:[%s5053_s15 + $0x174] sm:$0xf] %vm913_vm0, %v2004_v50  ;;  %v2008_v56 = vpop.permute.xlu0 %2007  ;;  %v2095_v57 = vpop.permute.xlu2 %2094  ;;  %v2374_v50 = vld [vmem:[%s5038_s3 + $0x108] sm:$0xff] (%p4936_p0)  }
 0x2ec   : > { %4487 = vst.msk [vmem:[%s5053_s15 + $0x17c] sm:$0xf] %vm913_vm0, %v2008_v56  ;;  %v2378_v56 = vld [vmem:[%s5038_s3 + $0x110] sm:$0xff] (%p4936_p0)  }
 0x2ed   : > { %4498 = vst.msk [vmem:[%s5053_s15 + $0x1a8] sm:$0xf] %vm913_vm0, %v2095_v57  ;;  %v2382_v57 = vld [vmem:[%s5038_s3 + $0x118] sm:$0xff] (%p4936_p0)  }
 0x2ee   : > { %2375 = vst [vmem:[%s6420_s28 + $0x208] sm:$0xff] (%p4936_p0), %v2374_v50  }
 0x2ef   : > { %2379 = vst [vmem:[%s6420_s28 + $0x210] sm:$0xff] (%p4936_p0), %v2378_v56  }
 0x2f0   : > { %2383 = vst [vmem:[%s6420_s28 + $0x218] sm:$0xff] (%p4936_p0), %v2382_v57  }
 0x2f2   : > { %v2075_v59 = vpop.permute.xlu1 %2074 }
 0x2f3   : > { %4488 = vst.msk [vmem:[%s5053_s15 + $0x180] sm:$0xf] %vm913_vm0, %v2075_v59  ;;  %v2079_v8 = vpop.permute.xlu0 %2078  ;;  %v2101_v55 = vpop.permute.xlu2 %2100  ;;  %v2386_v59 = vld [vmem:[%s5038_s3 + $0x120] sm:$0xff] (%p4936_p0)  }
 0x2f4   : > { %4490 = vst.msk [vmem:[%s5053_s15 + $0x188] sm:$0xf] %vm913_vm0, %v2079_v8  ;;  %v2390_v8 = vld [vmem:[%s5038_s3 + $0x128] sm:$0xff] (%p4936_p0)  }
 0x2f5   : > { %4501 = vst.msk [vmem:[%s5053_s15 + $0x1b4] sm:$0xf] %vm913_vm0, %v2101_v55  ;;  %v2394_v55 = vld [vmem:[%s5038_s3 + $0x130] sm:$0xff] (%p4936_p0)  }
 0x2f6   : > { %2387 = vst [vmem:[%s6420_s28 + $0x220] sm:$0xff] (%p4936_p0), %v2386_v59  }
 0x2f7   : > { %2391 = vst [vmem:[%s6420_s28 + $0x228] sm:$0xff] (%p4936_p0), %v2390_v8  }
 0x2f8   : > { %2395 = vst [vmem:[%s6420_s28 + $0x230] sm:$0xff] (%p4936_p0), %v2394_v55  }
 0x2fa   : > { %v2081_v63 = vpop.permute.xlu1 %2080 }
 0x2fb   : > { %4491 = vst.msk [vmem:[%s5053_s15 + $0x18c] sm:$0xf] %vm913_vm0, %v2081_v63  ;;  %v2085_v20 = vpop.permute.xlu0 %2084  ;;  %v2107_v34 = vpop.permute.xlu2 %2106  ;;  %v2398_v63 = vld [vmem:[%s5038_s3 + $0x138] sm:$0xff] (%p4936_p0)  }
 0x2fc   : > { %4493 = vst.msk [vmem:[%s5053_s15 + $0x194] sm:$0xf] %vm913_vm0, %v2085_v20  ;;  %v2402_v20 = vld [vmem:[%s5038_s3 + $0x140] sm:$0xff] (%p4936_p0)  }
 0x2fd   : > { %4504 = vst.msk [vmem:[%s5053_s15 + $0x1c0] sm:$0xf] %vm913_vm0, %v2107_v34  ;;  %v2406_v34 = vld [vmem:[%s5038_s3 + $0x148] sm:$0xff] (%p4936_p0)  }
 0x2fe   : > { %2399 = vst [vmem:[%s6420_s28 + $0x238] sm:$0xff] (%p4936_p0), %v2398_v63  }
 0x2ff   : > { %2403 = vst [vmem:[%s6420_s28 + $0x240] sm:$0xff] (%p4936_p0), %v2402_v20  }
 0x300   : > { %2407 = vst [vmem:[%s6420_s28 + $0x248] sm:$0xff] (%p4936_p0), %v2406_v34  }
 0x302   : > { %v2087_v2 = vpop.permute.xlu1 %2086 }
 0x303   : > { %4494 = vst.msk [vmem:[%s5053_s15 + $0x198] sm:$0xf] %vm913_vm0, %v2087_v2  ;;  %v2091_v5 = vpop.permute.xlu0 %2090  ;;  %v2113_v10 = vpop.permute.xlu2 %2112  ;;  %v2410_v2 = vld [vmem:[%s5038_s3 + $0x150] sm:$0xff] (%p4936_p0)  }
 0x304   : > { %4496 = vst.msk [vmem:[%s5053_s15 + $0x1a0] sm:$0xf] %vm913_vm0, %v2091_v5  ;;  %v2414_v5 = vld [vmem:[%s5038_s3 + $0x158] sm:$0xff] (%p4936_p0)  }
 0x305   : > { %4507 = vst.msk [vmem:[%s5053_s15 + $0x1cc] sm:$0xf] %vm913_vm0, %v2113_v10  ;;  %v2418_v10 = vld [vmem:[%s5038_s3 + $0x160] sm:$0xff] (%p4936_p0)  }
 0x306   : > { %2411 = vst [vmem:[%s6420_s28 + $0x250] sm:$0xff] (%p4936_p0), %v2410_v2  }
 0x307   : > { %2415 = vst [vmem:[%s6420_s28 + $0x258] sm:$0xff] (%p4936_p0), %v2414_v5  }
 0x308   : > { %2419 = vst [vmem:[%s6420_s28 + $0x260] sm:$0xff] (%p4936_p0), %v2418_v10  }
 0x30a   : > { %v2093_v12 = vpop.permute.xlu1 %2092 }
 0x30b   : > { %4497 = vst.msk [vmem:[%s5053_s15 + $0x1a4] sm:$0xf] %vm913_vm0, %v2093_v12  ;;  %v2097_v1 = vpop.permute.xlu0 %2096  ;;  %v2119_v58 = vpop.permute.xlu2 %2118  ;;  %v2422_v12 = vld [vmem:[%s5038_s3 + $0x168] sm:$0xff] (%p4936_p0)  }
 0x30c   : > { %4499 = vst.msk [vmem:[%s5053_s15 + $0x1ac] sm:$0xf] %vm913_vm0, %v2097_v1  ;;  %v2426_v1 = vld [vmem:[%s5038_s3 + $0x170] sm:$0xff] (%p4936_p0)  }
 0x30d   : > { %4510 = vst.msk [vmem:[%s5053_s15 + $0x1d8] sm:$0xf] %vm913_vm0, %v2119_v58  ;;  %v2430_v58 = vld [vmem:[%s5038_s3 + $0x178] sm:$0xff] (%p4936_p0)  }
 0x30e   : > { %2423 = vst [vmem:[%s6420_s28 + $0x268] sm:$0xff] (%p4936_p0), %v2422_v12  }
 0x30f   : > { %2427 = vst [vmem:[%s6420_s28 + $0x270] sm:$0xff] (%p4936_p0), %v2426_v1  }
 0x310   : > { %2431 = vst [vmem:[%s6420_s28 + $0x278] sm:$0xff] (%p4936_p0), %v2430_v58  }
 0x312   : > { %v2099_v17 = vpop.permute.xlu1 %2098 }
 0x313   : > { %4500 = vst.msk [vmem:[%s5053_s15 + $0x1b0] sm:$0xf] %vm913_vm0, %v2099_v17  ;;  %v2103_v21 = vpop.permute.xlu0 %2102  ;;  %v2125_v22 = vpop.permute.xlu2 %2124  ;;  %v2434_v17 = vld [vmem:[%s5038_s3 + $0x180] sm:$0xff] (%p4936_p0)  }
 0x314   : > { %4502 = vst.msk [vmem:[%s5053_s15 + $0x1b8] sm:$0xf] %vm913_vm0, %v2103_v21  ;;  %v2438_v21 = vld [vmem:[%s5038_s3 + $0x188] sm:$0xff] (%p4936_p0)  }
 0x315   : > { %4513 = vst.msk [vmem:[%s5053_s15 + $0x1e4] sm:$0xf] %vm913_vm0, %v2125_v22  ;;  %v2442_v22 = vld [vmem:[%s5038_s3 + $0x190] sm:$0xff] (%p4936_p0)  }
 0x316   : > { %2435 = vst [vmem:[%s6420_s28 + $0x300] sm:$0xff] (%p4936_p0), %v2434_v17  }
 0x317   : > { %2439 = vst [vmem:[%s6420_s28 + $0x308] sm:$0xff] (%p4936_p0), %v2438_v21  }
 0x318   : > { %2443 = vst [vmem:[%s6420_s28 + $0x310] sm:$0xff] (%p4936_p0), %v2442_v22  }
 0x31a   : > { %v2105_v32 = vpop.permute.xlu1 %2104 }
 0x31b   : > { %4503 = vst.msk [vmem:[%s5053_s15 + $0x1bc] sm:$0xf] %vm913_vm0, %v2105_v32  ;;  %v2109_v25 = vpop.permute.xlu0 %2108  ;;  %v2131_v47 = vpop.permute.xlu2 %2130  ;;  %v2446_v32 = vld [vmem:[%s5038_s3 + $0x198] sm:$0xff] (%p4936_p0)  }
 0x31c   : > { %4505 = vst.msk [vmem:[%s5053_s15 + $0x1c4] sm:$0xf] %vm913_vm0, %v2109_v25  ;;  %v2450_v25 = vld [vmem:[%s5038_s3 + $0x1a0] sm:$0xff] (%p4936_p0)  }
 0x31d   : > { %4516 = vst.msk [vmem:[%s5053_s15 + $0x1f0] sm:$0xf] %vm913_vm0, %v2131_v47  ;;  %v2454_v47 = vld [vmem:[%s5038_s3 + $0x1a8] sm:$0xff] (%p4936_p0)  }
 0x31e   : > { %2447 = vst [vmem:[%s6420_s28 + $0x318] sm:$0xff] (%p4936_p0), %v2446_v32  }
 0x31f   : > { %2451 = vst [vmem:[%s6420_s28 + $0x320] sm:$0xff] (%p4936_p0), %v2450_v25  }
 0x320   : > { %2455 = vst [vmem:[%s6420_s28 + $0x328] sm:$0xff] (%p4936_p0), %v2454_v47  }
 0x322   : > { %v2111_v24 = vpop.permute.xlu1 %2110 }
 0x323   : > { %4506 = vst.msk [vmem:[%s5053_s15 + $0x1c8] sm:$0xf] %vm913_vm0, %v2111_v24  ;;  %v2115_v29 = vpop.permute.xlu0 %2114  ;;  %v2137_v40 = vpop.permute.xlu2 %2136  ;;  %v2458_v24 = vld [vmem:[%s5038_s3 + $0x1b0] sm:$0xff] (%p4936_p0)  }
 0x324   : > { %4508 = vst.msk [vmem:[%s5053_s15 + $0x1d0] sm:$0xf] %vm913_vm0, %v2115_v29  ;;  %v2462_v29 = vld [vmem:[%s5038_s3 + $0x1b8] sm:$0xff] (%p4936_p0)  }
 0x325   : > { %4519 = vst.msk [vmem:[%s5053_s15 + $0x1fc] sm:$0xf] %vm913_vm0, %v2137_v40  ;;  %v2466_v40 = vld [vmem:[%s5038_s3 + $0x1c0] sm:$0xff] (%p4936_p0)  }
 0x326   : > { %2459 = vst [vmem:[%s6420_s28 + $0x330] sm:$0xff] (%p4936_p0), %v2458_v24  }
 0x327   : > { %2463 = vst [vmem:[%s6420_s28 + $0x338] sm:$0xff] (%p4936_p0), %v2462_v29  }
 0x328   : > { %2467 = vst [vmem:[%s6420_s28 + $0x340] sm:$0xff] (%p4936_p0), %v2466_v40  }
 0x32a   : > { %v2117_v53 = vpop.permute.xlu1 %2116 }
 0x32b   : > { %4509 = vst.msk [vmem:[%s5053_s15 + $0x1d4] sm:$0xf] %vm913_vm0, %v2117_v53  ;;  %v2121_v0 = vpop.permute.xlu0 %2120  ;;  %v2470_v53 = vld [vmem:[%s5038_s3 + $0x1c8] sm:$0xff] (%p4936_p0)  }
 0x32c   : > { %4511 = vst.msk [vmem:[%s5053_s15 + $0x1dc] sm:$0xf] %vm913_vm0, %v2121_v0  ;;  %v2474_v0 = vld [vmem:[%s5038_s3 + $0x1d0] sm:$0xff] (%p4936_p0)  }
 0x32d   : > { %2471 = vst [vmem:[%s6420_s28 + $0x348] sm:$0xff] (%p4936_p0), %v2470_v53  }
 0x32e   : > { %2475 = vst [vmem:[%s6420_s28 + $0x350] sm:$0xff] (%p4936_p0), %v2474_v0  }
 0x332   : > { %v2123_v30 = vpop.permute.xlu1 %2122 }
 0x333   : > { %4512 = vst.msk [vmem:[%s5053_s15 + $0x1e0] sm:$0xf] %vm913_vm0, %v2123_v30  ;;  %v2127_v46 = vpop.permute.xlu0 %2126  ;;  %v2478_v30 = vld [vmem:[%s5038_s3 + $0x1d8] sm:$0xff] (%p4936_p0)  }
 0x334   : > { %4514 = vst.msk [vmem:[%s5053_s15 + $0x1e8] sm:$0xf] %vm913_vm0, %v2127_v46  ;;  %v2482_v46 = vld [vmem:[%s5038_s3 + $0x1e0] sm:$0xff] (%p4936_p0)  }
 0x335   : > { %2479 = vst [vmem:[%s6420_s28 + $0x358] sm:$0xff] (%p4936_p0), %v2478_v30  }
 0x336   : > { %2483 = vst [vmem:[%s6420_s28 + $0x360] sm:$0xff] (%p4936_p0), %v2482_v46  }
 0x33a   : > { %v2129_v60 = vpop.permute.xlu1 %2128 }
 0x33b   : > { %4515 = vst.msk [vmem:[%s5053_s15 + $0x1ec] sm:$0xf] %vm913_vm0, %v2129_v60  ;;  %v2133_v13 = vpop.permute.xlu0 %2132  ;;  %v2486_v60 = vld [vmem:[%s5038_s3 + $0x1e8] sm:$0xff] (%p4936_p0)  }
 0x33c   : > { %4517 = vst.msk [vmem:[%s5053_s15 + $0x1f4] sm:$0xf] %vm913_vm0, %v2133_v13  ;;  %v2490_v13 = vld [vmem:[%s5038_s3 + $0x1f0] sm:$0xff] (%p4936_p0)  }
 0x33d   : > { %2487 = vst [vmem:[%s6420_s28 + $0x368] sm:$0xff] (%p4936_p0), %v2486_v60  }
 0x33e   : > { %2491 = vst [vmem:[%s6420_s28 + $0x370] sm:$0xff] (%p4936_p0), %v2490_v13  }
 0x33f   : > { %2217 = sbr.rel (!%p4936_p0) target bundleno = 837 (0x345), region = 40 }
 0x342   : > { %v2135_v31 = vpop.permute.xlu1 %2134 }
 0x343   : > { %4518 = vst.msk [vmem:[%s5053_s15 + $0x1f8] sm:$0xf] %vm913_vm0, %v2135_v31  ;;  %v2494_v31 = vld [vmem:[%s5038_s3 + $0x1f8] sm:$0xff] (%p4936_p0)  }
 0x344   : > { %2495 = vst [vmem:[%s6420_s28 + $0x378] sm:$0xff] %v2494_v31  }
 0x345 PF: > { %2777 = sbr.rel (!%p4936_p0) target bundleno = 909 (0x38d), region = 81  ;;  %s4526_s29 = sshll.u32 (%p4936_p0), %s4801_s18, 5  ;;  %v2802_v35 = vld [vmem:[%s5045_s13] sm:$0xff] (%p4936_p0)   ;;  %v2806_v9 = vld [vmem:[%s5045_s13 + $0x8] sm:$0xff] (%p4936_p0)   ;;  %v2810_v33 = vld [vmem:[%s5045_s13 + $0x10] sm:$0xff] (%p4936_p0)  }
 0x346   : > { %s4527_s11 = sshll.u32 (%p4936_p0), %s4805_s19, 8  ;;  %s6865_s3 = sld [smem:[#allocation14_spill]] (%p4936_p0)  ;;  %v2814_v7 = vld [vmem:[%s5045_s13 + $0x18] sm:$0xff] (%p4936_p0)   ;;  %v2818_v49 = vld [vmem:[%s5045_s13 + $0x20] sm:$0xff] (%p4936_p0)   ;;  %v2822_v18 = vld [vmem:[%s5045_s13 + $0x28] sm:$0xff] (%p4936_p0)  }
 0x347   : > { %s2783_s4 = sadd.s32 (%p4936_p0), %s4527_s11, %s4526_s29  ;;  %v2826_v6 = vld [vmem:[%s5045_s13 + $0x30] sm:$0xff] (%p4936_p0)   ;;  %v2830_v38 = vld [vmem:[%s5045_s13 + $0x38] sm:$0xff] (%p4936_p0)   ;;  %v2834_v15 = vld [vmem:[%s5045_s13 + $0x40] sm:$0xff] (%p4936_p0)  }
 0x348   : > { %s4528_s1 = sshll.u32 (%p4936_p0), %s2783_s4, 2  ;;  %v2838_v62 = vld [vmem:[%s5045_s13 + $0x48] sm:$0xff] (%p4936_p0)   ;;  %v2842_v45 = vld [vmem:[%s5045_s13 + $0x50] sm:$0xff] (%p4936_p0)   ;;  %v2846_v23 = vld [vmem:[%s5045_s13 + $0x58] sm:$0xff] (%p4936_p0)  }
 0x349   : > { %v2850_v61 = vld [vmem:[%s5045_s13 + $0x60] sm:$0xff] (%p4936_p0)   ;;  %v2854_v36 = vld [vmem:[%s5045_s13 + $0x68] sm:$0xff] (%p4936_p0)   ;;  %v2858_v26 = vld [vmem:[%s5045_s13 + $0x70] sm:$0xff] (%p4936_p0)  }
 0x34a   : > { %v2862_v19 = vld [vmem:[%s5045_s13 + $0x78] sm:$0xff]   ;;  %v2866_v14 = vld [vmem:[%s5045_s13 + $0x80] sm:$0xff]   ;;  %v2870_v54 = vld [vmem:[%s5045_s13 + $0x88] sm:$0xff]  }
 0x34b   : > { %v2874_v52 = vld [vmem:[%s5045_s13 + $0x90] sm:$0xff]   ;;  %v2878_v48 = vld [vmem:[%s5045_s13 + $0x98] sm:$0xff]   ;;  %v2882_v3 = vld [vmem:[%s5045_s13 + $0xa0] sm:$0xff]  }
 0x34c   : > { %s6557_s24 = scalar_lea.vmem %s6865_s3, %s4528_s1  ;;  %v2886_v39 = vld [vmem:[%s5045_s13 + $0xa8] sm:$0xff]   ;;  %v2890_v27 = vld [vmem:[%s5045_s13 + $0xb0] sm:$0xff]   ;;  %v2894_v28 = vld [vmem:[%s5045_s13 + $0xb8] sm:$0xff]  }
 0x34d   : > { %2803 = vst [vmem:[%s6557_s24] sm:$0xff] %v2802_v35   ;;  %v2898_v43 = vld [vmem:[%s5045_s13 + $0xc0] sm:$0xff]   ;;  %v2902_v16 = vld [vmem:[%s5045_s13 + $0xc8] sm:$0xff]   ;;  %v2906_v37 = vld [vmem:[%s5045_s13 + $0xd0] sm:$0xff]  }
 0x34e   : > { %2807 = vst [vmem:[%s6557_s24 + $0x8] sm:$0xff] %v2806_v9   ;;  %v2910_v4 = vld [vmem:[%s5045_s13 + $0xd8] sm:$0xff]   ;;  %v2914_v41 = vld [vmem:[%s5045_s13 + $0xe0] sm:$0xff]   ;;  %v2918_v42 = vld [vmem:[%s5045_s13 + $0xe8] sm:$0xff]  }
 0x34f   : > { %2811 = vst [vmem:[%s6557_s24 + $0x10] sm:$0xff] %v2810_v33   ;;  %v2922_v11 = vld [vmem:[%s5045_s13 + $0xf0] sm:$0xff]   ;;  %v2926_v44 = vld [vmem:[%s5045_s13 + $0xf8] sm:$0xff]   ;;  %v2930_v51 = vld [vmem:[%s5045_s13 + $0x100] sm:$0xff]  }
 0x350   : > { %2815 = vst [vmem:[%s6557_s24 + $0x18] sm:$0xff] %v2814_v7   ;;  %v2934_v50 = vld [vmem:[%s5045_s13 + $0x108] sm:$0xff]   ;;  %v2938_v56 = vld [vmem:[%s5045_s13 + $0x110] sm:$0xff]   ;;  %v2942_v57 = vld [vmem:[%s5045_s13 + $0x118] sm:$0xff]  }
 0x351   : > { %2819 = vst [vmem:[%s6557_s24 + $0x20] sm:$0xff] %v2818_v49   ;;  %v2946_v59 = vld [vmem:[%s5045_s13 + $0x120] sm:$0xff]   ;;  %v2950_v8 = vld [vmem:[%s5045_s13 + $0x128] sm:$0xff]   ;;  %v2954_v55 = vld [vmem:[%s5045_s13 + $0x130] sm:$0xff]  }
 0x352   : > { %2823 = vst [vmem:[%s6557_s24 + $0x28] sm:$0xff] %v2822_v18   ;;  %v2958_v63 = vld [vmem:[%s5045_s13 + $0x138] sm:$0xff]   ;;  %v2962_v20 = vld [vmem:[%s5045_s13 + $0x140] sm:$0xff]   ;;  %v2966_v34 = vld [vmem:[%s5045_s13 + $0x148] sm:$0xff]  }
 0x353   : > { %2827 = vst [vmem:[%s6557_s24 + $0x30] sm:$0xff] %v2826_v6   ;;  %v2970_v2 = vld [vmem:[%s5045_s13 + $0x150] sm:$0xff]   ;;  %v2974_v5 = vld [vmem:[%s5045_s13 + $0x158] sm:$0xff]   ;;  %v2978_v10 = vld [vmem:[%s5045_s13 + $0x160] sm:$0xff]  }
 0x354   : > { %2831 = vst [vmem:[%s6557_s24 + $0x38] sm:$0xff] %v2830_v38   ;;  %v2982_v12 = vld [vmem:[%s5045_s13 + $0x168] sm:$0xff]   ;;  %v2986_v1 = vld [vmem:[%s5045_s13 + $0x170] sm:$0xff]   ;;  %v2990_v58 = vld [vmem:[%s5045_s13 + $0x178] sm:$0xff]  }
 0x355   : > { %2835 = vst [vmem:[%s6557_s24 + $0x40] sm:$0xff] %v2834_v15   ;;  %v2994_v17 = vld [vmem:[%s5045_s13 + $0x180] sm:$0xff]   ;;  %v2998_v21 = vld [vmem:[%s5045_s13 + $0x188] sm:$0xff]   ;;  %v3002_v22 = vld [vmem:[%s5045_s13 + $0x190] sm:$0xff]  }
 0x356   : > { %2839 = vst [vmem:[%s6557_s24 + $0x48] sm:$0xff] %v2838_v62   ;;  %v3006_v32 = vld [vmem:[%s5045_s13 + $0x198] sm:$0xff]   ;;  %v3010_v25 = vld [vmem:[%s5045_s13 + $0x1a0] sm:$0xff]   ;;  %v3014_v47 = vld [vmem:[%s5045_s13 + $0x1a8] sm:$0xff]  }
 0x357   : > { %2843 = vst [vmem:[%s6557_s24 + $0x50] sm:$0xff] %v2842_v45   ;;  %v3018_v24 = vld [vmem:[%s5045_s13 + $0x1b0] sm:$0xff]   ;;  %v3022_v29 = vld [vmem:[%s5045_s13 + $0x1b8] sm:$0xff]   ;;  %v3026_v40 = vld [vmem:[%s5045_s13 + $0x1c0] sm:$0xff]  }
 0x358   : > { %2847 = vst [vmem:[%s6557_s24 + $0x58] sm:$0xff] %v2846_v23   ;;  %v3030_v53 = vld [vmem:[%s5045_s13 + $0x1c8] sm:$0xff]   ;;  %v3034_v0 = vld [vmem:[%s5045_s13 + $0x1d0] sm:$0xff]   ;;  %v3038_v30 = vld [vmem:[%s5045_s13 + $0x1d8] sm:$0xff]  }
 0x359   : > { %2851 = vst [vmem:[%s6557_s24 + $0x60] sm:$0xff] %v2850_v61   ;;  %v3042_v46 = vld [vmem:[%s5045_s13 + $0x1e0] sm:$0xff]   ;;  %v3046_v60 = vld [vmem:[%s5045_s13 + $0x1e8] sm:$0xff]   ;;  %v3050_v13 = vld [vmem:[%s5045_s13 + $0x1f0] sm:$0xff]  }
 0x35a   : > { %2855 = vst [vmem:[%s6557_s24 + $0x68] sm:$0xff] %v2854_v36   ;;  %v3054_v31 = vld [vmem:[%s5045_s13 + $0x1f8] sm:$0xff]  }
 0x35b   : > { %2859 = vst [vmem:[%s6557_s24 + $0x70] sm:$0xff] %v2858_v26  }
 0x35c   : > { %2863 = vst [vmem:[%s6557_s24 + $0x78] sm:$0xff] %v2862_v19  }
 0x35d   : > { %2867 = vst [vmem:[%s6557_s24 + $0x100] sm:$0xff] %v2866_v14  }
 0x35e   : > { %2871 = vst [vmem:[%s6557_s24 + $0x108] sm:$0xff] %v2870_v54  }
 0x35f   : > { %2875 = vst [vmem:[%s6557_s24 + $0x110] sm:$0xff] %v2874_v52  }
 0x360   : > { %2879 = vst [vmem:[%s6557_s24 + $0x118] sm:$0xff] %v2878_v48  }
 0x361   : > { %2883 = vst [vmem:[%s6557_s24 + $0x120] sm:$0xff] %v2882_v3  }
 0x362   : > { %2887 = vst [vmem:[%s6557_s24 + $0x128] sm:$0xff] %v2886_v39  }
 0x363   : > { %2891 = vst [vmem:[%s6557_s24 + $0x130] sm:$0xff] %v2890_v27  }
 0x364   : > { %2895 = vst [vmem:[%s6557_s24 + $0x138] sm:$0xff] %v2894_v28  }
 0x365   : > { %2899 = vst [vmem:[%s6557_s24 + $0x140] sm:$0xff] %v2898_v43  }
 0x366   : > { %2903 = vst [vmem:[%s6557_s24 + $0x148] sm:$0xff] %v2902_v16  }
 0x367   : > { %2907 = vst [vmem:[%s6557_s24 + $0x150] sm:$0xff] %v2906_v37  }
 0x368   : > { %2911 = vst [vmem:[%s6557_s24 + $0x158] sm:$0xff] %v2910_v4  }
 0x369   : > { %2915 = vst [vmem:[%s6557_s24 + $0x160] sm:$0xff] %v2914_v41  }
 0x36a   : > { %2919 = vst [vmem:[%s6557_s24 + $0x168] sm:$0xff] %v2918_v42  }
 0x36b   : > { %2923 = vst [vmem:[%s6557_s24 + $0x170] sm:$0xff] %v2922_v11  }
 0x36c   : > { %2927 = vst [vmem:[%s6557_s24 + $0x178] sm:$0xff] %v2926_v44  }
 0x36d   : > { %2931 = vst [vmem:[%s6557_s24 + $0x200] sm:$0xff] %v2930_v51  }
 0x36e   : > { %2935 = vst [vmem:[%s6557_s24 + $0x208] sm:$0xff] %v2934_v50  }
 0x36f   : > { %2939 = vst [vmem:[%s6557_s24 + $0x210] sm:$0xff] %v2938_v56  }
 0x370   : > { %2943 = vst [vmem:[%s6557_s24 + $0x218] sm:$0xff] %v2942_v57  }
 0x371   : > { %2947 = vst [vmem:[%s6557_s24 + $0x220] sm:$0xff] %v2946_v59  }
 0x372   : > { %2951 = vst [vmem:[%s6557_s24 + $0x228] sm:$0xff] %v2950_v8  }
 0x373   : > { %2955 = vst [vmem:[%s6557_s24 + $0x230] sm:$0xff] %v2954_v55  }
 0x374   : > { %2959 = vst [vmem:[%s6557_s24 + $0x238] sm:$0xff] %v2958_v63  }
 0x375   : > { %2963 = vst [vmem:[%s6557_s24 + $0x240] sm:$0xff] %v2962_v20  }
 0x376   : > { %2967 = vst [vmem:[%s6557_s24 + $0x248] sm:$0xff] %v2966_v34  }
 0x377   : > { %2971 = vst [vmem:[%s6557_s24 + $0x250] sm:$0xff] %v2970_v2  }
 0x378   : > { %2975 = vst [vmem:[%s6557_s24 + $0x258] sm:$0xff] %v2974_v5  }
 0x379   : > { %2979 = vst [vmem:[%s6557_s24 + $0x260] sm:$0xff] %v2978_v10  }
 0x37a   : > { %2983 = vst [vmem:[%s6557_s24 + $0x268] sm:$0xff] %v2982_v12  }
 0x37b   : > { %2987 = vst [vmem:[%s6557_s24 + $0x270] sm:$0xff] %v2986_v1  }
 0x37c   : > { %2991 = vst [vmem:[%s6557_s24 + $0x278] sm:$0xff] %v2990_v58  }
 0x37d   : > { %2995 = vst [vmem:[%s6557_s24 + $0x300] sm:$0xff] %v2994_v17  }
 0x37e   : > { %2999 = vst [vmem:[%s6557_s24 + $0x308] sm:$0xff] %v2998_v21  }
 0x37f   : > { %3003 = vst [vmem:[%s6557_s24 + $0x310] sm:$0xff] %v3002_v22  }
 0x380   : > { %3007 = vst [vmem:[%s6557_s24 + $0x318] sm:$0xff] %v3006_v32  }
 0x381   : > { %3011 = vst [vmem:[%s6557_s24 + $0x320] sm:$0xff] %v3010_v25  }
 0x382   : > { %3015 = vst [vmem:[%s6557_s24 + $0x328] sm:$0xff] %v3014_v47  }
 0x383   : > { %3019 = vst [vmem:[%s6557_s24 + $0x330] sm:$0xff] %v3018_v24  }
 0x384   : > { %3023 = vst [vmem:[%s6557_s24 + $0x338] sm:$0xff] %v3022_v29  }
 0x385   : > { %3027 = vst [vmem:[%s6557_s24 + $0x340] sm:$0xff] %v3026_v40  }
 0x386   : > { %3031 = vst [vmem:[%s6557_s24 + $0x348] sm:$0xff] %v3030_v53  }
 0x387   : > { %3035 = vst [vmem:[%s6557_s24 + $0x350] sm:$0xff] %v3034_v0  }
 0x388   : > { %3039 = vst [vmem:[%s6557_s24 + $0x358] sm:$0xff] %v3038_v30  }
 0x389   : > { %3043 = vst [vmem:[%s6557_s24 + $0x360] sm:$0xff] %v3042_v46  }
 0x38a   : > { %3047 = vst [vmem:[%s6557_s24 + $0x368] sm:$0xff] %v3046_v60  }
 0x38b   : > { %3051 = vst [vmem:[%s6557_s24 + $0x370] sm:$0xff] %v3050_v13  }
 0x38c   : > { %3055 = vst [vmem:[%s6557_s24 + $0x378] sm:$0xff] %v3054_v31  }
 0x38d PF: > { %3337 = sbr.rel (!%p4936_p0) target bundleno = 981 (0x3d5), region = 122  ;;  %s4529_s26 = sshll.u32 (%p4936_p0), %s4801_s18, 5  ;;  %v3362_v35 = vld [vmem:[%s5053_s15] sm:$0xff] (%p4936_p0)   ;;  %v3366_v9 = vld [vmem:[%s5053_s15 + $0x8] sm:$0xff] (%p4936_p0)   ;;  %v3370_v33 = vld [vmem:[%s5053_s15 + $0x10] sm:$0xff] (%p4936_p0)  }
 0x38e   : > { %s4530_s27 = sshll.u32 (%p4936_p0), %s4805_s19, 8  ;;  %s6866_s5 = sld [smem:[#allocation15_spill]] (%p4936_p0)  ;;  %v3374_v7 = vld [vmem:[%s5053_s15 + $0x18] sm:$0xff] (%p4936_p0)   ;;  %v3378_v49 = vld [vmem:[%s5053_s15 + $0x20] sm:$0xff] (%p4936_p0)   ;;  %v3382_v18 = vld [vmem:[%s5053_s15 + $0x28] sm:$0xff] (%p4936_p0)  }
 0x38f   : > { %s3343_s13 = sadd.s32 (%p4936_p0), %s4530_s27, %s4529_s26  ;;  %v3386_v6 = vld [vmem:[%s5053_s15 + $0x30] sm:$0xff] (%p4936_p0)   ;;  %v3390_v38 = vld [vmem:[%s5053_s15 + $0x38] sm:$0xff] (%p4936_p0)   ;;  %v3394_v15 = vld [vmem:[%s5053_s15 + $0x40] sm:$0xff] (%p4936_p0)  }
 0x390   : > { %s4531_s23 = sshll.u32 (%p4936_p0), %s3343_s13, 2  ;;  %v3398_v62 = vld [vmem:[%s5053_s15 + $0x48] sm:$0xff] (%p4936_p0)   ;;  %v3402_v45 = vld [vmem:[%s5053_s15 + $0x50] sm:$0xff] (%p4936_p0)   ;;  %v3406_v23 = vld [vmem:[%s5053_s15 + $0x58] sm:$0xff] (%p4936_p0)  }
 0x391   : > { %v3410_v61 = vld [vmem:[%s5053_s15 + $0x60] sm:$0xff] (%p4936_p0)   ;;  %v3414_v36 = vld [vmem:[%s5053_s15 + $0x68] sm:$0xff] (%p4936_p0)   ;;  %v3418_v26 = vld [vmem:[%s5053_s15 + $0x70] sm:$0xff] (%p4936_p0)  }
 0x392   : > { %v3422_v19 = vld [vmem:[%s5053_s15 + $0x78] sm:$0xff]   ;;  %v3426_v14 = vld [vmem:[%s5053_s15 + $0x80] sm:$0xff]   ;;  %v3430_v54 = vld [vmem:[%s5053_s15 + $0x88] sm:$0xff]  }
 0x393   : > { %v3434_v52 = vld [vmem:[%s5053_s15 + $0x90] sm:$0xff]   ;;  %v3438_v48 = vld [vmem:[%s5053_s15 + $0x98] sm:$0xff]   ;;  %v3442_v3 = vld [vmem:[%s5053_s15 + $0xa0] sm:$0xff]  }
 0x394   : > { %s6694_s6 = scalar_lea.vmem %s6866_s5, %s4531_s23  ;;  %v3446_v39 = vld [vmem:[%s5053_s15 + $0xa8] sm:$0xff]   ;;  %v3450_v27 = vld [vmem:[%s5053_s15 + $0xb0] sm:$0xff]   ;;  %v3454_v28 = vld [vmem:[%s5053_s15 + $0xb8] sm:$0xff]  }
 0x395   : > { %3363 = vst [vmem:[%s6694_s6] sm:$0xff] %v3362_v35   ;;  %v3458_v43 = vld [vmem:[%s5053_s15 + $0xc0] sm:$0xff]   ;;  %v3462_v16 = vld [vmem:[%s5053_s15 + $0xc8] sm:$0xff]   ;;  %v3466_v37 = vld [vmem:[%s5053_s15 + $0xd0] sm:$0xff]  }
 0x396   : > { %3367 = vst [vmem:[%s6694_s6 + $0x8] sm:$0xff] %v3366_v9   ;;  %v3470_v4 = vld [vmem:[%s5053_s15 + $0xd8] sm:$0xff]   ;;  %v3474_v41 = vld [vmem:[%s5053_s15 + $0xe0] sm:$0xff]   ;;  %v3478_v42 = vld [vmem:[%s5053_s15 + $0xe8] sm:$0xff]  }
 0x397   : > { %3371 = vst [vmem:[%s6694_s6 + $0x10] sm:$0xff] %v3370_v33   ;;  %v3482_v11 = vld [vmem:[%s5053_s15 + $0xf0] sm:$0xff]   ;;  %v3486_v44 = vld [vmem:[%s5053_s15 + $0xf8] sm:$0xff]   ;;  %v3490_v51 = vld [vmem:[%s5053_s15 + $0x100] sm:$0xff]  }
 0x398   : > { %3375 = vst [vmem:[%s6694_s6 + $0x18] sm:$0xff] %v3374_v7   ;;  %v3494_v50 = vld [vmem:[%s5053_s15 + $0x108] sm:$0xff]   ;;  %v3498_v56 = vld [vmem:[%s5053_s15 + $0x110] sm:$0xff]   ;;  %v3502_v57 = vld [vmem:[%s5053_s15 + $0x118] sm:$0xff]  }
 0x399   : > { %3379 = vst [vmem:[%s6694_s6 + $0x20] sm:$0xff] %v3378_v49   ;;  %v3506_v59 = vld [vmem:[%s5053_s15 + $0x120] sm:$0xff]   ;;  %v3510_v8 = vld [vmem:[%s5053_s15 + $0x128] sm:$0xff]   ;;  %v3514_v55 = vld [vmem:[%s5053_s15 + $0x130] sm:$0xff]  }
 0x39a   : > { %3383 = vst [vmem:[%s6694_s6 + $0x28] sm:$0xff] %v3382_v18   ;;  %v3518_v63 = vld [vmem:[%s5053_s15 + $0x138] sm:$0xff]   ;;  %v3522_v20 = vld [vmem:[%s5053_s15 + $0x140] sm:$0xff]   ;;  %v3526_v34 = vld [vmem:[%s5053_s15 + $0x148] sm:$0xff]  }
 0x39b   : > { %3387 = vst [vmem:[%s6694_s6 + $0x30] sm:$0xff] %v3386_v6   ;;  %v3530_v2 = vld [vmem:[%s5053_s15 + $0x150] sm:$0xff]   ;;  %v3534_v5 = vld [vmem:[%s5053_s15 + $0x158] sm:$0xff]   ;;  %v3538_v10 = vld [vmem:[%s5053_s15 + $0x160] sm:$0xff]  }
 0x39c   : > { %3391 = vst [vmem:[%s6694_s6 + $0x38] sm:$0xff] %v3390_v38   ;;  %v3542_v12 = vld [vmem:[%s5053_s15 + $0x168] sm:$0xff]   ;;  %v3546_v1 = vld [vmem:[%s5053_s15 + $0x170] sm:$0xff]   ;;  %v3550_v58 = vld [vmem:[%s5053_s15 + $0x178] sm:$0xff]  }
 0x39d   : > { %3395 = vst [vmem:[%s6694_s6 + $0x40] sm:$0xff] %v3394_v15   ;;  %v3554_v17 = vld [vmem:[%s5053_s15 + $0x180] sm:$0xff]   ;;  %v3558_v21 = vld [vmem:[%s5053_s15 + $0x188] sm:$0xff]   ;;  %v3562_v22 = vld [vmem:[%s5053_s15 + $0x190] sm:$0xff]  }
 0x39e   : > { %3399 = vst [vmem:[%s6694_s6 + $0x48] sm:$0xff] %v3398_v62   ;;  %v3566_v32 = vld [vmem:[%s5053_s15 + $0x198] sm:$0xff]   ;;  %v3570_v25 = vld [vmem:[%s5053_s15 + $0x1a0] sm:$0xff]   ;;  %v3574_v47 = vld [vmem:[%s5053_s15 + $0x1a8] sm:$0xff]  }
 0x39f   : > { %3403 = vst [vmem:[%s6694_s6 + $0x50] sm:$0xff] %v3402_v45   ;;  %v3578_v24 = vld [vmem:[%s5053_s15 + $0x1b0] sm:$0xff]   ;;  %v3582_v29 = vld [vmem:[%s5053_s15 + $0x1b8] sm:$0xff]   ;;  %v3586_v40 = vld [vmem:[%s5053_s15 + $0x1c0] sm:$0xff]  }
 0x3a0   : > { %3407 = vst [vmem:[%s6694_s6 + $0x58] sm:$0xff] %v3406_v23   ;;  %v3590_v53 = vld [vmem:[%s5053_s15 + $0x1c8] sm:$0xff]   ;;  %v3594_v0 = vld [vmem:[%s5053_s15 + $0x1d0] sm:$0xff]   ;;  %v3598_v30 = vld [vmem:[%s5053_s15 + $0x1d8] sm:$0xff]  }
 0x3a1   : > { %3411 = vst [vmem:[%s6694_s6 + $0x60] sm:$0xff] %v3410_v61   ;;  %v3602_v46 = vld [vmem:[%s5053_s15 + $0x1e0] sm:$0xff]   ;;  %v3606_v60 = vld [vmem:[%s5053_s15 + $0x1e8] sm:$0xff]   ;;  %v3610_v13 = vld [vmem:[%s5053_s15 + $0x1f0] sm:$0xff]  }
 0x3a2   : > { %3415 = vst [vmem:[%s6694_s6 + $0x68] sm:$0xff] %v3414_v36   ;;  %v3614_v31 = vld [vmem:[%s5053_s15 + $0x1f8] sm:$0xff]  }
 0x3a3   : > { %3419 = vst [vmem:[%s6694_s6 + $0x70] sm:$0xff] %v3418_v26  }
 0x3a4   : > { %3423 = vst [vmem:[%s6694_s6 + $0x78] sm:$0xff] %v3422_v19  }
 0x3a5   : > { %3427 = vst [vmem:[%s6694_s6 + $0x100] sm:$0xff] %v3426_v14  }
 0x3a6   : > { %3431 = vst [vmem:[%s6694_s6 + $0x108] sm:$0xff] %v3430_v54  }
 0x3a7   : > { %3435 = vst [vmem:[%s6694_s6 + $0x110] sm:$0xff] %v3434_v52  }
 0x3a8   : > { %3439 = vst [vmem:[%s6694_s6 + $0x118] sm:$0xff] %v3438_v48  }
 0x3a9   : > { %3443 = vst [vmem:[%s6694_s6 + $0x120] sm:$0xff] %v3442_v3  }
 0x3aa   : > { %3447 = vst [vmem:[%s6694_s6 + $0x128] sm:$0xff] %v3446_v39  }
 0x3ab   : > { %3451 = vst [vmem:[%s6694_s6 + $0x130] sm:$0xff] %v3450_v27  }
 0x3ac   : > { %3455 = vst [vmem:[%s6694_s6 + $0x138] sm:$0xff] %v3454_v28  }
 0x3ad   : > { %3459 = vst [vmem:[%s6694_s6 + $0x140] sm:$0xff] %v3458_v43  }
 0x3ae   : > { %3463 = vst [vmem:[%s6694_s6 + $0x148] sm:$0xff] %v3462_v16  }
 0x3af   : > { %3467 = vst [vmem:[%s6694_s6 + $0x150] sm:$0xff] %v3466_v37  }
 0x3b0   : > { %3471 = vst [vmem:[%s6694_s6 + $0x158] sm:$0xff] %v3470_v4  }
 0x3b1   : > { %3475 = vst [vmem:[%s6694_s6 + $0x160] sm:$0xff] %v3474_v41  }
 0x3b2   : > { %3479 = vst [vmem:[%s6694_s6 + $0x168] sm:$0xff] %v3478_v42  }
 0x3b3   : > { %3483 = vst [vmem:[%s6694_s6 + $0x170] sm:$0xff] %v3482_v11  }
 0x3b4   : > { %3487 = vst [vmem:[%s6694_s6 + $0x178] sm:$0xff] %v3486_v44  }
 0x3b5   : > { %3491 = vst [vmem:[%s6694_s6 + $0x200] sm:$0xff] %v3490_v51  }
 0x3b6   : > { %3495 = vst [vmem:[%s6694_s6 + $0x208] sm:$0xff] %v3494_v50  }
 0x3b7   : > { %3499 = vst [vmem:[%s6694_s6 + $0x210] sm:$0xff] %v3498_v56  }
 0x3b8   : > { %3503 = vst [vmem:[%s6694_s6 + $0x218] sm:$0xff] %v3502_v57  }
 0x3b9   : > { %3507 = vst [vmem:[%s6694_s6 + $0x220] sm:$0xff] %v3506_v59  }
 0x3ba   : > { %3511 = vst [vmem:[%s6694_s6 + $0x228] sm:$0xff] %v3510_v8  }
 0x3bb   : > { %3515 = vst [vmem:[%s6694_s6 + $0x230] sm:$0xff] %v3514_v55  }
 0x3bc   : > { %3519 = vst [vmem:[%s6694_s6 + $0x238] sm:$0xff] %v3518_v63  }
 0x3bd   : > { %3523 = vst [vmem:[%s6694_s6 + $0x240] sm:$0xff] %v3522_v20  }
 0x3be   : > { %3527 = vst [vmem:[%s6694_s6 + $0x248] sm:$0xff] %v3526_v34  }
 0x3bf   : > { %3531 = vst [vmem:[%s6694_s6 + $0x250] sm:$0xff] %v3530_v2  }
 0x3c0   : > { %3535 = vst [vmem:[%s6694_s6 + $0x258] sm:$0xff] %v3534_v5  }
 0x3c1   : > { %3539 = vst [vmem:[%s6694_s6 + $0x260] sm:$0xff] %v3538_v10  }
 0x3c2   : > { %3543 = vst [vmem:[%s6694_s6 + $0x268] sm:$0xff] %v3542_v12  }
 0x3c3   : > { %3547 = vst [vmem:[%s6694_s6 + $0x270] sm:$0xff] %v3546_v1  }
 0x3c4   : > { %3551 = vst [vmem:[%s6694_s6 + $0x278] sm:$0xff] %v3550_v58  }
 0x3c5   : > { %3555 = vst [vmem:[%s6694_s6 + $0x300] sm:$0xff] %v3554_v17  }
 0x3c6   : > { %3559 = vst [vmem:[%s6694_s6 + $0x308] sm:$0xff] %v3558_v21  }
 0x3c7   : > { %3563 = vst [vmem:[%s6694_s6 + $0x310] sm:$0xff] %v3562_v22  }
 0x3c8   : > { %3567 = vst [vmem:[%s6694_s6 + $0x318] sm:$0xff] %v3566_v32  }
 0x3c9   : > { %3571 = vst [vmem:[%s6694_s6 + $0x320] sm:$0xff] %v3570_v25  }
 0x3ca   : > { %3575 = vst [vmem:[%s6694_s6 + $0x328] sm:$0xff] %v3574_v47  }
 0x3cb   : > { %3579 = vst [vmem:[%s6694_s6 + $0x330] sm:$0xff] %v3578_v24  }
 0x3cc   : > { %3583 = vst [vmem:[%s6694_s6 + $0x338] sm:$0xff] %v3582_v29  }
 0x3cd   : > { %3587 = vst [vmem:[%s6694_s6 + $0x340] sm:$0xff] %v3586_v40  }
 0x3ce   : > { %3591 = vst [vmem:[%s6694_s6 + $0x348] sm:$0xff] %v3590_v53  }
 0x3cf   : > { %3595 = vst [vmem:[%s6694_s6 + $0x350] sm:$0xff] %v3594_v0  }
 0x3d0   : > { %3599 = vst [vmem:[%s6694_s6 + $0x358] sm:$0xff] %v3598_v30  }
 0x3d1   : > { %3603 = vst [vmem:[%s6694_s6 + $0x360] sm:$0xff] %v3602_v46  }
 0x3d2   : > { %3607 = vst [vmem:[%s6694_s6 + $0x368] sm:$0xff] %v3606_v60  }
 0x3d3   : > { %3611 = vst [vmem:[%s6694_s6 + $0x370] sm:$0xff] %v3610_v13  }
 0x3d4   : > { %3615 = vst [vmem:[%s6694_s6 + $0x378] sm:$0xff] %v3614_v31  }
 0x3d5 PF: > { %s19_s22 = sadd.s32 1, %s4817_s22   ;;  %s6867_s7 = sld [smem:[#allocation11_spill]] }
 0x3d6   : > { %p16_p1 = scmp.ge.s32.totalorder %s19_s22, 6   ;;  %s6868_s15 = smov %s4793_s16 }
 0x3d7   : > { %s6869_s16 = smov %s4797_s17  ;;  %s6870_s17 = smov %s4949_s8 }
 0x3d8   : > { %s6871_s18 = smov %s4809_s20  ;;  %s6872_s19 = smov %s4813_s21 }
 0x3d9   : > { %s6874_s21 = smov %s6880_s10  ;;  %18 = sbr.rel (!%p16_p1) target bundleno = 11 (0xb), region = 229 }
 0x3db   : > { %s6873_s20 = smov %s6867_s7 }
 0x3de   :  { %3921 = vsyncpa [#allocation3], 1 }
 0x3df   :  { %3923 = vsyncpa [#allocation3 + $0x1], 1 }
 0x3e0   :  { %3924 = vsyncpa [#allocation5], 1 }

</bundles_post_ra>
